<compile_context>
chip_gen: v5e
topology: v5e:2x2
jax: 0.10.0
libtpu: 0.0.40
codegen_flags: <defaults>
</compile_context>

<pallas_src>
import functools

import jax
import jax.numpy as jnp
import numpy as np
from jax.experimental import pallas as pl
from jax.experimental.pallas import tpu as pltpu


_GRU_VMEM_BUDGET = 40 * 1024 * 1024   # tile-sizing budget (fits v7x's 64 MiB)
_GRU_VMEM_LIMIT = 48 * 1024 * 1024
_HEAD_VMEM_BUDGET = 24 * 1024 * 1024
_HEAD_VMEM_LIMIT = 48 * 1024 * 1024


def _round_up(x, m):
    return ((x + m - 1) // m) * m


# ----------------------------------------------------------------------------
# Tiling helpers (VMEM-budget aware)
# ----------------------------------------------------------------------------
def _pick_time_chunk(T, Bp, in_dim, H, budget_bytes=_GRU_VMEM_BUDGET, target=128):
    """Largest chunk <= target that divides T, keeps bf16 blocks 16-row aligned
    (unless the block is the full array) and fits the VMEM budget."""
    smallest_valid = T
    for tc in range(min(T, target), 0, -1):
        if T % tc:
            continue
        if tc != T and (tc * Bp) % 16:
            continue
        smallest_valid = tc
        rows = tc * Bp
        foot = (2 * 2 * rows * in_dim * 2          # x chunks: 2 dirs, 2 buffers, bf16
                + 2 * 2 * rows * H * 2             # out chunks: 2 dirs, 2 buffers, bf16
                + 2 * rows * 3 * H * 4             # gx scratch, f32
                + 2 * rows * H * 4                 # f32 output staging scratch
                + 2 * 2 * (in_dim + H) * 3 * H * 4)  # weight buffers (upper bound)
        if foot <= budget_bytes:
            return tc
    return smallest_valid


def _pick_vocab_tile(V, H, Bp, budget_bytes=_HEAD_VMEM_BUDGET, target=8192):
    """128-aligned vocab tile sized for the VMEM budget (V gets padded to it)."""
    t = max(128, min(target, _round_up(V, 128)))
    t -= t % 128
    while t > 128 and 2 * (H * t * 2 + Bp * t * 4 + t * 4) > budget_bytes:
        t -= 128
    return max(t, 128)


# ----------------------------------------------------------------------------
# Fused bidirectional GRU layer kernel
#   grid = (time_chunk,) ["arbitrary"]; fwd and bwd recurrences are interleaved
#   in the same in-kernel loop (two independent latency chains).
# ----------------------------------------------------------------------------
def make_bigru_kernel(H, tc, Bp, unroll):
    def kernel(xf_ref, xb_ref, win_ref, whh_ref, bgx_ref, bhn_ref,
               outf_ref, outb_ref,
               hf_ref, hb_ref, gxf_ref, gxb_ref, of_ref, ob_ref):
        i = pl.program_id(0)

        @pl.when(i == 0)
        def _():
            hf_ref[...] = jnp.zeros_like(hf_ref)
            hb_ref[...] = jnp.zeros_like(hb_ref)

        # Hoisted per-chunk input projections (bf16 MXU operands, f32 accumulate).
        # TODO(synk): double-buffer gx and issue chunk i+1's projection before
        # chunk i's recurrence so the projection is fully hidden behind the loop.
        gxf_ref[...] = (jnp.dot(xf_ref[...], win_ref[0],
                                preferred_element_type=jnp.float32) + bgx_ref[0])
        gxb_ref[...] = (jnp.dot(xb_ref[...], win_ref[1],
                                preferred_element_type=jnp.float32) + bgx_ref[1])

        whh_f = whh_ref[0]     # (H, 3H) f32
        whh_b = whh_ref[1]
        bhn_f = bhn_ref[0]     # (1, H)  n-gate hidden bias only
        bhn_b = bhn_ref[1]

        def cell(gxt, h, whh, bhn):
            gh = jnp.dot(h, whh, preferred_element_type=jnp.float32)
            r = jax.nn.sigmoid(gxt[:, 0:H] + gh[:, 0:H])
            z = jax.nn.sigmoid(gxt[:, H:2 * H] + gh[:, H:2 * H])
            n = jnp.tanh(gxt[:, 2 * H:3 * H] + r * (gh[:, 2 * H:3 * H] + bhn))
            return (1.0 - z) * n + z * h

        def step(j, carry):
            hf, hb = carry
            rf = pl.multiple_of(j * Bp, Bp)                 # fwd local time j
            rb = pl.multiple_of((tc - 1 - j) * Bp, Bp)      # bwd local time tc-1-j
            hf = cell(gxf_ref[pl.ds(rf, Bp), :], hf, whh_f, bhn_f)
            hb = cell(gxb_ref[pl.ds(rb, Bp), :], hb, whh_b, bhn_b)
            of_ref[pl.ds(rf, Bp), :] = hf                   # full 8-row f32 tiles
            ob_ref[pl.ds(rb, Bp), :] = hb
            return hf, hb

        hf, hb = jax.lax.fori_loop(0, tc, step,
                                   (hf_ref[...], hb_ref[...]), unroll=unroll)
        hf_ref[...] = hf
        hb_ref[...] = hb

        # One dense bulk cast/store per chunk (keeps bf16 packing off the
        # serial critical path).
        outf_ref[...] = of_ref[...].astype(outf_ref.dtype)
        outb_ref[...] = ob_ref[...].astype(outb_ref.dtype)

    return kernel


def run_bigru_layer(x2d, win, whh, bgx, bhn, H, T, Bp):
    """x2d: (T*Bp, IN) time-major bf16 -> (out_fwd, out_bwd) each (T*Bp, H) bf16."""
    rows, IN = x2d.shape
    assert rows == T * Bp
    tc = _pick_time_chunk(T, Bp, IN, H)
    nc = T // tc
    unroll = True if tc <= 32 else 8
    kernel = make_bigru_kernel(H, tc, Bp, unroll)

    fwd_map = lambda i: (i, 0)
    bwd_map = lambda i: (nc - 1 - i, 0)
    const3 = lambda i: (0, 0, 0)

    outf, outb = pl.pallas_call(
        kernel,
        out_shape=(jax.ShapeDtypeStruct((rows, H), jnp.bfloat16),
                   jax.ShapeDtypeStruct((rows, H), jnp.bfloat16)),
        grid_spec=pltpu.PrefetchScalarGridSpec(
            num_scalar_prefetch=0,
            grid=(nc,),
            in_specs=[
                pl.BlockSpec((tc * Bp, IN), fwd_map),      # x chunk, fwd order (bf16)
                pl.BlockSpec((tc * Bp, IN), bwd_map),      # x chunk, bwd order (bf16)
                pl.BlockSpec((2, IN, 3 * H), const3),      # W_in, both dirs (bf16)
                pl.BlockSpec((2, H, 3 * H), const3),       # W_hh, both dirs (f32)
                pl.BlockSpec((2, 1, 3 * H), const3),       # folded projection bias
                pl.BlockSpec((2, 1, H), const3),           # n-gate hidden bias
            ],
            out_specs=(pl.BlockSpec((tc * Bp, H), fwd_map),
                       pl.BlockSpec((tc * Bp, H), bwd_map)),
            scratch_shapes=[
                pltpu.VMEM((Bp, H), jnp.float32),            # h fwd
                pltpu.VMEM((Bp, H), jnp.float32),            # h bwd
                pltpu.VMEM((tc * Bp, 3 * H), jnp.float32),   # gx fwd
                pltpu.VMEM((tc * Bp, 3 * H), jnp.float32),   # gx bwd
                pltpu.VMEM((tc * Bp, H), jnp.float32),       # out staging fwd (f32)
                pltpu.VMEM((tc * Bp, H), jnp.float32),       # out staging bwd (f32)
            ],
        ),
        compiler_params=pltpu.CompilerParams(
            dimension_semantics=("arbitrary",),
            vmem_limit_bytes=_GRU_VMEM_LIMIT),
    )(x2d, x2d, win, whh, bgx, bhn)
    return outf, outb


# ----------------------------------------------------------------------------
# Head kernels.
#   1) latent_kernel: hidden2mean / hidden2logv / reparam / latent2ARe (tiny).
#   2) vocab_kernel:  output2vocab, vocab-tiled, grid axis "parallel".
# ----------------------------------------------------------------------------
def latent_kernel(h_ref, noise_ref, wm_ref, bm_ref, wv_ref, bv_ref,
                  wl_ref, bl_ref, mean_ref, logv_ref, s_ref, areh_ref):
    h = h_ref[...]                                                   # (Bp, 2H)
    mean = jnp.dot(h, wm_ref[...],
                   preferred_element_type=jnp.float32) + bm_ref[...]
    logv = jnp.dot(h, wv_ref[...],
                   preferred_element_type=jnp.float32) + bv_ref[...]
    s = noise_ref[...] * jnp.exp(0.5 * logv) + mean                  # (Bp, L)
    areh = jnp.dot(s, wl_ref[...],
                   preferred_element_type=jnp.float32) + bl_ref[...]
    mean_ref[...] = mean
    logv_ref[...] = logv
    s_ref[...] = s
    areh_ref[...] = areh.astype(areh_ref.dtype)                      # bf16 out


def vocab_kernel(areh_ref, wo_ref, bo_ref, logits_ref):
    logits_ref[...] = (jnp.dot(areh_ref[...], wo_ref[...],
                               preferred_element_type=jnp.float32)
                       + bo_ref[...])


def run_head(last_hidden_p, noise_p, prep, Bp):
    H2 = last_hidden_p.shape[1]
    L = prep["wm"].shape[1]
    H = prep["wl"].shape[1]
    Vp = prep["vocab_padded"]
    tV = prep["vocab_tile"]
    nV = Vp // tV

    c2 = lambda i: (0, 0)
    mean, logv, s, areh = pl.pallas_call(
        latent_kernel,
        out_shape=(jax.ShapeDtypeStruct((Bp, L), jnp.float32),
                   jax.ShapeDtypeStruct((Bp, L), jnp.float32),
                   jax.ShapeDtypeStruct((Bp, L), jnp.float32),
                   jax.ShapeDtypeStruct((Bp, H), jnp.bfloat16)),
        grid_spec=pltpu.PrefetchScalarGridSpec(
            num_scalar_prefetch=0,
            grid=(1,),
            in_specs=[
                pl.BlockSpec((Bp, H2), c2), pl.BlockSpec((Bp, L), c2),
                pl.BlockSpec((H2, L), c2), pl.BlockSpec((1, L), c2),
                pl.BlockSpec((H2, L), c2), pl.BlockSpec((1, L), c2),
                pl.BlockSpec((L, H), c2), pl.BlockSpec((1, H), c2),
            ],
            out_specs=(pl.BlockSpec((Bp, L), c2), pl.BlockSpec((Bp, L), c2),
                       pl.BlockSpec((Bp, L), c2), pl.BlockSpec((Bp, H), c2)),
        ),
        compiler_params=pltpu.CompilerParams(
            dimension_semantics=("arbitrary",)),
    )(last_hidden_p, noise_p, prep["wm"], prep["bm"], prep["wv"], prep["bv"],
      prep["wl"], prep["bl"])

    logits = pl.pallas_call(
        vocab_kernel,
        out_shape=jax.ShapeDtypeStruct((Bp, Vp), jnp.float32),
        grid_spec=pltpu.PrefetchScalarGridSpec(
            num_scalar_prefetch=0,
            grid=(nV,),
            in_specs=[
                pl.BlockSpec((Bp, H), lambda j: (0, 0)),   # ARe_hidden (bf16)
                pl.BlockSpec((H, tV), lambda j: (0, j)),   # w_out2vocab tile (bf16)
                pl.BlockSpec((1, tV), lambda j: (0, j)),   # bias tile (f32)
            ],
            out_specs=pl.BlockSpec((Bp, tV), lambda j: (0, j)),
        ),
        compiler_params=pltpu.CompilerParams(
            dimension_semantics=("parallel",),
            vmem_limit_bytes=_HEAD_VMEM_LIMIT),
    )(areh, prep["wo"], prep["bo"])

    return logits, mean, logv, s


# ----------------------------------------------------------------------------
# One-time parameter preparation (transposes / casts / bias folding / padding
# happen here, OUTSIDE the per-call forward).
# ----------------------------------------------------------------------------
def prepare_params(params, batch_hint=8):
    H = params["hidden_size"]
    num_layers = params["num_layers"]
    prep = {
        "hidden_size": H,
        "num_layers": num_layers,
        "embedding": params["embedding"].astype(jnp.bfloat16),
    }
    for l in range(num_layers):
        wins, whhs, bgxs, bhns = [], [], [], []
        for sfx in ("", "_rev"):
            w_ih = params[f"gru_w_ih_l{l}{sfx}"]
            w_hh = params[f"gru_w_hh_l{l}{sfx}"]
            b_ih = params[f"gru_b_ih_l{l}{sfx}"]
            b_hh = params[f"gru_b_hh_l{l}{sfx}"]
            wins.append(jnp.transpose(w_ih).astype(jnp.bfloat16))     # (IN, 3H)
            whhs.append(jnp.transpose(w_hh).astype(jnp.float32))      # (H, 3H)
            # Fold b_ih (all gates) + b_hh (r,z gates) into the projection bias.
            bgxs.append(jnp.concatenate(
                [b_ih[0:H] + b_hh[0:H],
                 b_ih[H:2 * H] + b_hh[H:2 * H],
                 b_ih[2 * H:3 * H]]).reshape(1, 3 * H).astype(jnp.float32))
            bhns.append(b_hh[2 * H:3 * H].reshape(1, H).astype(jnp.float32))
        prep[f"win_l{l}"] = jnp.stack(wins)     # (2, IN, 3H) bf16
        prep[f"whh_l{l}"] = jnp.stack(whhs)     # (2, H, 3H)  f32
        prep[f"bgx_l{l}"] = jnp.stack(bgxs)     # (2, 1, 3H)  f32
        prep[f"bhn_l{l}"] = jnp.stack(bhns)     # (2, 1, H)   f32

    V = params["w_out2vocab"].shape[0]
    L = params["w_mean"].shape[0]
    Bp_hint = _round_up(max(batch_hint, 1), 8)
    tV = _pick_vocab_tile(V, H, Bp_hint)
    Vp = _round_up(V, tV)
    wo = jnp.transpose(params["w_out2vocab"]).astype(jnp.bfloat16)    # (H, V)
    bo = params["b_out2vocab"].reshape(1, V).astype(jnp.float32)
    if Vp != V:
        wo = jnp.pad(wo, ((0, 0), (0, Vp - V)))
        bo = jnp.pad(bo, ((0, 0), (0, Vp - V)))
    prep.update(
        vocab_size=V, vocab_padded=Vp, vocab_tile=tV, latent_size=L,
        wm=params["w_mean"].T.astype(jnp.float32),
        bm=params["b_mean"].reshape(1, L).astype(jnp.float32),
        wv=params["w_logv"].T.astype(jnp.float32),
        bv=params["b_logv"].reshape(1, L).astype(jnp.float32),
        wl=params["w_lat2are"].T.astype(jnp.float32),
        bl=params["b_lat2are"].reshape(1, H).astype(jnp.float32),
        wo=wo, bo=bo)
    return prep


# ----------------------------------------------------------------------------
# Full REVIEWDI forward
# ----------------------------------------------------------------------------
def reviewdi_forward(prep, input_sequence, user_ids, length, noise):
    del user_ids  # unused in the reference forward pass
    B, T = input_sequence.shape
    H = prep["hidden_size"]
    num_layers = prep["num_layers"]
    Bp = _round_up(B, 8)   # pad batch to full sublane groups

    # Embedding gather emitted directly in time-major (T, B, E); pad batch.
    # Dropout is identity (eval mode).
    emb = jnp.take(prep["embedding"], input_sequence.T, axis=0)       # (T, B, E) bf16
    x = jnp.pad(emb, ((0, 0), (0, Bp - B), (0, 0)))                   # (T, Bp, E)

    outf = outb = None
    for l in range(num_layers):
        outf, outb = run_bigru_layer(
            x.reshape(T * Bp, x.shape[-1]),
            prep[f"win_l{l}"], prep[f"whh_l{l}"],
            prep[f"bgx_l{l}"], prep[f"bhn_l{l}"],
            H, T, Bp)                                                 # (T*Bp, H) x2
        if l + 1 < num_layers:
            # TODO(synk): feed the fwd/bwd streams separately into the next
            # layer's fused projection instead of materializing this concat.
            x = jnp.concatenate([outf.reshape(T, Bp, H),
                                 outb.reshape(T, Bp, H)], axis=-1)

    outf = outf.reshape(T, Bp, H)
    outb = outb.reshape(T, Bp, H)

    # last_en_hidden = encoder_outputs[arange(B), length-1, :] (tiny gather;
    # fwd/bwd halves gathered separately — the (B,T,2H) concat never exists).
    idx = (length - 1).astype(jnp.int32)
    b_idx = jnp.arange(B)
    last_hidden = jnp.concatenate(
        [outf[idx, b_idx, :], outb[idx, b_idx, :]], axis=-1).astype(jnp.float32)
    last_hidden_p = jnp.pad(last_hidden, ((0, Bp - B), (0, 0)))       # (Bp, 2H)
    noise_p = jnp.pad(noise.astype(jnp.float32), ((0, Bp - B), (0, 0)))

    logits, mean, logv, s = run_head(last_hidden_p, noise_p, prep, Bp)
    V = prep["vocab_size"]
    return logits[:B, :V], mean[:B], logv[:B], s[:B]


# ----------------------------------------------------------------------------
# Pure-JAX f32 reference (correctness check only)
# ----------------------------------------------------------------------------
def _ref_gru_dir(x_bte, w_ih, w_hh, b_ih, b_hh, reverse):
    B, T, _ = x_bte.shape
    H = w_hh.shape[1]
    h = jnp.zeros((B, H), jnp.float32)
    outs = [None] * T
    ts = range(T - 1, -1, -1) if reverse else range(T)
    for t in ts:
        xt = x_bte[:, t, :]
        gx = xt @ w_ih.T + b_ih
        gh = h @ w_hh.T + b_hh
        r = jax.nn.sigmoid(gx[:, :H] + gh[:, :H])
        z = jax.nn.sigmoid(gx[:, H:2 * H] + gh[:, H:2 * H])
        n = jnp.tanh(gx[:, 2 * H:] + r * gh[:, 2 * H:])
        h = (1 - z) * n + z * h
        outs[t] = h
    return jnp.stack(outs, axis=1)


def reviewdi_forward_ref(params, input_sequence, user_ids, length, noise):
    del user_ids
    B, T = input_sequence.shape
    x = jnp.take(params["embedding"], input_sequence, axis=0).astype(jnp.float32)
    for l in range(params["num_layers"]):
        f = _ref_gru_dir(x, params[f"gru_w_ih_l{l}"], params[f"gru_w_hh_l{l}"],
                         params[f"gru_b_ih_l{l}"], params[f"gru_b_hh_l{l}"], False)
        b = _ref_gru_dir(x, params[f"gru_w_ih_l{l}_rev"], params[f"gru_w_hh_l{l}_rev"],
                         params[f"gru_b_ih_l{l}_rev"], params[f"gru_b_hh_l{l}_rev"], True)
        x = jnp.concatenate([f, b], axis=-1)
    last_hidden = x[jnp.arange(B), (length - 1).astype(jnp.int32), :]
    mean = last_hidden @ params["w_mean"].T + params["b_mean"]
    logv = last_hidden @ params["w_logv"].T + params["b_logv"]
    s = noise * jnp.exp(0.5 * logv) + mean
    are_h = s @ params["w_lat2are"].T + params["b_lat2are"]
    logits = are_h @ params["w_out2vocab"].T + params["b_out2vocab"]
    return logits, mean, logv, s


# ----------------------------------------------------------------------------
# Deterministic parameter init (synthetic; no checkpoint load)
# ----------------------------------------------------------------------------
def init_params(key, vocab_size, user_size, embedding_size, hidden_size,
                latent_size, num_layers):
    keys = iter(jax.random.split(key, 64))
    u = lambda k, shape, s: jax.random.uniform(k, shape, jnp.float32, -s, s)
    H, E, L, V = hidden_size, embedding_size, latent_size, vocab_size
    sc = 1.0 / np.sqrt(H)

    params = {
        "hidden_size": H,
        "num_layers": num_layers,
        "embedding": jax.random.normal(next(keys), (V, E), jnp.float32) * 0.1,
        # m_user_embedding exists in __init__ but is unused in forward.
        "user_embedding": jax.random.normal(next(keys), (user_size, L), jnp.float32) * 0.1,
        "w_mean": u(next(keys), (L, 2 * H), sc), "b_mean": u(next(keys), (L,), sc),
        "w_logv": u(next(keys), (L, 2 * H), sc), "b_logv": u(next(keys), (L,), sc),
        "w_lat2are": u(next(keys), (H, L), sc), "b_lat2are": u(next(keys), (H,), sc),
        "w_out2vocab": u(next(keys), (V, H), sc), "b_out2vocab": u(next(keys), (V,), sc),
    }
    for l in range(num_layers):
        in_dim = E if l == 0 else 2 * H
        for suffix in ("", "_rev"):
            params[f"gru_w_ih_l{l}{suffix}"] = u(next(keys), (3 * H, in_dim), sc)
            params[f"gru_w_hh_l{l}{suffix}"] = u(next(keys), (3 * H, H), sc)
            params[f"gru_b_ih_l{l}{suffix}"] = u(next(keys), (3 * H,), sc)
            params[f"gru_b_hh_l{l}{suffix}"] = u(next(keys), (3 * H,), sc)
    return params


if __name__ == "__main__":
    # Small, module-consistent shapes.
    B, T = 2, 8
    VOCAB, USERS = 128, 8
    E, H, L = 32, 32, 16
    NUM_LAYERS = 1

    key = jax.random.PRNGKey(0)
    k_par, k_tok, k_user, k_noise = jax.random.split(key, 4)

    params = init_params(k_par, VOCAB, USERS, E, H, L, NUM_LAYERS)
    prep = prepare_params(params, batch_hint=B)   # one-time weight prep

    input_sequence = jax.random.randint(k_tok, (B, T), 0, VOCAB, dtype=jnp.int32)
    user_ids = jax.random.randint(k_user, (B,), 0, USERS, dtype=jnp.int32)
    length = jnp.array([T, T - 3], dtype=jnp.int32)
    noise = jax.random.normal(k_noise, (B, L), jnp.float32)  # torch.randn_like

    fwd = jax.jit(functools.partial(reviewdi_forward, prep))
    logits, s_mean, s_logv, s = fwd(input_sequence, user_ids, length, noise)
    jax.block_until_ready((logits, s_mean, s_logv, s))

    # Correctness check against a pure-JAX f32 reference of the same math.
    r_logits, r_mean, r_logv, r_s = reviewdi_forward_ref(
        params, input_sequence, user_ids, length, noise)
    np.testing.assert_allclose(np.asarray(logits), np.asarray(r_logits), atol=2e-3, rtol=2e-3)
    np.testing.assert_allclose(np.asarray(s_mean), np.asarray(r_mean), atol=2e-3, rtol=2e-3)
    np.testing.assert_allclose(np.asarray(s_logv), np.asarray(r_logv), atol=2e-3, rtol=2e-3)
    np.testing.assert_allclose(np.asarray(s), np.asarray(r_s), atol=2e-3, rtol=2e-3)

    assert logits.shape == (B, VOCAB) and s.shape == (B, L)
    print("KERNEL_OK")
</pallas_src>

<mosaic_0001>
module attributes {stable_mosaic.version = 11 : i64} {
  func.func @kernel(%arg0: i32, %arg1: memref<64x32xbf16, #tpu.memory_space<vmem>>, %arg2: memref<64x32xbf16, #tpu.memory_space<vmem>>, %arg3: memref<2x32x96xbf16, #tpu.memory_space<vmem>>, %arg4: memref<2x32x96xf32, #tpu.memory_space<vmem>>, %arg5: memref<2x1x96xf32, #tpu.memory_space<vmem>>, %arg6: memref<2x1x32xf32, #tpu.memory_space<vmem>>, %arg7: memref<64x32xbf16, #tpu.memory_space<vmem>>, %arg8: memref<64x32xbf16, #tpu.memory_space<vmem>>, %arg9: memref<8x32xf32, #tpu.memory_space<vmem>>, %arg10: memref<8x32xf32, #tpu.memory_space<vmem>>, %arg11: memref<64x96xf32, #tpu.memory_space<vmem>>, %arg12: memref<64x96xf32, #tpu.memory_space<vmem>>, %arg13: memref<64x32xf32, #tpu.memory_space<vmem>>, %arg14: memref<64x32xf32, #tpu.memory_space<vmem>>) attributes {dimension_semantics = [#tpu.dimension_semantics<arbitrary>], iteration_bounds = array<i64: 1>, scalar_prefetch = 0 : i64, scratch_operands = 6 : i64, tpu.core_type = #tpu.core_type<tc>, window_params = [{transform_indices = @transform_0, window_bounds = array<i64: 64, 32>}, {transform_indices = @transform_1, window_bounds = array<i64: 64, 32>}, {pipeline_mode = #tpu.pipeline_mode<synchronous>, transform_indices = @transform_2, window_bounds = array<i64: 2, 32, 96>}, {pipeline_mode = #tpu.pipeline_mode<synchronous>, transform_indices = @transform_3, window_bounds = array<i64: 2, 32, 96>}, {pipeline_mode = #tpu.pipeline_mode<synchronous>, transform_indices = @transform_4, window_bounds = array<i64: 2, 1, 96>}, {pipeline_mode = #tpu.pipeline_mode<synchronous>, transform_indices = @transform_5, window_bounds = array<i64: 2, 1, 32>}, {transform_indices = @transform_6, window_bounds = array<i64: 64, 32>}, {transform_indices = @transform_7, window_bounds = array<i64: 64, 32>}]} {
    %c0_i32 = arith.constant 0 : i32
    %0 = arith.cmpi eq, %arg0, %c0_i32 : i32
    %1 = arith.extui %0 : i1 to i32
    %c0_i32_0 = arith.constant 0 : i32
    %2 = arith.cmpi ne, %1, %c0_i32_0 : i32
    scf.if %2 {
      %cst_169 = arith.constant 0.000000e+00 : f32
      %607 = vector.broadcast %cst_169 : f32 to vector<8x32xf32>
      %c0_170 = arith.constant 0 : index
      %c0_171 = arith.constant 0 : index
      %608 = vector.load %arg9[%c0_170, %c0_171] : memref<8x32xf32, #tpu.memory_space<vmem>>, vector<8x32xf32>
      tpu.vector_store %arg9[%c0_170, %c0_171], %607 {strides = array<i32>} : memref<8x32xf32, #tpu.memory_space<vmem>>, vector<8x32xf32>,
      %cst_172 = arith.constant 0.000000e+00 : f32
      %609 = vector.broadcast %cst_172 : f32 to vector<8x32xf32>
      %c0_173 = arith.constant 0 : index
      %c0_174 = arith.constant 0 : index
      %610 = vector.load %arg10[%c0_173, %c0_174] : memref<8x32xf32, #tpu.memory_space<vmem>>, vector<8x32xf32>
      tpu.vector_store %arg10[%c0_173, %c0_174], %609 {strides = array<i32>} : memref<8x32xf32, #tpu.memory_space<vmem>>, vector<8x32xf32>,
    } else {
    }
    %c0 = arith.constant 0 : index
    %c0_1 = arith.constant 0 : index
    %3 = vector.load %arg1[%c0, %c0_1] : memref<64x32xbf16, #tpu.memory_space<vmem>>, vector<64x32xbf16>
    %c0_2 = arith.constant 0 : index
    %c0_3 = arith.constant 0 : index
    %c0_4 = arith.constant 0 : index
    %4 = vector.load %arg3[%c0_2, %c0_3, %c0_4] : memref<2x32x96xbf16, #tpu.memory_space<vmem>>, vector<1x32x96xbf16>
    %5 = vector.shape_cast %4 : vector<1x32x96xbf16> to vector<32x96xbf16>
    %cst = arith.constant dense<0.000000e+00> : vector<64x96xf32>
    %6 = tpu.matmul %3, %5, %cst {dimension_numbers = #tpu.dot_dimension_numbers<[1], [0], [0], [1], [0, 0, 1, 1], [], []>} : vector<64x32xbf16>, vector<32x96xbf16>, vector<64x96xf32> -> vector<64x96xf32>
    %c0_5 = arith.constant 0 : index
    %c0_6 = arith.constant 0 : index
    %c0_7 = arith.constant 0 : index
    %7 = vector.load %arg5[%c0_5, %c0_6, %c0_7] : memref<2x1x96xf32, #tpu.memory_space<vmem>>, vector<1x1x96xf32>
    %8 = vector.shape_cast %7 : vector<1x1x96xf32> to vector<1x96xf32>
    %9 = vector.broadcast %8 : vector<1x96xf32> to vector<64x96xf32>
    %10 = arith.addf %6, %9 : vector<64x96xf32>
    %c0_8 = arith.constant 0 : index
    %c0_9 = arith.constant 0 : index
    %11 = vector.load %arg11[%c0_8, %c0_9] : memref<64x96xf32, #tpu.memory_space<vmem>>, vector<64x96xf32>
    tpu.vector_store %arg11[%c0_8, %c0_9], %10 {strides = array<i32>} : memref<64x96xf32, #tpu.memory_space<vmem>>, vector<64x96xf32>,
    %c0_10 = arith.constant 0 : index
    %c0_11 = arith.constant 0 : index
    %12 = vector.load %arg2[%c0_10, %c0_11] : memref<64x32xbf16, #tpu.memory_space<vmem>>, vector<64x32xbf16>
    %c1 = arith.constant 1 : index
    %c0_12 = arith.constant 0 : index
    %c0_13 = arith.constant 0 : index
    %13 = vector.load %arg3[%c1, %c0_12, %c0_13] : memref<2x32x96xbf16, #tpu.memory_space<vmem>>, vector<1x32x96xbf16>
    %14 = vector.shape_cast %13 : vector<1x32x96xbf16> to vector<32x96xbf16>
    %cst_14 = arith.constant dense<0.000000e+00> : vector<64x96xf32>
    %15 = tpu.matmul %12, %14, %cst_14 {dimension_numbers = #tpu.dot_dimension_numbers<[1], [0], [0], [1], [0, 0, 1, 1], [], []>} : vector<64x32xbf16>, vector<32x96xbf16>, vector<64x96xf32> -> vector<64x96xf32>
    %c1_15 = arith.constant 1 : index
    %c0_16 = arith.constant 0 : index
    %c0_17 = arith.constant 0 : index
    %16 = vector.load %arg5[%c1_15, %c0_16, %c0_17] : memref<2x1x96xf32, #tpu.memory_space<vmem>>, vector<1x1x96xf32>
    %17 = vector.shape_cast %16 : vector<1x1x96xf32> to vector<1x96xf32>
    %18 = vector.broadcast %17 : vector<1x96xf32> to vector<64x96xf32>
    %19 = arith.addf %15, %18 : vector<64x96xf32>
    %c0_18 = arith.constant 0 : index
    %c0_19 = arith.constant 0 : index
    %20 = vector.load %arg12[%c0_18, %c0_19] : memref<64x96xf32, #tpu.memory_space<vmem>>, vector<64x96xf32>
    tpu.vector_store %arg12[%c0_18, %c0_19], %19 {strides = array<i32>} : memref<64x96xf32, #tpu.memory_space<vmem>>, vector<64x96xf32>,
    %c0_20 = arith.constant 0 : index
    %c0_21 = arith.constant 0 : index
    %c0_22 = arith.constant 0 : index
    %21 = vector.load %arg4[%c0_20, %c0_21, %c0_22] : memref<2x32x96xf32, #tpu.memory_space<vmem>>, vector<1x32x96xf32>
    %22 = vector.shape_cast %21 : vector<1x32x96xf32> to vector<32x96xf32>
    %c1_23 = arith.constant 1 : index
    %c0_24 = arith.constant 0 : index
    %c0_25 = arith.constant 0 : index
    %23 = vector.load %arg4[%c1_23, %c0_24, %c0_25] : memref<2x32x96xf32, #tpu.memory_space<vmem>>, vector<1x32x96xf32>
    %24 = vector.shape_cast %23 : vector<1x32x96xf32> to vector<32x96xf32>
    %c0_26 = arith.constant 0 : index
    %c0_27 = arith.constant 0 : index
    %c0_28 = arith.constant 0 : index
    %25 = vector.load %arg6[%c0_26, %c0_27, %c0_28] : memref<2x1x32xf32, #tpu.memory_space<vmem>>, vector<1x1x32xf32>
    %26 = vector.shape_cast %25 : vector<1x1x32xf32> to vector<1x32xf32>
    %c1_29 = arith.constant 1 : index
    %c0_30 = arith.constant 0 : index
    %c0_31 = arith.constant 0 : index
    %27 = vector.load %arg6[%c1_29, %c0_30, %c0_31] : memref<2x1x32xf32, #tpu.memory_space<vmem>>, vector<1x1x32xf32>
    %28 = vector.shape_cast %27 : vector<1x1x32xf32> to vector<1x32xf32>
    %c0_32 = arith.constant 0 : index
    %c0_33 = arith.constant 0 : index
    %29 = vector.load %arg9[%c0_32, %c0_33] : memref<8x32xf32, #tpu.memory_space<vmem>>, vector<8x32xf32>
    %c0_34 = arith.constant 0 : index
    %c0_35 = arith.constant 0 : index
    %30 = vector.load %arg10[%c0_34, %c0_35] : memref<8x32xf32, #tpu.memory_space<vmem>>, vector<8x32xf32>
    %c0_i32_36 = arith.constant 0 : i32
    %c8_i32 = arith.constant 8 : i32
    %31 = arith.muli %c0_i32_36, %c8_i32 : i32
    %32 = tpu.assume_multiple %31, 8 : i32
    %c7_i32 = arith.constant 7 : i32
    %33 = arith.subi %c7_i32, %c0_i32_36 : i32
    %c8_i32_37 = arith.constant 8 : i32
    %34 = arith.muli %33, %c8_i32_37 : i32
    %35 = tpu.assume_multiple %34, 8 : i32
    %36 = arith.index_cast %32 : i32 to index
    %c0_38 = arith.constant 0 : index
    %37 = vector.load %arg11[%36, %c0_38] : memref<64x96xf32, #tpu.memory_space<vmem>>, vector<8x96xf32>
    %cst_39 = arith.constant dense<0.000000e+00> : vector<8x96xf32>
    %38 = tpu.matmul %29, %22, %cst_39 {dimension_numbers = #tpu.dot_dimension_numbers<[1], [0], [0], [1], [0, 0, 1, 1], [], []>} : vector<8x32xf32>, vector<32x96xf32>, vector<8x96xf32> -> vector<8x96xf32>
    %39 = vector.extract_strided_slice %37 {offsets = [0, 0], sizes = [8, 32], strides = [1, 1]} : vector<8x96xf32> to vector<8x32xf32>
    %40 = vector.extract_strided_slice %38 {offsets = [0, 0], sizes = [8, 32], strides = [1, 1]} : vector<8x96xf32> to vector<8x32xf32>
    %41 = arith.addf %39, %40 : vector<8x32xf32>
    %42 = arith.negf %41 : vector<8x32xf32>
    %43 = math.exp %42 : vector<8x32xf32>
    %cst_40 = arith.constant 1.000000e+00 : f32
    %44 = vector.broadcast %cst_40 : f32 to vector<8x32xf32>
    %45 = arith.addf %44, %43 : vector<8x32xf32>
    %46 = arith.divf %44, %45 : vector<8x32xf32>
    %47 = vector.extract_strided_slice %37 {offsets = [0, 32], sizes = [8, 32], strides = [1, 1]} : vector<8x96xf32> to vector<8x32xf32>
    %48 = vector.extract_strided_slice %38 {offsets = [0, 32], sizes = [8, 32], strides = [1, 1]} : vector<8x96xf32> to vector<8x32xf32>
    %49 = arith.addf %47, %48 : vector<8x32xf32>
    %50 = arith.negf %49 : vector<8x32xf32>
    %51 = math.exp %50 : vector<8x32xf32>
    %cst_41 = arith.constant 1.000000e+00 : f32
    %52 = vector.broadcast %cst_41 : f32 to vector<8x32xf32>
    %53 = arith.addf %52, %51 : vector<8x32xf32>
    %54 = arith.divf %52, %53 : vector<8x32xf32>
    %55 = vector.extract_strided_slice %37 {offsets = [0, 64], sizes = [8, 32], strides = [1, 1]} : vector<8x96xf32> to vector<8x32xf32>
    %56 = vector.extract_strided_slice %38 {offsets = [0, 64], sizes = [8, 32], strides = [1, 1]} : vector<8x96xf32> to vector<8x32xf32>
    %57 = vector.broadcast %26 : vector<1x32xf32> to vector<8x32xf32>
    %58 = arith.addf %56, %57 : vector<8x32xf32>
    %59 = arith.mulf %46, %58 : vector<8x32xf32>
    %60 = arith.addf %55, %59 : vector<8x32xf32>
    %61 = math.tanh %60 : vector<8x32xf32>
    %cst_42 = arith.constant 1.000000e+00 : f32
    %62 = vector.broadcast %cst_42 : f32 to vector<8x32xf32>
    %63 = arith.subf %62, %54 : vector<8x32xf32>
    %64 = arith.mulf %63, %61 : vector<8x32xf32>
    %65 = arith.mulf %54, %29 : vector<8x32xf32>
    %66 = arith.addf %64, %65 : vector<8x32xf32>
    %67 = arith.index_cast %35 : i32 to index
    %c0_43 = arith.constant 0 : index
    %68 = vector.load %arg12[%67, %c0_43] : memref<64x96xf32, #tpu.memory_space<vmem>>, vector<8x96xf32>
    %cst_44 = arith.constant dense<0.000000e+00> : vector<8x96xf32>
    %69 = tpu.matmul %30, %24, %cst_44 {dimension_numbers = #tpu.dot_dimension_numbers<[1], [0], [0], [1], [0, 0, 1, 1], [], []>} : vector<8x32xf32>, vector<32x96xf32>, vector<8x96xf32> -> vector<8x96xf32>
    %70 = vector.extract_strided_slice %68 {offsets = [0, 0], sizes = [8, 32], strides = [1, 1]} : vector<8x96xf32> to vector<8x32xf32>
    %71 = vector.extract_strided_slice %69 {offsets = [0, 0], sizes = [8, 32], strides = [1, 1]} : vector<8x96xf32> to vector<8x32xf32>
    %72 = arith.addf %70, %71 : vector<8x32xf32>
    %73 = arith.negf %72 : vector<8x32xf32>
    %74 = math.exp %73 : vector<8x32xf32>
    %cst_45 = arith.constant 1.000000e+00 : f32
    %75 = vector.broadcast %cst_45 : f32 to vector<8x32xf32>
    %76 = arith.addf %75, %74 : vector<8x32xf32>
    %77 = arith.divf %75, %76 : vector<8x32xf32>
    %78 = vector.extract_strided_slice %68 {offsets = [0, 32], sizes = [8, 32], strides = [1, 1]} : vector<8x96xf32> to vector<8x32xf32>
    %79 = vector.extract_strided_slice %69 {offsets = [0, 32], sizes = [8, 32], strides = [1, 1]} : vector<8x96xf32> to vector<8x32xf32>
    %80 = arith.addf %78, %79 : vector<8x32xf32>
    %81 = arith.negf %80 : vector<8x32xf32>
    %82 = math.exp %81 : vector<8x32xf32>
    %cst_46 = arith.constant 1.000000e+00 : f32
    %83 = vector.broadcast %cst_46 : f32 to vector<8x32xf32>
    %84 = arith.addf %83, %82 : vector<8x32xf32>
    %85 = arith.divf %83, %84 : vector<8x32xf32>
    %86 = vector.extract_strided_slice %68 {offsets = [0, 64], sizes = [8, 32], strides = [1, 1]} : vector<8x96xf32> to vector<8x32xf32>
    %87 = vector.extract_strided_slice %69 {offsets = [0, 64], sizes = [8, 32], strides = [1, 1]} : vector<8x96xf32> to vector<8x32xf32>
    %88 = vector.broadcast %28 : vector<1x32xf32> to vector<8x32xf32>
    %89 = arith.addf %87, %88 : vector<8x32xf32>
    %90 = arith.mulf %77, %89 : vector<8x32xf32>
    %91 = arith.addf %86, %90 : vector<8x32xf32>
    %92 = math.tanh %91 : vector<8x32xf32>
    %cst_47 = arith.constant 1.000000e+00 : f32
    %93 = vector.broadcast %cst_47 : f32 to vector<8x32xf32>
    %94 = arith.subf %93, %85 : vector<8x32xf32>
    %95 = arith.mulf %94, %92 : vector<8x32xf32>
    %96 = arith.mulf %85, %30 : vector<8x32xf32>
    %97 = arith.addf %95, %96 : vector<8x32xf32>
    %98 = arith.index_cast %32 : i32 to index
    %c0_48 = arith.constant 0 : index
    %99 = vector.load %arg13[%98, %c0_48] : memref<64x32xf32, #tpu.memory_space<vmem>>, vector<8x32xf32>
    tpu.vector_store %arg13[%98, %c0_48], %66 {strides = array<i32>} : memref<64x32xf32, #tpu.memory_space<vmem>>, vector<8x32xf32>,
    %100 = arith.index_cast %35 : i32 to index
    %c0_49 = arith.constant 0 : index
    %101 = vector.load %arg14[%100, %c0_49] : memref<64x32xf32, #tpu.memory_space<vmem>>, vector<8x32xf32>
    tpu.vector_store %arg14[%100, %c0_49], %97 {strides = array<i32>} : memref<64x32xf32, #tpu.memory_space<vmem>>, vector<8x32xf32>,
    %c1_i32 = arith.constant 1 : i32
    %c8_i32_50 = arith.constant 8 : i32
    %102 = arith.muli %c1_i32, %c8_i32_50 : i32
    %103 = tpu.assume_multiple %102, 8 : i32
    %c7_i32_51 = arith.constant 7 : i32
    %104 = arith.subi %c7_i32_51, %c1_i32 : i32
    %c8_i32_52 = arith.constant 8 : i32
    %105 = arith.muli %104, %c8_i32_52 : i32
    %106 = tpu.assume_multiple %105, 8 : i32
    %107 = arith.index_cast %103 : i32 to index
    %c0_53 = arith.constant 0 : index
    %108 = vector.load %arg11[%107, %c0_53] : memref<64x96xf32, #tpu.memory_space<vmem>>, vector<8x96xf32>
    %cst_54 = arith.constant dense<0.000000e+00> : vector<8x96xf32>
    %109 = tpu.matmul %66, %22, %cst_54 {dimension_numbers = #tpu.dot_dimension_numbers<[1], [0], [0], [1], [0, 0, 1, 1], [], []>} : vector<8x32xf32>, vector<32x96xf32>, vector<8x96xf32> -> vector<8x96xf32>
    %110 = vector.extract_strided_slice %108 {offsets = [0, 0], sizes = [8, 32], strides = [1, 1]} : vector<8x96xf32> to vector<8x32xf32>
    %111 = vector.extract_strided_slice %109 {offsets = [0, 0], sizes = [8, 32], strides = [1, 1]} : vector<8x96xf32> to vector<8x32xf32>
    %112 = arith.addf %110, %111 : vector<8x32xf32>
    %113 = arith.negf %112 : vector<8x32xf32>
    %114 = math.exp %113 : vector<8x32xf32>
    %cst_55 = arith.constant 1.000000e+00 : f32
    %115 = vector.broadcast %cst_55 : f32 to vector<8x32xf32>
    %116 = arith.addf %115, %114 : vector<8x32xf32>
    %117 = arith.divf %115, %116 : vector<8x32xf32>
    %118 = vector.extract_strided_slice %108 {offsets = [0, 32], sizes = [8, 32], strides = [1, 1]} : vector<8x96xf32> to vector<8x32xf32>
    %119 = vector.extract_strided_slice %109 {offsets = [0, 32], sizes = [8, 32], strides = [1, 1]} : vector<8x96xf32> to vector<8x32xf32>
    %120 = arith.addf %118, %119 : vector<8x32xf32>
    %121 = arith.negf %120 : vector<8x32xf32>
    %122 = math.exp %121 : vector<8x32xf32>
    %cst_56 = arith.constant 1.000000e+00 : f32
    %123 = vector.broadcast %cst_56 : f32 to vector<8x32xf32>
    %124 = arith.addf %123, %122 : vector<8x32xf32>
    %125 = arith.divf %123, %124 : vector<8x32xf32>
    %126 = vector.extract_strided_slice %108 {offsets = [0, 64], sizes = [8, 32], strides = [1, 1]} : vector<8x96xf32> to vector<8x32xf32>
    %127 = vector.extract_strided_slice %109 {offsets = [0, 64], sizes = [8, 32], strides = [1, 1]} : vector<8x96xf32> to vector<8x32xf32>
    %128 = vector.broadcast %26 : vector<1x32xf32> to vector<8x32xf32>
    %129 = arith.addf %127, %128 : vector<8x32xf32>
    %130 = arith.mulf %117, %129 : vector<8x32xf32>
    %131 = arith.addf %126, %130 : vector<8x32xf32>
    %132 = math.tanh %131 : vector<8x32xf32>
    %cst_57 = arith.constant 1.000000e+00 : f32
    %133 = vector.broadcast %cst_57 : f32 to vector<8x32xf32>
    %134 = arith.subf %133, %125 : vector<8x32xf32>
    %135 = arith.mulf %134, %132 : vector<8x32xf32>
    %136 = arith.mulf %125, %66 : vector<8x32xf32>
    %137 = arith.addf %135, %136 : vector<8x32xf32>
    %138 = arith.index_cast %106 : i32 to index
    %c0_58 = arith.constant 0 : index
    %139 = vector.load %arg12[%138, %c0_58] : memref<64x96xf32, #tpu.memory_space<vmem>>, vector<8x96xf32>
    %cst_59 = arith.constant dense<0.000000e+00> : vector<8x96xf32>
    %140 = tpu.matmul %97, %24, %cst_59 {dimension_numbers = #tpu.dot_dimension_numbers<[1], [0], [0], [1], [0, 0, 1, 1], [], []>} : vector<8x32xf32>, vector<32x96xf32>, vector<8x96xf32> -> vector<8x96xf32>
    %141 = vector.extract_strided_slice %139 {offsets = [0, 0], sizes = [8, 32], strides = [1, 1]} : vector<8x96xf32> to vector<8x32xf32>
    %142 = vector.extract_strided_slice %140 {offsets = [0, 0], sizes = [8, 32], strides = [1, 1]} : vector<8x96xf32> to vector<8x32xf32>
    %143 = arith.addf %141, %142 : vector<8x32xf32>
    %144 = arith.negf %143 : vector<8x32xf32>
    %145 = math.exp %144 : vector<8x32xf32>
    %cst_60 = arith.constant 1.000000e+00 : f32
    %146 = vector.broadcast %cst_60 : f32 to vector<8x32xf32>
    %147 = arith.addf %146, %145 : vector<8x32xf32>
    %148 = arith.divf %146, %147 : vector<8x32xf32>
    %149 = vector.extract_strided_slice %139 {offsets = [0, 32], sizes = [8, 32], strides = [1, 1]} : vector<8x96xf32> to vector<8x32xf32>
    %150 = vector.extract_strided_slice %140 {offsets = [0, 32], sizes = [8, 32], strides = [1, 1]} : vector<8x96xf32> to vector<8x32xf32>
    %151 = arith.addf %149, %150 : vector<8x32xf32>
    %152 = arith.negf %151 : vector<8x32xf32>
    %153 = math.exp %152 : vector<8x32xf32>
    %cst_61 = arith.constant 1.000000e+00 : f32
    %154 = vector.broadcast %cst_61 : f32 to vector<8x32xf32>
    %155 = arith.addf %154, %153 : vector<8x32xf32>
    %156 = arith.divf %154, %155 : vector<8x32xf32>
    %157 = vector.extract_strided_slice %139 {offsets = [0, 64], sizes = [8, 32], strides = [1, 1]} : vector<8x96xf32> to vector<8x32xf32>
    %158 = vector.extract_strided_slice %140 {offsets = [0, 64], sizes = [8, 32], strides = [1, 1]} : vector<8x96xf32> to vector<8x32xf32>
    %159 = vector.broadcast %28 : vector<1x32xf32> to vector<8x32xf32>
    %160 = arith.addf %158, %159 : vector<8x32xf32>
    %161 = arith.mulf %148, %160 : vector<8x32xf32>
    %162 = arith.addf %157, %161 : vector<8x32xf32>
    %163 = math.tanh %162 : vector<8x32xf32>
    %cst_62 = arith.constant 1.000000e+00 : f32
    %164 = vector.broadcast %cst_62 : f32 to vector<8x32xf32>
    %165 = arith.subf %164, %156 : vector<8x32xf32>
    %166 = arith.mulf %165, %163 : vector<8x32xf32>
    %167 = arith.mulf %156, %97 : vector<8x32xf32>
    %168 = arith.addf %166, %167 : vector<8x32xf32>
    %169 = arith.index_cast %103 : i32 to index
    %c0_63 = arith.constant 0 : index
    %170 = vector.load %arg13[%169, %c0_63] : memref<64x32xf32, #tpu.memory_space<vmem>>, vector<8x32xf32>
    tpu.vector_store %arg13[%169, %c0_63], %137 {strides = array<i32>} : memref<64x32xf32, #tpu.memory_space<vmem>>, vector<8x32xf32>,
    %171 = arith.index_cast %106 : i32 to index
    %c0_64 = arith.constant 0 : index
    %172 = vector.load %arg14[%171, %c0_64] : memref<64x32xf32, #tpu.memory_space<vmem>>, vector<8x32xf32>
    tpu.vector_store %arg14[%171, %c0_64], %168 {strides = array<i32>} : memref<64x32xf32, #tpu.memory_space<vmem>>, vector<8x32xf32>,
    %c2_i32 = arith.constant 2 : i32
    %c8_i32_65 = arith.constant 8 : i32
    %173 = arith.muli %c2_i32, %c8_i32_65 : i32
    %174 = tpu.assume_multiple %173, 8 : i32
    %c7_i32_66 = arith.constant 7 : i32
    %175 = arith.subi %c7_i32_66, %c2_i32 : i32
    %c8_i32_67 = arith.constant 8 : i32
    %176 = arith.muli %175, %c8_i32_67 : i32
    %177 = tpu.assume_multiple %176, 8 : i32
    %178 = arith.index_cast %174 : i32 to index
    %c0_68 = arith.constant 0 : index
    %179 = vector.load %arg11[%178, %c0_68] : memref<64x96xf32, #tpu.memory_space<vmem>>, vector<8x96xf32>
    %cst_69 = arith.constant dense<0.000000e+00> : vector<8x96xf32>
    %180 = tpu.matmul %137, %22, %cst_69 {dimension_numbers = #tpu.dot_dimension_numbers<[1], [0], [0], [1], [0, 0, 1, 1], [], []>} : vector<8x32xf32>, vector<32x96xf32>, vector<8x96xf32> -> vector<8x96xf32>
    %181 = vector.extract_strided_slice %179 {offsets = [0, 0], sizes = [8, 32], strides = [1, 1]} : vector<8x96xf32> to vector<8x32xf32>
    %182 = vector.extract_strided_slice %180 {offsets = [0, 0], sizes = [8, 32], strides = [1, 1]} : vector<8x96xf32> to vector<8x32xf32>
    %183 = arith.addf %181, %182 : vector<8x32xf32>
    %184 = arith.negf %183 : vector<8x32xf32>
    %185 = math.exp %184 : vector<8x32xf32>
    %cst_70 = arith.constant 1.000000e+00 : f32
    %186 = vector.broadcast %cst_70 : f32 to vector<8x32xf32>
    %187 = arith.addf %186, %185 : vector<8x32xf32>
    %188 = arith.divf %186, %187 : vector<8x32xf32>
    %189 = vector.extract_strided_slice %179 {offsets = [0, 32], sizes = [8, 32], strides = [1, 1]} : vector<8x96xf32> to vector<8x32xf32>
    %190 = vector.extract_strided_slice %180 {offsets = [0, 32], sizes = [8, 32], strides = [1, 1]} : vector<8x96xf32> to vector<8x32xf32>
    %191 = arith.addf %189, %190 : vector<8x32xf32>
    %192 = arith.negf %191 : vector<8x32xf32>
    %193 = math.exp %192 : vector<8x32xf32>
    %cst_71 = arith.constant 1.000000e+00 : f32
    %194 = vector.broadcast %cst_71 : f32 to vector<8x32xf32>
    %195 = arith.addf %194, %193 : vector<8x32xf32>
    %196 = arith.divf %194, %195 : vector<8x32xf32>
    %197 = vector.extract_strided_slice %179 {offsets = [0, 64], sizes = [8, 32], strides = [1, 1]} : vector<8x96xf32> to vector<8x32xf32>
    %198 = vector.extract_strided_slice %180 {offsets = [0, 64], sizes = [8, 32], strides = [1, 1]} : vector<8x96xf32> to vector<8x32xf32>
    %199 = vector.broadcast %26 : vector<1x32xf32> to vector<8x32xf32>
    %200 = arith.addf %198, %199 : vector<8x32xf32>
    %201 = arith.mulf %188, %200 : vector<8x32xf32>
    %202 = arith.addf %197, %201 : vector<8x32xf32>
    %203 = math.tanh %202 : vector<8x32xf32>
    %cst_72 = arith.constant 1.000000e+00 : f32
    %204 = vector.broadcast %cst_72 : f32 to vector<8x32xf32>
    %205 = arith.subf %204, %196 : vector<8x32xf32>
    %206 = arith.mulf %205, %203 : vector<8x32xf32>
    %207 = arith.mulf %196, %137 : vector<8x32xf32>
    %208 = arith.addf %206, %207 : vector<8x32xf32>
    %209 = arith.index_cast %177 : i32 to index
    %c0_73 = arith.constant 0 : index
    %210 = vector.load %arg12[%209, %c0_73] : memref<64x96xf32, #tpu.memory_space<vmem>>, vector<8x96xf32>
    %cst_74 = arith.constant dense<0.000000e+00> : vector<8x96xf32>
    %211 = tpu.matmul %168, %24, %cst_74 {dimension_numbers = #tpu.dot_dimension_numbers<[1], [0], [0], [1], [0, 0, 1, 1], [], []>} : vector<8x32xf32>, vector<32x96xf32>, vector<8x96xf32> -> vector<8x96xf32>
    %212 = vector.extract_strided_slice %210 {offsets = [0, 0], sizes = [8, 32], strides = [1, 1]} : vector<8x96xf32> to vector<8x32xf32>
    %213 = vector.extract_strided_slice %211 {offsets = [0, 0], sizes = [8, 32], strides = [1, 1]} : vector<8x96xf32> to vector<8x32xf32>
    %214 = arith.addf %212, %213 : vector<8x32xf32>
    %215 = arith.negf %214 : vector<8x32xf32>
    %216 = math.exp %215 : vector<8x32xf32>
    %cst_75 = arith.constant 1.000000e+00 : f32
    %217 = vector.broadcast %cst_75 : f32 to vector<8x32xf32>
    %218 = arith.addf %217, %216 : vector<8x32xf32>
    %219 = arith.divf %217, %218 : vector<8x32xf32>
    %220 = vector.extract_strided_slice %210 {offsets = [0, 32], sizes = [8, 32], strides = [1, 1]} : vector<8x96xf32> to vector<8x32xf32>
    %221 = vector.extract_strided_slice %211 {offsets = [0, 32], sizes = [8, 32], strides = [1, 1]} : vector<8x96xf32> to vector<8x32xf32>
    %222 = arith.addf %220, %221 : vector<8x32xf32>
    %223 = arith.negf %222 : vector<8x32xf32>
    %224 = math.exp %223 : vector<8x32xf32>
    %cst_76 = arith.constant 1.000000e+00 : f32
    %225 = vector.broadcast %cst_76 : f32 to vector<8x32xf32>
    %226 = arith.addf %225, %224 : vector<8x32xf32>
    %227 = arith.divf %225, %226 : vector<8x32xf32>
    %228 = vector.extract_strided_slice %210 {offsets = [0, 64], sizes = [8, 32], strides = [1, 1]} : vector<8x96xf32> to vector<8x32xf32>
    %229 = vector.extract_strided_slice %211 {offsets = [0, 64], sizes = [8, 32], strides = [1, 1]} : vector<8x96xf32> to vector<8x32xf32>
    %230 = vector.broadcast %28 : vector<1x32xf32> to vector<8x32xf32>
    %231 = arith.addf %229, %230 : vector<8x32xf32>
    %232 = arith.mulf %219, %231 : vector<8x32xf32>
    %233 = arith.addf %228, %232 : vector<8x32xf32>
    %234 = math.tanh %233 : vector<8x32xf32>
    %cst_77 = arith.constant 1.000000e+00 : f32
    %235 = vector.broadcast %cst_77 : f32 to vector<8x32xf32>
    %236 = arith.subf %235, %227 : vector<8x32xf32>
    %237 = arith.mulf %236, %234 : vector<8x32xf32>
    %238 = arith.mulf %227, %168 : vector<8x32xf32>
    %239 = arith.addf %237, %238 : vector<8x32xf32>
    %240 = arith.index_cast %174 : i32 to index
    %c0_78 = arith.constant 0 : index
    %241 = vector.load %arg13[%240, %c0_78] : memref<64x32xf32, #tpu.memory_space<vmem>>, vector<8x32xf32>
    tpu.vector_store %arg13[%240, %c0_78], %208 {strides = array<i32>} : memref<64x32xf32, #tpu.memory_space<vmem>>, vector<8x32xf32>,
    %242 = arith.index_cast %177 : i32 to index
    %c0_79 = arith.constant 0 : index
    %243 = vector.load %arg14[%242, %c0_79] : memref<64x32xf32, #tpu.memory_space<vmem>>, vector<8x32xf32>
    tpu.vector_store %arg14[%242, %c0_79], %239 {strides = array<i32>} : memref<64x32xf32, #tpu.memory_space<vmem>>, vector<8x32xf32>,
    %c3_i32 = arith.constant 3 : i32
    %c8_i32_80 = arith.constant 8 : i32
    %244 = arith.muli %c3_i32, %c8_i32_80 : i32
    %245 = tpu.assume_multiple %244, 8 : i32
    %c7_i32_81 = arith.constant 7 : i32
    %246 = arith.subi %c7_i32_81, %c3_i32 : i32
    %c8_i32_82 = arith.constant 8 : i32
    %247 = arith.muli %246, %c8_i32_82 : i32
    %248 = tpu.assume_multiple %247, 8 : i32
    %249 = arith.index_cast %245 : i32 to index
    %c0_83 = arith.constant 0 : index
    %250 = vector.load %arg11[%249, %c0_83] : memref<64x96xf32, #tpu.memory_space<vmem>>, vector<8x96xf32>
    %cst_84 = arith.constant dense<0.000000e+00> : vector<8x96xf32>
    %251 = tpu.matmul %208, %22, %cst_84 {dimension_numbers = #tpu.dot_dimension_numbers<[1], [0], [0], [1], [0, 0, 1, 1], [], []>} : vector<8x32xf32>, vector<32x96xf32>, vector<8x96xf32> -> vector<8x96xf32>
    %252 = vector.extract_strided_slice %250 {offsets = [0, 0], sizes = [8, 32], strides = [1, 1]} : vector<8x96xf32> to vector<8x32xf32>
    %253 = vector.extract_strided_slice %251 {offsets = [0, 0], sizes = [8, 32], strides = [1, 1]} : vector<8x96xf32> to vector<8x32xf32>
    %254 = arith.addf %252, %253 : vector<8x32xf32>
    %255 = arith.negf %254 : vector<8x32xf32>
    %256 = math.exp %255 : vector<8x32xf32>
    %cst_85 = arith.constant 1.000000e+00 : f32
    %257 = vector.broadcast %cst_85 : f32 to vector<8x32xf32>
    %258 = arith.addf %257, %256 : vector<8x32xf32>
    %259 = arith.divf %257, %258 : vector<8x32xf32>
    %260 = vector.extract_strided_slice %250 {offsets = [0, 32], sizes = [8, 32], strides = [1, 1]} : vector<8x96xf32> to vector<8x32xf32>
    %261 = vector.extract_strided_slice %251 {offsets = [0, 32], sizes = [8, 32], strides = [1, 1]} : vector<8x96xf32> to vector<8x32xf32>
    %262 = arith.addf %260, %261 : vector<8x32xf32>
    %263 = arith.negf %262 : vector<8x32xf32>
    %264 = math.exp %263 : vector<8x32xf32>
    %cst_86 = arith.constant 1.000000e+00 : f32
    %265 = vector.broadcast %cst_86 : f32 to vector<8x32xf32>
    %266 = arith.addf %265, %264 : vector<8x32xf32>
    %267 = arith.divf %265, %266 : vector<8x32xf32>
    %268 = vector.extract_strided_slice %250 {offsets = [0, 64], sizes = [8, 32], strides = [1, 1]} : vector<8x96xf32> to vector<8x32xf32>
    %269 = vector.extract_strided_slice %251 {offsets = [0, 64], sizes = [8, 32], strides = [1, 1]} : vector<8x96xf32> to vector<8x32xf32>
    %270 = vector.broadcast %26 : vector<1x32xf32> to vector<8x32xf32>
    %271 = arith.addf %269, %270 : vector<8x32xf32>
    %272 = arith.mulf %259, %271 : vector<8x32xf32>
    %273 = arith.addf %268, %272 : vector<8x32xf32>
    %274 = math.tanh %273 : vector<8x32xf32>
    %cst_87 = arith.constant 1.000000e+00 : f32
    %275 = vector.broadcast %cst_87 : f32 to vector<8x32xf32>
    %276 = arith.subf %275, %267 : vector<8x32xf32>
    %277 = arith.mulf %276, %274 : vector<8x32xf32>
    %278 = arith.mulf %267, %208 : vector<8x32xf32>
    %279 = arith.addf %277, %278 : vector<8x32xf32>
    %280 = arith.index_cast %248 : i32 to index
    %c0_88 = arith.constant 0 : index
    %281 = vector.load %arg12[%280, %c0_88] : memref<64x96xf32, #tpu.memory_space<vmem>>, vector<8x96xf32>
    %cst_89 = arith.constant dense<0.000000e+00> : vector<8x96xf32>
    %282 = tpu.matmul %239, %24, %cst_89 {dimension_numbers = #tpu.dot_dimension_numbers<[1], [0], [0], [1], [0, 0, 1, 1], [], []>} : vector<8x32xf32>, vector<32x96xf32>, vector<8x96xf32> -> vector<8x96xf32>
    %283 = vector.extract_strided_slice %281 {offsets = [0, 0], sizes = [8, 32], strides = [1, 1]} : vector<8x96xf32> to vector<8x32xf32>
    %284 = vector.extract_strided_slice %282 {offsets = [0, 0], sizes = [8, 32], strides = [1, 1]} : vector<8x96xf32> to vector<8x32xf32>
    %285 = arith.addf %283, %284 : vector<8x32xf32>
    %286 = arith.negf %285 : vector<8x32xf32>
    %287 = math.exp %286 : vector<8x32xf32>
    %cst_90 = arith.constant 1.000000e+00 : f32
    %288 = vector.broadcast %cst_90 : f32 to vector<8x32xf32>
    %289 = arith.addf %288, %287 : vector<8x32xf32>
    %290 = arith.divf %288, %289 : vector<8x32xf32>
    %291 = vector.extract_strided_slice %281 {offsets = [0, 32], sizes = [8, 32], strides = [1, 1]} : vector<8x96xf32> to vector<8x32xf32>
    %292 = vector.extract_strided_slice %282 {offsets = [0, 32], sizes = [8, 32], strides = [1, 1]} : vector<8x96xf32> to vector<8x32xf32>
    %293 = arith.addf %291, %292 : vector<8x32xf32>
    %294 = arith.negf %293 : vector<8x32xf32>
    %295 = math.exp %294 : vector<8x32xf32>
    %cst_91 = arith.constant 1.000000e+00 : f32
    %296 = vector.broadcast %cst_91 : f32 to vector<8x32xf32>
    %297 = arith.addf %296, %295 : vector<8x32xf32>
    %298 = arith.divf %296, %297 : vector<8x32xf32>
    %299 = vector.extract_strided_slice %281 {offsets = [0, 64], sizes = [8, 32], strides = [1, 1]} : vector<8x96xf32> to vector<8x32xf32>
    %300 = vector.extract_strided_slice %282 {offsets = [0, 64], sizes = [8, 32], strides = [1, 1]} : vector<8x96xf32> to vector<8x32xf32>
    %301 = vector.broadcast %28 : vector<1x32xf32> to vector<8x32xf32>
    %302 = arith.addf %300, %301 : vector<8x32xf32>
    %303 = arith.mulf %290, %302 : vector<8x32xf32>
    %304 = arith.addf %299, %303 : vector<8x32xf32>
    %305 = math.tanh %304 : vector<8x32xf32>
    %cst_92 = arith.constant 1.000000e+00 : f32
    %306 = vector.broadcast %cst_92 : f32 to vector<8x32xf32>
    %307 = arith.subf %306, %298 : vector<8x32xf32>
    %308 = arith.mulf %307, %305 : vector<8x32xf32>
    %309 = arith.mulf %298, %239 : vector<8x32xf32>
    %310 = arith.addf %308, %309 : vector<8x32xf32>
    %311 = arith.index_cast %245 : i32 to index
    %c0_93 = arith.constant 0 : index
    %312 = vector.load %arg13[%311, %c0_93] : memref<64x32xf32, #tpu.memory_space<vmem>>, vector<8x32xf32>
    tpu.vector_store %arg13[%311, %c0_93], %279 {strides = array<i32>} : memref<64x32xf32, #tpu.memory_space<vmem>>, vector<8x32xf32>,
    %313 = arith.index_cast %248 : i32 to index
    %c0_94 = arith.constant 0 : index
    %314 = vector.load %arg14[%313, %c0_94] : memref<64x32xf32, #tpu.memory_space<vmem>>, vector<8x32xf32>
    tpu.vector_store %arg14[%313, %c0_94], %310 {strides = array<i32>} : memref<64x32xf32, #tpu.memory_space<vmem>>, vector<8x32xf32>,
    %c4_i32 = arith.constant 4 : i32
    %c8_i32_95 = arith.constant 8 : i32
    %315 = arith.muli %c4_i32, %c8_i32_95 : i32
    %316 = tpu.assume_multiple %315, 8 : i32
    %c7_i32_96 = arith.constant 7 : i32
    %317 = arith.subi %c7_i32_96, %c4_i32 : i32
    %c8_i32_97 = arith.constant 8 : i32
    %318 = arith.muli %317, %c8_i32_97 : i32
    %319 = tpu.assume_multiple %318, 8 : i32
    %320 = arith.index_cast %316 : i32 to index
    %c0_98 = arith.constant 0 : index
    %321 = vector.load %arg11[%320, %c0_98] : memref<64x96xf32, #tpu.memory_space<vmem>>, vector<8x96xf32>
    %cst_99 = arith.constant dense<0.000000e+00> : vector<8x96xf32>
    %322 = tpu.matmul %279, %22, %cst_99 {dimension_numbers = #tpu.dot_dimension_numbers<[1], [0], [0], [1], [0, 0, 1, 1], [], []>} : vector<8x32xf32>, vector<32x96xf32>, vector<8x96xf32> -> vector<8x96xf32>
    %323 = vector.extract_strided_slice %321 {offsets = [0, 0], sizes = [8, 32], strides = [1, 1]} : vector<8x96xf32> to vector<8x32xf32>
    %324 = vector.extract_strided_slice %322 {offsets = [0, 0], sizes = [8, 32], strides = [1, 1]} : vector<8x96xf32> to vector<8x32xf32>
    %325 = arith.addf %323, %324 : vector<8x32xf32>
    %326 = arith.negf %325 : vector<8x32xf32>
    %327 = math.exp %326 : vector<8x32xf32>
    %cst_100 = arith.constant 1.000000e+00 : f32
    %328 = vector.broadcast %cst_100 : f32 to vector<8x32xf32>
    %329 = arith.addf %328, %327 : vector<8x32xf32>
    %330 = arith.divf %328, %329 : vector<8x32xf32>
    %331 = vector.extract_strided_slice %321 {offsets = [0, 32], sizes = [8, 32], strides = [1, 1]} : vector<8x96xf32> to vector<8x32xf32>
    %332 = vector.extract_strided_slice %322 {offsets = [0, 32], sizes = [8, 32], strides = [1, 1]} : vector<8x96xf32> to vector<8x32xf32>
    %333 = arith.addf %331, %332 : vector<8x32xf32>
    %334 = arith.negf %333 : vector<8x32xf32>
    %335 = math.exp %334 : vector<8x32xf32>
    %cst_101 = arith.constant 1.000000e+00 : f32
    %336 = vector.broadcast %cst_101 : f32 to vector<8x32xf32>
    %337 = arith.addf %336, %335 : vector<8x32xf32>
    %338 = arith.divf %336, %337 : vector<8x32xf32>
    %339 = vector.extract_strided_slice %321 {offsets = [0, 64], sizes = [8, 32], strides = [1, 1]} : vector<8x96xf32> to vector<8x32xf32>
    %340 = vector.extract_strided_slice %322 {offsets = [0, 64], sizes = [8, 32], strides = [1, 1]} : vector<8x96xf32> to vector<8x32xf32>
    %341 = vector.broadcast %26 : vector<1x32xf32> to vector<8x32xf32>
    %342 = arith.addf %340, %341 : vector<8x32xf32>
    %343 = arith.mulf %330, %342 : vector<8x32xf32>
    %344 = arith.addf %339, %343 : vector<8x32xf32>
    %345 = math.tanh %344 : vector<8x32xf32>
    %cst_102 = arith.constant 1.000000e+00 : f32
    %346 = vector.broadcast %cst_102 : f32 to vector<8x32xf32>
    %347 = arith.subf %346, %338 : vector<8x32xf32>
    %348 = arith.mulf %347, %345 : vector<8x32xf32>
    %349 = arith.mulf %338, %279 : vector<8x32xf32>
    %350 = arith.addf %348, %349 : vector<8x32xf32>
    %351 = arith.index_cast %319 : i32 to index
    %c0_103 = arith.constant 0 : index
    %352 = vector.load %arg12[%351, %c0_103] : memref<64x96xf32, #tpu.memory_space<vmem>>, vector<8x96xf32>
    %cst_104 = arith.constant dense<0.000000e+00> : vector<8x96xf32>
    %353 = tpu.matmul %310, %24, %cst_104 {dimension_numbers = #tpu.dot_dimension_numbers<[1], [0], [0], [1], [0, 0, 1, 1], [], []>} : vector<8x32xf32>, vector<32x96xf32>, vector<8x96xf32> -> vector<8x96xf32>
    %354 = vector.extract_strided_slice %352 {offsets = [0, 0], sizes = [8, 32], strides = [1, 1]} : vector<8x96xf32> to vector<8x32xf32>
    %355 = vector.extract_strided_slice %353 {offsets = [0, 0], sizes = [8, 32], strides = [1, 1]} : vector<8x96xf32> to vector<8x32xf32>
    %356 = arith.addf %354, %355 : vector<8x32xf32>
    %357 = arith.negf %356 : vector<8x32xf32>
    %358 = math.exp %357 : vector<8x32xf32>
    %cst_105 = arith.constant 1.000000e+00 : f32
    %359 = vector.broadcast %cst_105 : f32 to vector<8x32xf32>
    %360 = arith.addf %359, %358 : vector<8x32xf32>
    %361 = arith.divf %359, %360 : vector<8x32xf32>
    %362 = vector.extract_strided_slice %352 {offsets = [0, 32], sizes = [8, 32], strides = [1, 1]} : vector<8x96xf32> to vector<8x32xf32>
    %363 = vector.extract_strided_slice %353 {offsets = [0, 32], sizes = [8, 32], strides = [1, 1]} : vector<8x96xf32> to vector<8x32xf32>
    %364 = arith.addf %362, %363 : vector<8x32xf32>
    %365 = arith.negf %364 : vector<8x32xf32>
    %366 = math.exp %365 : vector<8x32xf32>
    %cst_106 = arith.constant 1.000000e+00 : f32
    %367 = vector.broadcast %cst_106 : f32 to vector<8x32xf32>
    %368 = arith.addf %367, %366 : vector<8x32xf32>
    %369 = arith.divf %367, %368 : vector<8x32xf32>
    %370 = vector.extract_strided_slice %352 {offsets = [0, 64], sizes = [8, 32], strides = [1, 1]} : vector<8x96xf32> to vector<8x32xf32>
    %371 = vector.extract_strided_slice %353 {offsets = [0, 64], sizes = [8, 32], strides = [1, 1]} : vector<8x96xf32> to vector<8x32xf32>
    %372 = vector.broadcast %28 : vector<1x32xf32> to vector<8x32xf32>
    %373 = arith.addf %371, %372 : vector<8x32xf32>
    %374 = arith.mulf %361, %373 : vector<8x32xf32>
    %375 = arith.addf %370, %374 : vector<8x32xf32>
    %376 = math.tanh %375 : vector<8x32xf32>
    %cst_107 = arith.constant 1.000000e+00 : f32
    %377 = vector.broadcast %cst_107 : f32 to vector<8x32xf32>
    %378 = arith.subf %377, %369 : vector<8x32xf32>
    %379 = arith.mulf %378, %376 : vector<8x32xf32>
    %380 = arith.mulf %369, %310 : vector<8x32xf32>
    %381 = arith.addf %379, %380 : vector<8x32xf32>
    %382 = arith.index_cast %316 : i32 to index
    %c0_108 = arith.constant 0 : index
    %383 = vector.load %arg13[%382, %c0_108] : memref<64x32xf32, #tpu.memory_space<vmem>>, vector<8x32xf32>
    tpu.vector_store %arg13[%382, %c0_108], %350 {strides = array<i32>} : memref<64x32xf32, #tpu.memory_space<vmem>>, vector<8x32xf32>,
    %384 = arith.index_cast %319 : i32 to index
    %c0_109 = arith.constant 0 : index
    %385 = vector.load %arg14[%384, %c0_109] : memref<64x32xf32, #tpu.memory_space<vmem>>, vector<8x32xf32>
    tpu.vector_store %arg14[%384, %c0_109], %381 {strides = array<i32>} : memref<64x32xf32, #tpu.memory_space<vmem>>, vector<8x32xf32>,
    %c5_i32 = arith.constant 5 : i32
    %c8_i32_110 = arith.constant 8 : i32
    %386 = arith.muli %c5_i32, %c8_i32_110 : i32
    %387 = tpu.assume_multiple %386, 8 : i32
    %c7_i32_111 = arith.constant 7 : i32
    %388 = arith.subi %c7_i32_111, %c5_i32 : i32
    %c8_i32_112 = arith.constant 8 : i32
    %389 = arith.muli %388, %c8_i32_112 : i32
    %390 = tpu.assume_multiple %389, 8 : i32
    %391 = arith.index_cast %387 : i32 to index
    %c0_113 = arith.constant 0 : index
    %392 = vector.load %arg11[%391, %c0_113] : memref<64x96xf32, #tpu.memory_space<vmem>>, vector<8x96xf32>
    %cst_114 = arith.constant dense<0.000000e+00> : vector<8x96xf32>
    %393 = tpu.matmul %350, %22, %cst_114 {dimension_numbers = #tpu.dot_dimension_numbers<[1], [0], [0], [1], [0, 0, 1, 1], [], []>} : vector<8x32xf32>, vector<32x96xf32>, vector<8x96xf32> -> vector<8x96xf32>
    %394 = vector.extract_strided_slice %392 {offsets = [0, 0], sizes = [8, 32], strides = [1, 1]} : vector<8x96xf32> to vector<8x32xf32>
    %395 = vector.extract_strided_slice %393 {offsets = [0, 0], sizes = [8, 32], strides = [1, 1]} : vector<8x96xf32> to vector<8x32xf32>
    %396 = arith.addf %394, %395 : vector<8x32xf32>
    %397 = arith.negf %396 : vector<8x32xf32>
    %398 = math.exp %397 : vector<8x32xf32>
    %cst_115 = arith.constant 1.000000e+00 : f32
    %399 = vector.broadcast %cst_115 : f32 to vector<8x32xf32>
    %400 = arith.addf %399, %398 : vector<8x32xf32>
    %401 = arith.divf %399, %400 : vector<8x32xf32>
    %402 = vector.extract_strided_slice %392 {offsets = [0, 32], sizes = [8, 32], strides = [1, 1]} : vector<8x96xf32> to vector<8x32xf32>
    %403 = vector.extract_strided_slice %393 {offsets = [0, 32], sizes = [8, 32], strides = [1, 1]} : vector<8x96xf32> to vector<8x32xf32>
    %404 = arith.addf %402, %403 : vector<8x32xf32>
    %405 = arith.negf %404 : vector<8x32xf32>
    %406 = math.exp %405 : vector<8x32xf32>
    %cst_116 = arith.constant 1.000000e+00 : f32
    %407 = vector.broadcast %cst_116 : f32 to vector<8x32xf32>
    %408 = arith.addf %407, %406 : vector<8x32xf32>
    %409 = arith.divf %407, %408 : vector<8x32xf32>
    %410 = vector.extract_strided_slice %392 {offsets = [0, 64], sizes = [8, 32], strides = [1, 1]} : vector<8x96xf32> to vector<8x32xf32>
    %411 = vector.extract_strided_slice %393 {offsets = [0, 64], sizes = [8, 32], strides = [1, 1]} : vector<8x96xf32> to vector<8x32xf32>
    %412 = vector.broadcast %26 : vector<1x32xf32> to vector<8x32xf32>
    %413 = arith.addf %411, %412 : vector<8x32xf32>
    %414 = arith.mulf %401, %413 : vector<8x32xf32>
    %415 = arith.addf %410, %414 : vector<8x32xf32>
    %416 = math.tanh %415 : vector<8x32xf32>
    %cst_117 = arith.constant 1.000000e+00 : f32
    %417 = vector.broadcast %cst_117 : f32 to vector<8x32xf32>
    %418 = arith.subf %417, %409 : vector<8x32xf32>
    %419 = arith.mulf %418, %416 : vector<8x32xf32>
    %420 = arith.mulf %409, %350 : vector<8x32xf32>
    %421 = arith.addf %419, %420 : vector<8x32xf32>
    %422 = arith.index_cast %390 : i32 to index
    %c0_118 = arith.constant 0 : index
    %423 = vector.load %arg12[%422, %c0_118] : memref<64x96xf32, #tpu.memory_space<vmem>>, vector<8x96xf32>
    %cst_119 = arith.constant dense<0.000000e+00> : vector<8x96xf32>
    %424 = tpu.matmul %381, %24, %cst_119 {dimension_numbers = #tpu.dot_dimension_numbers<[1], [0], [0], [1], [0, 0, 1, 1], [], []>} : vector<8x32xf32>, vector<32x96xf32>, vector<8x96xf32> -> vector<8x96xf32>
    %425 = vector.extract_strided_slice %423 {offsets = [0, 0], sizes = [8, 32], strides = [1, 1]} : vector<8x96xf32> to vector<8x32xf32>
    %426 = vector.extract_strided_slice %424 {offsets = [0, 0], sizes = [8, 32], strides = [1, 1]} : vector<8x96xf32> to vector<8x32xf32>
    %427 = arith.addf %425, %426 : vector<8x32xf32>
    %428 = arith.negf %427 : vector<8x32xf32>
    %429 = math.exp %428 : vector<8x32xf32>
    %cst_120 = arith.constant 1.000000e+00 : f32
    %430 = vector.broadcast %cst_120 : f32 to vector<8x32xf32>
    %431 = arith.addf %430, %429 : vector<8x32xf32>
    %432 = arith.divf %430, %431 : vector<8x32xf32>
    %433 = vector.extract_strided_slice %423 {offsets = [0, 32], sizes = [8, 32], strides = [1, 1]} : vector<8x96xf32> to vector<8x32xf32>
    %434 = vector.extract_strided_slice %424 {offsets = [0, 32], sizes = [8, 32], strides = [1, 1]} : vector<8x96xf32> to vector<8x32xf32>
    %435 = arith.addf %433, %434 : vector<8x32xf32>
    %436 = arith.negf %435 : vector<8x32xf32>
    %437 = math.exp %436 : vector<8x32xf32>
    %cst_121 = arith.constant 1.000000e+00 : f32
    %438 = vector.broadcast %cst_121 : f32 to vector<8x32xf32>
    %439 = arith.addf %438, %437 : vector<8x32xf32>
    %440 = arith.divf %438, %439 : vector<8x32xf32>
    %441 = vector.extract_strided_slice %423 {offsets = [0, 64], sizes = [8, 32], strides = [1, 1]} : vector<8x96xf32> to vector<8x32xf32>
    %442 = vector.extract_strided_slice %424 {offsets = [0, 64], sizes = [8, 32], strides = [1, 1]} : vector<8x96xf32> to vector<8x32xf32>
    %443 = vector.broadcast %28 : vector<1x32xf32> to vector<8x32xf32>
    %444 = arith.addf %442, %443 : vector<8x32xf32>
    %445 = arith.mulf %432, %444 : vector<8x32xf32>
    %446 = arith.addf %441, %445 : vector<8x32xf32>
    %447 = math.tanh %446 : vector<8x32xf32>
    %cst_122 = arith.constant 1.000000e+00 : f32
    %448 = vector.broadcast %cst_122 : f32 to vector<8x32xf32>
    %449 = arith.subf %448, %440 : vector<8x32xf32>
    %450 = arith.mulf %449, %447 : vector<8x32xf32>
    %451 = arith.mulf %440, %381 : vector<8x32xf32>
    %452 = arith.addf %450, %451 : vector<8x32xf32>
    %453 = arith.index_cast %387 : i32 to index
    %c0_123 = arith.constant 0 : index
    %454 = vector.load %arg13[%453, %c0_123] : memref<64x32xf32, #tpu.memory_space<vmem>>, vector<8x32xf32>
    tpu.vector_store %arg13[%453, %c0_123], %421 {strides = array<i32>} : memref<64x32xf32, #tpu.memory_space<vmem>>, vector<8x32xf32>,
    %455 = arith.index_cast %390 : i32 to index
    %c0_124 = arith.constant 0 : index
    %456 = vector.load %arg14[%455, %c0_124] : memref<64x32xf32, #tpu.memory_space<vmem>>, vector<8x32xf32>
    tpu.vector_store %arg14[%455, %c0_124], %452 {strides = array<i32>} : memref<64x32xf32, #tpu.memory_space<vmem>>, vector<8x32xf32>,
    %c6_i32 = arith.constant 6 : i32
    %c8_i32_125 = arith.constant 8 : i32
    %457 = arith.muli %c6_i32, %c8_i32_125 : i32
    %458 = tpu.assume_multiple %457, 8 : i32
    %c7_i32_126 = arith.constant 7 : i32
    %459 = arith.subi %c7_i32_126, %c6_i32 : i32
    %c8_i32_127 = arith.constant 8 : i32
    %460 = arith.muli %459, %c8_i32_127 : i32
    %461 = tpu.assume_multiple %460, 8 : i32
    %462 = arith.index_cast %458 : i32 to index
    %c0_128 = arith.constant 0 : index
    %463 = vector.load %arg11[%462, %c0_128] : memref<64x96xf32, #tpu.memory_space<vmem>>, vector<8x96xf32>
    %cst_129 = arith.constant dense<0.000000e+00> : vector<8x96xf32>
    %464 = tpu.matmul %421, %22, %cst_129 {dimension_numbers = #tpu.dot_dimension_numbers<[1], [0], [0], [1], [0, 0, 1, 1], [], []>} : vector<8x32xf32>, vector<32x96xf32>, vector<8x96xf32> -> vector<8x96xf32>
    %465 = vector.extract_strided_slice %463 {offsets = [0, 0], sizes = [8, 32], strides = [1, 1]} : vector<8x96xf32> to vector<8x32xf32>
    %466 = vector.extract_strided_slice %464 {offsets = [0, 0], sizes = [8, 32], strides = [1, 1]} : vector<8x96xf32> to vector<8x32xf32>
    %467 = arith.addf %465, %466 : vector<8x32xf32>
    %468 = arith.negf %467 : vector<8x32xf32>
    %469 = math.exp %468 : vector<8x32xf32>
    %cst_130 = arith.constant 1.000000e+00 : f32
    %470 = vector.broadcast %cst_130 : f32 to vector<8x32xf32>
    %471 = arith.addf %470, %469 : vector<8x32xf32>
    %472 = arith.divf %470, %471 : vector<8x32xf32>
    %473 = vector.extract_strided_slice %463 {offsets = [0, 32], sizes = [8, 32], strides = [1, 1]} : vector<8x96xf32> to vector<8x32xf32>
    %474 = vector.extract_strided_slice %464 {offsets = [0, 32], sizes = [8, 32], strides = [1, 1]} : vector<8x96xf32> to vector<8x32xf32>
    %475 = arith.addf %473, %474 : vector<8x32xf32>
    %476 = arith.negf %475 : vector<8x32xf32>
    %477 = math.exp %476 : vector<8x32xf32>
    %cst_131 = arith.constant 1.000000e+00 : f32
    %478 = vector.broadcast %cst_131 : f32 to vector<8x32xf32>
    %479 = arith.addf %478, %477 : vector<8x32xf32>
    %480 = arith.divf %478, %479 : vector<8x32xf32>
    %481 = vector.extract_strided_slice %463 {offsets = [0, 64], sizes = [8, 32], strides = [1, 1]} : vector<8x96xf32> to vector<8x32xf32>
    %482 = vector.extract_strided_slice %464 {offsets = [0, 64], sizes = [8, 32], strides = [1, 1]} : vector<8x96xf32> to vector<8x32xf32>
    %483 = vector.broadcast %26 : vector<1x32xf32> to vector<8x32xf32>
    %484 = arith.addf %482, %483 : vector<8x32xf32>
    %485 = arith.mulf %472, %484 : vector<8x32xf32>
    %486 = arith.addf %481, %485 : vector<8x32xf32>
    %487 = math.tanh %486 : vector<8x32xf32>
    %cst_132 = arith.constant 1.000000e+00 : f32
    %488 = vector.broadcast %cst_132 : f32 to vector<8x32xf32>
    %489 = arith.subf %488, %480 : vector<8x32xf32>
    %490 = arith.mulf %489, %487 : vector<8x32xf32>
    %491 = arith.mulf %480, %421 : vector<8x32xf32>
    %492 = arith.addf %490, %491 : vector<8x32xf32>
    %493 = arith.index_cast %461 : i32 to index
    %c0_133 = arith.constant 0 : index
    %494 = vector.load %arg12[%493, %c0_133] : memref<64x96xf32, #tpu.memory_space<vmem>>, vector<8x96xf32>
    %cst_134 = arith.constant dense<0.000000e+00> : vector<8x96xf32>
    %495 = tpu.matmul %452, %24, %cst_134 {dimension_numbers = #tpu.dot_dimension_numbers<[1], [0], [0], [1], [0, 0, 1, 1], [], []>} : vector<8x32xf32>, vector<32x96xf32>, vector<8x96xf32> -> vector<8x96xf32>
    %496 = vector.extract_strided_slice %494 {offsets = [0, 0], sizes = [8, 32], strides = [1, 1]} : vector<8x96xf32> to vector<8x32xf32>
    %497 = vector.extract_strided_slice %495 {offsets = [0, 0], sizes = [8, 32], strides = [1, 1]} : vector<8x96xf32> to vector<8x32xf32>
    %498 = arith.addf %496, %497 : vector<8x32xf32>
    %499 = arith.negf %498 : vector<8x32xf32>
    %500 = math.exp %499 : vector<8x32xf32>
    %cst_135 = arith.constant 1.000000e+00 : f32
    %501 = vector.broadcast %cst_135 : f32 to vector<8x32xf32>
    %502 = arith.addf %501, %500 : vector<8x32xf32>
    %503 = arith.divf %501, %502 : vector<8x32xf32>
    %504 = vector.extract_strided_slice %494 {offsets = [0, 32], sizes = [8, 32], strides = [1, 1]} : vector<8x96xf32> to vector<8x32xf32>
    %505 = vector.extract_strided_slice %495 {offsets = [0, 32], sizes = [8, 32], strides = [1, 1]} : vector<8x96xf32> to vector<8x32xf32>
    %506 = arith.addf %504, %505 : vector<8x32xf32>
    %507 = arith.negf %506 : vector<8x32xf32>
    %508 = math.exp %507 : vector<8x32xf32>
    %cst_136 = arith.constant 1.000000e+00 : f32
    %509 = vector.broadcast %cst_136 : f32 to vector<8x32xf32>
    %510 = arith.addf %509, %508 : vector<8x32xf32>
    %511 = arith.divf %509, %510 : vector<8x32xf32>
    %512 = vector.extract_strided_slice %494 {offsets = [0, 64], sizes = [8, 32], strides = [1, 1]} : vector<8x96xf32> to vector<8x32xf32>
    %513 = vector.extract_strided_slice %495 {offsets = [0, 64], sizes = [8, 32], strides = [1, 1]} : vector<8x96xf32> to vector<8x32xf32>
    %514 = vector.broadcast %28 : vector<1x32xf32> to vector<8x32xf32>
    %515 = arith.addf %513, %514 : vector<8x32xf32>
    %516 = arith.mulf %503, %515 : vector<8x32xf32>
    %517 = arith.addf %512, %516 : vector<8x32xf32>
    %518 = math.tanh %517 : vector<8x32xf32>
    %cst_137 = arith.constant 1.000000e+00 : f32
    %519 = vector.broadcast %cst_137 : f32 to vector<8x32xf32>
    %520 = arith.subf %519, %511 : vector<8x32xf32>
    %521 = arith.mulf %520, %518 : vector<8x32xf32>
    %522 = arith.mulf %511, %452 : vector<8x32xf32>
    %523 = arith.addf %521, %522 : vector<8x32xf32>
    %524 = arith.index_cast %458 : i32 to index
    %c0_138 = arith.constant 0 : index
    %525 = vector.load %arg13[%524, %c0_138] : memref<64x32xf32, #tpu.memory_space<vmem>>, vector<8x32xf32>
    tpu.vector_store %arg13[%524, %c0_138], %492 {strides = array<i32>} : memref<64x32xf32, #tpu.memory_space<vmem>>, vector<8x32xf32>,
    %526 = arith.index_cast %461 : i32 to index
    %c0_139 = arith.constant 0 : index
    %527 = vector.load %arg14[%526, %c0_139] : memref<64x32xf32, #tpu.memory_space<vmem>>, vector<8x32xf32>
    tpu.vector_store %arg14[%526, %c0_139], %523 {strides = array<i32>} : memref<64x32xf32, #tpu.memory_space<vmem>>, vector<8x32xf32>,
    %c7_i32_140 = arith.constant 7 : i32
    %c8_i32_141 = arith.constant 8 : i32
    %528 = arith.muli %c7_i32_140, %c8_i32_141 : i32
    %529 = tpu.assume_multiple %528, 8 : i32
    %c7_i32_142 = arith.constant 7 : i32
    %530 = arith.subi %c7_i32_142, %c7_i32_140 : i32
    %c8_i32_143 = arith.constant 8 : i32
    %531 = arith.muli %530, %c8_i32_143 : i32
    %532 = tpu.assume_multiple %531, 8 : i32
    %533 = arith.index_cast %529 : i32 to index
    %c0_144 = arith.constant 0 : index
    %534 = vector.load %arg11[%533, %c0_144] : memref<64x96xf32, #tpu.memory_space<vmem>>, vector<8x96xf32>
    %cst_145 = arith.constant dense<0.000000e+00> : vector<8x96xf32>
    %535 = tpu.matmul %492, %22, %cst_145 {dimension_numbers = #tpu.dot_dimension_numbers<[1], [0], [0], [1], [0, 0, 1, 1], [], []>} : vector<8x32xf32>, vector<32x96xf32>, vector<8x96xf32> -> vector<8x96xf32>
    %536 = vector.extract_strided_slice %534 {offsets = [0, 0], sizes = [8, 32], strides = [1, 1]} : vector<8x96xf32> to vector<8x32xf32>
    %537 = vector.extract_strided_slice %535 {offsets = [0, 0], sizes = [8, 32], strides = [1, 1]} : vector<8x96xf32> to vector<8x32xf32>
    %538 = arith.addf %536, %537 : vector<8x32xf32>
    %539 = arith.negf %538 : vector<8x32xf32>
    %540 = math.exp %539 : vector<8x32xf32>
    %cst_146 = arith.constant 1.000000e+00 : f32
    %541 = vector.broadcast %cst_146 : f32 to vector<8x32xf32>
    %542 = arith.addf %541, %540 : vector<8x32xf32>
    %543 = arith.divf %541, %542 : vector<8x32xf32>
    %544 = vector.extract_strided_slice %534 {offsets = [0, 32], sizes = [8, 32], strides = [1, 1]} : vector<8x96xf32> to vector<8x32xf32>
    %545 = vector.extract_strided_slice %535 {offsets = [0, 32], sizes = [8, 32], strides = [1, 1]} : vector<8x96xf32> to vector<8x32xf32>
    %546 = arith.addf %544, %545 : vector<8x32xf32>
    %547 = arith.negf %546 : vector<8x32xf32>
    %548 = math.exp %547 : vector<8x32xf32>
    %cst_147 = arith.constant 1.000000e+00 : f32
    %549 = vector.broadcast %cst_147 : f32 to vector<8x32xf32>
    %550 = arith.addf %549, %548 : vector<8x32xf32>
    %551 = arith.divf %549, %550 : vector<8x32xf32>
    %552 = vector.extract_strided_slice %534 {offsets = [0, 64], sizes = [8, 32], strides = [1, 1]} : vector<8x96xf32> to vector<8x32xf32>
    %553 = vector.extract_strided_slice %535 {offsets = [0, 64], sizes = [8, 32], strides = [1, 1]} : vector<8x96xf32> to vector<8x32xf32>
    %554 = vector.broadcast %26 : vector<1x32xf32> to vector<8x32xf32>
    %555 = arith.addf %553, %554 : vector<8x32xf32>
    %556 = arith.mulf %543, %555 : vector<8x32xf32>
    %557 = arith.addf %552, %556 : vector<8x32xf32>
    %558 = math.tanh %557 : vector<8x32xf32>
    %cst_148 = arith.constant 1.000000e+00 : f32
    %559 = vector.broadcast %cst_148 : f32 to vector<8x32xf32>
    %560 = arith.subf %559, %551 : vector<8x32xf32>
    %561 = arith.mulf %560, %558 : vector<8x32xf32>
    %562 = arith.mulf %551, %492 : vector<8x32xf32>
    %563 = arith.addf %561, %562 : vector<8x32xf32>
    %564 = arith.index_cast %532 : i32 to index
    %c0_149 = arith.constant 0 : index
    %565 = vector.load %arg12[%564, %c0_149] : memref<64x96xf32, #tpu.memory_space<vmem>>, vector<8x96xf32>
    %cst_150 = arith.constant dense<0.000000e+00> : vector<8x96xf32>
    %566 = tpu.matmul %523, %24, %cst_150 {dimension_numbers = #tpu.dot_dimension_numbers<[1], [0], [0], [1], [0, 0, 1, 1], [], []>} : vector<8x32xf32>, vector<32x96xf32>, vector<8x96xf32> -> vector<8x96xf32>
    %567 = vector.extract_strided_slice %565 {offsets = [0, 0], sizes = [8, 32], strides = [1, 1]} : vector<8x96xf32> to vector<8x32xf32>
    %568 = vector.extract_strided_slice %566 {offsets = [0, 0], sizes = [8, 32], strides = [1, 1]} : vector<8x96xf32> to vector<8x32xf32>
    %569 = arith.addf %567, %568 : vector<8x32xf32>
    %570 = arith.negf %569 : vector<8x32xf32>
    %571 = math.exp %570 : vector<8x32xf32>
    %cst_151 = arith.constant 1.000000e+00 : f32
    %572 = vector.broadcast %cst_151 : f32 to vector<8x32xf32>
    %573 = arith.addf %572, %571 : vector<8x32xf32>
    %574 = arith.divf %572, %573 : vector<8x32xf32>
    %575 = vector.extract_strided_slice %565 {offsets = [0, 32], sizes = [8, 32], strides = [1, 1]} : vector<8x96xf32> to vector<8x32xf32>
    %576 = vector.extract_strided_slice %566 {offsets = [0, 32], sizes = [8, 32], strides = [1, 1]} : vector<8x96xf32> to vector<8x32xf32>
    %577 = arith.addf %575, %576 : vector<8x32xf32>
    %578 = arith.negf %577 : vector<8x32xf32>
    %579 = math.exp %578 : vector<8x32xf32>
    %cst_152 = arith.constant 1.000000e+00 : f32
    %580 = vector.broadcast %cst_152 : f32 to vector<8x32xf32>
    %581 = arith.addf %580, %579 : vector<8x32xf32>
    %582 = arith.divf %580, %581 : vector<8x32xf32>
    %583 = vector.extract_strided_slice %565 {offsets = [0, 64], sizes = [8, 32], strides = [1, 1]} : vector<8x96xf32> to vector<8x32xf32>
    %584 = vector.extract_strided_slice %566 {offsets = [0, 64], sizes = [8, 32], strides = [1, 1]} : vector<8x96xf32> to vector<8x32xf32>
    %585 = vector.broadcast %28 : vector<1x32xf32> to vector<8x32xf32>
    %586 = arith.addf %584, %585 : vector<8x32xf32>
    %587 = arith.mulf %574, %586 : vector<8x32xf32>
    %588 = arith.addf %583, %587 : vector<8x32xf32>
    %589 = math.tanh %588 : vector<8x32xf32>
    %cst_153 = arith.constant 1.000000e+00 : f32
    %590 = vector.broadcast %cst_153 : f32 to vector<8x32xf32>
    %591 = arith.subf %590, %582 : vector<8x32xf32>
    %592 = arith.mulf %591, %589 : vector<8x32xf32>
    %593 = arith.mulf %582, %523 : vector<8x32xf32>
    %594 = arith.addf %592, %593 : vector<8x32xf32>
    %595 = arith.index_cast %529 : i32 to index
    %c0_154 = arith.constant 0 : index
    %596 = vector.load %arg13[%595, %c0_154] : memref<64x32xf32, #tpu.memory_space<vmem>>, vector<8x32xf32>
    tpu.vector_store %arg13[%595, %c0_154], %563 {strides = array<i32>} : memref<64x32xf32, #tpu.memory_space<vmem>>, vector<8x32xf32>,
    %597 = arith.index_cast %532 : i32 to index
    %c0_155 = arith.constant 0 : index
    %598 = vector.load %arg14[%597, %c0_155] : memref<64x32xf32, #tpu.memory_space<vmem>>, vector<8x32xf32>
    tpu.vector_store %arg14[%597, %c0_155], %594 {strides = array<i32>} : memref<64x32xf32, #tpu.memory_space<vmem>>, vector<8x32xf32>,
    %c8_i32_156 = arith.constant 8 : i32
    %c0_157 = arith.constant 0 : index
    %c0_158 = arith.constant 0 : index
    %599 = vector.load %arg9[%c0_157, %c0_158] : memref<8x32xf32, #tpu.memory_space<vmem>>, vector<8x32xf32>
    tpu.vector_store %arg9[%c0_157, %c0_158], %563 {strides = array<i32>} : memref<8x32xf32, #tpu.memory_space<vmem>>, vector<8x32xf32>,
    %c0_159 = arith.constant 0 : index
    %c0_160 = arith.constant 0 : index
    %600 = vector.load %arg10[%c0_159, %c0_160] : memref<8x32xf32, #tpu.memory_space<vmem>>, vector<8x32xf32>
    tpu.vector_store %arg10[%c0_159, %c0_160], %594 {strides = array<i32>} : memref<8x32xf32, #tpu.memory_space<vmem>>, vector<8x32xf32>,
    %c0_161 = arith.constant 0 : index
    %c0_162 = arith.constant 0 : index
    %601 = vector.load %arg13[%c0_161, %c0_162] : memref<64x32xf32, #tpu.memory_space<vmem>>, vector<64x32xf32>
    %602 = arith.truncf %601 : vector<64x32xf32> to vector<64x32xbf16>
    %c0_163 = arith.constant 0 : index
    %c0_164 = arith.constant 0 : index
    %603 = vector.load %arg7[%c0_163, %c0_164] : memref<64x32xbf16, #tpu.memory_space<vmem>>, vector<64x32xbf16>
    tpu.vector_store %arg7[%c0_163, %c0_164], %602 {strides = array<i32>} : memref<64x32xbf16, #tpu.memory_space<vmem>>, vector<64x32xbf16>,
    %c0_165 = arith.constant 0 : index
    %c0_166 = arith.constant 0 : index
    %604 = vector.load %arg14[%c0_165, %c0_166] : memref<64x32xf32, #tpu.memory_space<vmem>>, vector<64x32xf32>
    %605 = arith.truncf %604 : vector<64x32xf32> to vector<64x32xbf16>
    %c0_167 = arith.constant 0 : index
    %c0_168 = arith.constant 0 : index
    %606 = vector.load %arg8[%c0_167, %c0_168] : memref<64x32xbf16, #tpu.memory_space<vmem>>, vector<64x32xbf16>
    tpu.vector_store %arg8[%c0_167, %c0_168], %605 {strides = array<i32>} : memref<64x32xbf16, #tpu.memory_space<vmem>>, vector<64x32xbf16>,
    return
  }
  func.func @transform_0(%arg0: i32) -> (i32, i32) {
    %c0_i32 = arith.constant 0 : i32
    %c0_i32_0 = arith.constant 0 : i32
    return %arg0, %c0_i32 : i32, i32
  }
  func.func @transform_1(%arg0: i32) -> (i32, i32) {
    %c0_i32 = arith.constant 0 : i32
    %0 = arith.subi %c0_i32, %arg0 : i32
    %c0_i32_0 = arith.constant 0 : i32
    %c0_i32_1 = arith.constant 0 : i32
    return %0, %c0_i32_0 : i32, i32
  }
  func.func @transform_2(%arg0: i32) -> (i32, i32, i32) {
    %c0_i32 = arith.constant 0 : i32
    %c0_i32_0 = arith.constant 0 : i32
    %c0_i32_1 = arith.constant 0 : i32
    %c0_i32_2 = arith.constant 0 : i32
    return %c0_i32, %c0_i32_0, %c0_i32_1 : i32, i32, i32
  }
  func.func @transform_3(%arg0: i32) -> (i32, i32, i32) {
    %c0_i32 = arith.constant 0 : i32
    %c0_i32_0 = arith.constant 0 : i32
    %c0_i32_1 = arith.constant 0 : i32
    %c0_i32_2 = arith.constant 0 : i32
    return %c0_i32, %c0_i32_0, %c0_i32_1 : i32, i32, i32
  }
  func.func @transform_4(%arg0: i32) -> (i32, i32, i32) {
    %c0_i32 = arith.constant 0 : i32
    %c0_i32_0 = arith.constant 0 : i32
    %c0_i32_1 = arith.constant 0 : i32
    %c0_i32_2 = arith.constant 0 : i32
    return %c0_i32, %c0_i32_0, %c0_i32_1 : i32, i32, i32
  }
  func.func @transform_5(%arg0: i32) -> (i32, i32, i32) {
    %c0_i32 = arith.constant 0 : i32
    %c0_i32_0 = arith.constant 0 : i32
    %c0_i32_1 = arith.constant 0 : i32
    %c0_i32_2 = arith.constant 0 : i32
    return %c0_i32, %c0_i32_0, %c0_i32_1 : i32, i32, i32
  }
  func.func @transform_6(%arg0: i32) -> (i32, i32) {
    %c0_i32 = arith.constant 0 : i32
    %c0_i32_0 = arith.constant 0 : i32
    return %arg0, %c0_i32 : i32, i32
  }
  func.func @transform_7(%arg0: i32) -> (i32, i32) {
    %c0_i32 = arith.constant 0 : i32
    %0 = arith.subi %c0_i32, %arg0 : i32
    %c0_i32_0 = arith.constant 0 : i32
    %c0_i32_1 = arith.constant 0 : i32
    return %0, %c0_i32_0 : i32, i32
  }
}

module attributes {stable_mosaic.version = 11 : i64} {
  func.func @vocab_kernel(%arg0: i32, %arg1: memref<8x32xbf16, #tpu.memory_space<vmem>>, %arg2: memref<32x128xbf16, #tpu.memory_space<vmem>>, %arg3: memref<1x128xf32, #tpu.memory_space<vmem>>, %arg4: memref<8x128xf32, #tpu.memory_space<vmem>>) attributes {dimension_semantics = [#tpu.dimension_semantics<parallel>], iteration_bounds = array<i64: 1>, scalar_prefetch = 0 : i64, scratch_operands = 0 : i64, tpu.core_type = #tpu.core_type<tc>, window_params = [{pipeline_mode = #tpu.pipeline_mode<synchronous>, transform_indices = @transform_0, window_bounds = array<i64: 8, 32>}, {transform_indices = @transform_1, window_bounds = array<i64: 32, 128>}, {transform_indices = @transform_2, window_bounds = array<i64: 1, 128>}, {transform_indices = @transform_3, window_bounds = array<i64: 8, 128>}]} {
    %c0 = arith.constant 0 : index
    %c0_0 = arith.constant 0 : index
    %0 = vector.load %arg1[%c0, %c0_0] : memref<8x32xbf16, #tpu.memory_space<vmem>>, vector<8x32xbf16>
    %c0_1 = arith.constant 0 : index
    %c0_2 = arith.constant 0 : index
    %1 = vector.load %arg2[%c0_1, %c0_2] : memref<32x128xbf16, #tpu.memory_space<vmem>>, vector<32x128xbf16>
    %cst = arith.constant dense<0.000000e+00> : vector<8x128xf32>
    %2 = tpu.matmul %0, %1, %cst {dimension_numbers = #tpu.dot_dimension_numbers<[1], [0], [0], [1], [0, 0, 1, 1], [], []>} : vector<8x32xbf16>, vector<32x128xbf16>, vector<8x128xf32> -> vector<8x128xf32>
    %c0_3 = arith.constant 0 : index
    %c0_4 = arith.constant 0 : index
    %3 = vector.load %arg3[%c0_3, %c0_4] : memref<1x128xf32, #tpu.memory_space<vmem>>, vector<1x128xf32>
    %4 = vector.broadcast %3 : vector<1x128xf32> to vector<8x128xf32>
    %5 = arith.addf %2, %4 : vector<8x128xf32>
    %c0_5 = arith.constant 0 : index
    %c0_6 = arith.constant 0 : index
    %6 = vector.load %arg4[%c0_5, %c0_6] : memref<8x128xf32, #tpu.memory_space<vmem>>, vector<8x128xf32>
    tpu.vector_store %arg4[%c0_5, %c0_6], %5 {strides = array<i32>} : memref<8x128xf32, #tpu.memory_space<vmem>>, vector<8x128xf32>,
    return
  }
  func.func @transform_0(%arg0: i32) -> (i32, i32) {
    %c0_i32 = arith.constant 0 : i32
    %c0_i32_0 = arith.constant 0 : i32
    %c0_i32_1 = arith.constant 0 : i32
    return %c0_i32, %c0_i32_0 : i32, i32
  }
  func.func @transform_1(%arg0: i32) -> (i32, i32) {
    %c0_i32 = arith.constant 0 : i32
    %c0_i32_0 = arith.constant 0 : i32
    return %c0_i32, %arg0 : i32, i32
  }
  func.func @transform_2(%arg0: i32) -> (i32, i32) {
    %c0_i32 = arith.constant 0 : i32
    %c0_i32_0 = arith.constant 0 : i32
    return %c0_i32, %arg0 : i32, i32
  }
  func.func @transform_3(%arg0: i32) -> (i32, i32) {
    %c0_i32 = arith.constant 0 : i32
    %c0_i32_0 = arith.constant 0 : i32
    return %c0_i32, %arg0 : i32, i32
  }
}

module attributes {stable_mosaic.version = 11 : i64} {
  func.func @latent_kernel(%arg0: i32, %arg1: memref<8x64xf32, #tpu.memory_space<vmem>>, %arg2: memref<8x16xf32, #tpu.memory_space<vmem>>, %arg3: memref<64x16xf32, #tpu.memory_space<vmem>>, %arg4: memref<1x16xf32, #tpu.memory_space<vmem>>, %arg5: memref<64x16xf32, #tpu.memory_space<vmem>>, %arg6: memref<1x16xf32, #tpu.memory_space<vmem>>, %arg7: memref<16x32xf32, #tpu.memory_space<vmem>>, %arg8: memref<1x32xf32, #tpu.memory_space<vmem>>, %arg9: memref<8x16xf32, #tpu.memory_space<vmem>>, %arg10: memref<8x16xf32, #tpu.memory_space<vmem>>, %arg11: memref<8x16xf32, #tpu.memory_space<vmem>>, %arg12: memref<8x32xbf16, #tpu.memory_space<vmem>>) attributes {dimension_semantics = [#tpu.dimension_semantics<arbitrary>], iteration_bounds = array<i64: 1>, scalar_prefetch = 0 : i64, scratch_operands = 0 : i64, tpu.core_type = #tpu.core_type<tc>, window_params = [{pipeline_mode = #tpu.pipeline_mode<synchronous>, transform_indices = @transform_0, window_bounds = array<i64: 8, 64>}, {pipeline_mode = #tpu.pipeline_mode<synchronous>, transform_indices = @transform_1, window_bounds = array<i64: 8, 16>}, {pipeline_mode = #tpu.pipeline_mode<synchronous>, transform_indices = @transform_2, window_bounds = array<i64: 64, 16>}, {pipeline_mode = #tpu.pipeline_mode<synchronous>, transform_indices = @transform_3, window_bounds = array<i64: 1, 16>}, {pipeline_mode = #tpu.pipeline_mode<synchronous>, transform_indices = @transform_4, window_bounds = array<i64: 64, 16>}, {pipeline_mode = #tpu.pipeline_mode<synchronous>, transform_indices = @transform_5, window_bounds = array<i64: 1, 16>}, {pipeline_mode = #tpu.pipeline_mode<synchronous>, transform_indices = @transform_6, window_bounds = array<i64: 16, 32>}, {pipeline_mode = #tpu.pipeline_mode<synchronous>, transform_indices = @transform_7, window_bounds = array<i64: 1, 32>}, {pipeline_mode = #tpu.pipeline_mode<synchronous>, transform_indices = @transform_8, window_bounds = array<i64: 8, 16>}, {pipeline_mode = #tpu.pipeline_mode<synchronous>, transform_indices = @transform_9, window_bounds = array<i64: 8, 16>}, {pipeline_mode = #tpu.pipeline_mode<synchronous>, transform_indices = @transform_10, window_bounds = array<i64: 8, 16>}, {pipeline_mode = #tpu.pipeline_mode<synchronous>, transform_indices = @transform_11, window_bounds = array<i64: 8, 32>}]} {
    %c0 = arith.constant 0 : index
    %c0_0 = arith.constant 0 : index
    %0 = vector.load %arg1[%c0, %c0_0] : memref<8x64xf32, #tpu.memory_space<vmem>>, vector<8x64xf32>
    %c0_1 = arith.constant 0 : index
    %c0_2 = arith.constant 0 : index
    %1 = vector.load %arg3[%c0_1, %c0_2] : memref<64x16xf32, #tpu.memory_space<vmem>>, vector<64x16xf32>
    %cst = arith.constant dense<0.000000e+00> : vector<8x16xf32>
    %2 = tpu.matmul %0, %1, %cst {dimension_numbers = #tpu.dot_dimension_numbers<[1], [0], [0], [1], [0, 0, 1, 1], [], []>} : vector<8x64xf32>, vector<64x16xf32>, vector<8x16xf32> -> vector<8x16xf32>
    %c0_3 = arith.constant 0 : index
    %c0_4 = arith.constant 0 : index
    %3 = vector.load %arg4[%c0_3, %c0_4] : memref<1x16xf32, #tpu.memory_space<vmem>>, vector<1x16xf32>
    %4 = vector.broadcast %3 : vector<1x16xf32> to vector<8x16xf32>
    %5 = arith.addf %2, %4 : vector<8x16xf32>
    %c0_5 = arith.constant 0 : index
    %c0_6 = arith.constant 0 : index
    %6 = vector.load %arg5[%c0_5, %c0_6] : memref<64x16xf32, #tpu.memory_space<vmem>>, vector<64x16xf32>
    %cst_7 = arith.constant dense<0.000000e+00> : vector<8x16xf32>
    %7 = tpu.matmul %0, %6, %cst_7 {dimension_numbers = #tpu.dot_dimension_numbers<[1], [0], [0], [1], [0, 0, 1, 1], [], []>} : vector<8x64xf32>, vector<64x16xf32>, vector<8x16xf32> -> vector<8x16xf32>
    %c0_8 = arith.constant 0 : index
    %c0_9 = arith.constant 0 : index
    %8 = vector.load %arg6[%c0_8, %c0_9] : memref<1x16xf32, #tpu.memory_space<vmem>>, vector<1x16xf32>
    %9 = vector.broadcast %8 : vector<1x16xf32> to vector<8x16xf32>
    %10 = arith.addf %7, %9 : vector<8x16xf32>
    %c0_10 = arith.constant 0 : index
    %c0_11 = arith.constant 0 : index
    %11 = vector.load %arg2[%c0_10, %c0_11] : memref<8x16xf32, #tpu.memory_space<vmem>>, vector<8x16xf32>
    %cst_12 = arith.constant 5.000000e-01 : f32
    %12 = vector.broadcast %cst_12 : f32 to vector<8x16xf32>
    %13 = arith.mulf %12, %10 : vector<8x16xf32>
    %14 = math.exp %13 : vector<8x16xf32>
    %15 = arith.mulf %11, %14 : vector<8x16xf32>
    %16 = arith.addf %15, %5 : vector<8x16xf32>
    %c0_13 = arith.constant 0 : index
    %c0_14 = arith.constant 0 : index
    %17 = vector.load %arg7[%c0_13, %c0_14] : memref<16x32xf32, #tpu.memory_space<vmem>>, vector<16x32xf32>
    %cst_15 = arith.constant dense<0.000000e+00> : vector<8x32xf32>
    %18 = tpu.matmul %16, %17, %cst_15 {dimension_numbers = #tpu.dot_dimension_numbers<[1], [0], [0], [1], [0, 0, 1, 1], [], []>} : vector<8x16xf32>, vector<16x32xf32>, vector<8x32xf32> -> vector<8x32xf32>
    %c0_16 = arith.constant 0 : index
    %c0_17 = arith.constant 0 : index
    %19 = vector.load %arg8[%c0_16, %c0_17] : memref<1x32xf32, #tpu.memory_space<vmem>>, vector<1x32xf32>
    %20 = vector.broadcast %19 : vector<1x32xf32> to vector<8x32xf32>
    %21 = arith.addf %18, %20 : vector<8x32xf32>
    %c0_18 = arith.constant 0 : index
    %c0_19 = arith.constant 0 : index
    %22 = vector.load %arg9[%c0_18, %c0_19] : memref<8x16xf32, #tpu.memory_space<vmem>>, vector<8x16xf32>
    tpu.vector_store %arg9[%c0_18, %c0_19], %5 {strides = array<i32>} : memref<8x16xf32, #tpu.memory_space<vmem>>, vector<8x16xf32>,
    %c0_20 = arith.constant 0 : index
    %c0_21 = arith.constant 0 : index
    %23 = vector.load %arg10[%c0_20, %c0_21] : memref<8x16xf32, #tpu.memory_space<vmem>>, vector<8x16xf32>
    tpu.vector_store %arg10[%c0_20, %c0_21], %10 {strides = array<i32>} : memref<8x16xf32, #tpu.memory_space<vmem>>, vector<8x16xf32>,
    %c0_22 = arith.constant 0 : index
    %c0_23 = arith.constant 0 : index
    %24 = vector.load %arg11[%c0_22, %c0_23] : memref<8x16xf32, #tpu.memory_space<vmem>>, vector<8x16xf32>
    tpu.vector_store %arg11[%c0_22, %c0_23], %16 {strides = array<i32>} : memref<8x16xf32, #tpu.memory_space<vmem>>, vector<8x16xf32>,
    %25 = arith.truncf %21 : vector<8x32xf32> to vector<8x32xbf16>
    %c0_24 = arith.constant 0 : index
    %c0_25 = arith.constant 0 : index
    %26 = vector.load %arg12[%c0_24, %c0_25] : memref<8x32xbf16, #tpu.memory_space<vmem>>, vector<8x32xbf16>
    tpu.vector_store %arg12[%c0_24, %c0_25], %25 {strides = array<i32>} : memref<8x32xbf16, #tpu.memory_space<vmem>>, vector<8x32xbf16>,
    return
  }
  func.func @transform_0(%arg0: i32) -> (i32, i32) {
    %c0_i32 = arith.constant 0 : i32
    %c0_i32_0 = arith.constant 0 : i32
    %c0_i32_1 = arith.constant 0 : i32
    return %c0_i32, %c0_i32_0 : i32, i32
  }
  func.func @transform_1(%arg0: i32) -> (i32, i32) {
    %c0_i32 = arith.constant 0 : i32
    %c0_i32_0 = arith.constant 0 : i32
    %c0_i32_1 = arith.constant 0 : i32
    return %c0_i32, %c0_i32_0 : i32, i32
  }
  func.func @transform_2(%arg0: i32) -> (i32, i32) {
    %c0_i32 = arith.constant 0 : i32
    %c0_i32_0 = arith.constant 0 : i32
    %c0_i32_1 = arith.constant 0 : i32
    return %c0_i32, %c0_i32_0 : i32, i32
  }
  func.func @transform_3(%arg0: i32) -> (i32, i32) {
    %c0_i32 = arith.constant 0 : i32
    %c0_i32_0 = arith.constant 0 : i32
    %c0_i32_1 = arith.constant 0 : i32
    return %c0_i32, %c0_i32_0 : i32, i32
  }
  func.func @transform_4(%arg0: i32) -> (i32, i32) {
    %c0_i32 = arith.constant 0 : i32
    %c0_i32_0 = arith.constant 0 : i32
    %c0_i32_1 = arith.constant 0 : i32
    return %c0_i32, %c0_i32_0 : i32, i32
  }
  func.func @transform_5(%arg0: i32) -> (i32, i32) {
    %c0_i32 = arith.constant 0 : i32
    %c0_i32_0 = arith.constant 0 : i32
    %c0_i32_1 = arith.constant 0 : i32
    return %c0_i32, %c0_i32_0 : i32, i32
  }
  func.func @transform_6(%arg0: i32) -> (i32, i32) {
    %c0_i32 = arith.constant 0 : i32
    %c0_i32_0 = arith.constant 0 : i32
    %c0_i32_1 = arith.constant 0 : i32
    return %c0_i32, %c0_i32_0 : i32, i32
  }
  func.func @transform_7(%arg0: i32) -> (i32, i32) {
    %c0_i32 = arith.constant 0 : i32
    %c0_i32_0 = arith.constant 0 : i32
    %c0_i32_1 = arith.constant 0 : i32
    return %c0_i32, %c0_i32_0 : i32, i32
  }
  func.func @transform_8(%arg0: i32) -> (i32, i32) {
    %c0_i32 = arith.constant 0 : i32
    %c0_i32_0 = arith.constant 0 : i32
    %c0_i32_1 = arith.constant 0 : i32
    return %c0_i32, %c0_i32_0 : i32, i32
  }
  func.func @transform_9(%arg0: i32) -> (i32, i32) {
    %c0_i32 = arith.constant 0 : i32
    %c0_i32_0 = arith.constant 0 : i32
    %c0_i32_1 = arith.constant 0 : i32
    return %c0_i32, %c0_i32_0 : i32, i32
  }
  func.func @transform_10(%arg0: i32) -> (i32, i32) {
    %c0_i32 = arith.constant 0 : i32
    %c0_i32_0 = arith.constant 0 : i32
    %c0_i32_1 = arith.constant 0 : i32
    return %c0_i32, %c0_i32_0 : i32, i32
  }
  func.func @transform_11(%arg0: i32) -> (i32, i32) {
    %c0_i32 = arith.constant 0 : i32
    %c0_i32_0 = arith.constant 0 : i32
    %c0_i32_1 = arith.constant 0 : i32
    return %c0_i32, %c0_i32_0 : i32, i32
  }
}

</mosaic_0001>

<bundles_post_ra>
// kernel: reviewdi_forward.5
= control target key start
LH: loop header
LB: loop body
LE: loop exit
PB: predicated region body
PF: predicated region fallthrough
CT: control target
= control target key end

     0   :  { %vm36_vm0 = vcmask 261120   ;;  %s105_s1 = inlined_call_operand.vmem [shape: bf16[32,128], index: 1, kind: input, shape index: {}]   ;;  %s106_s2 = inlined_call_operand.vmem [shape: f32[1,128], index: 2, kind: input, shape index: {}]   ;;  %s107_s0 = inlined_call_operand.vmem [shape: bf16[8,32], index: 0, kind: input, shape index: {}]   ;;  %s108_s3 = inlined_call_operand.vmem [shape: f32[8,128], index: 3, kind: output, shape index: {}]  }
   0x1   :  { %v68_v0 = vld [vmem:[%s105_s1 + $0x8] sm:$0xff]  ;;  %v67_v1 = vld [vmem:[%s105_s1] sm:$0xff] }
   0x2   :  { %46 = vmatpush.bf16.msra.mxu0 %v68_v0  ;;  %v15_v2 = vld [vmem:[%s107_s0] sm:$0xf] }
   0x3   :  { %v69_v3 = vld [vmem:[%s106_s2] ss:$0 sm:$0xff] }
   0x6   :  { %47 = vmatpush.bf16.msra.mxu0 %v67_v1 }
   0x9   :  { %66 = vmatmul.msk.bf16.vlgmr.msra.gmra.mxu0 %vm36_vm0, %v15_v2 }
  0x86   :  { %v49_v4 = vpop.f32.mrf.mxu0 }
  0x87   :  { %v50_v5 = vadd.f32 %v69_v3, %v49_v4 }
  0x89   :  { %53 = vst [vmem:[%s108_s3] sm:$0xff] %v50_v5 }
  0x8e   :  { %v51_v6 = vpop.f32.mrf.mxu0 }

// kernel: reviewdi_forward.4
= control target key start
LH: loop header
LB: loop body
LE: loop exit
PB: predicated region body
PF: predicated region fallthrough
CT: control target
= control target key end

     0   :  { %vm46_vm0 = vcmask 523264   ;;  %vm114_vm1 = vcmask 130048   ;;  %vm142_vm2 = vcmask 257024   ;;  %s313_s4 = inlined_call_operand.vmem [shape: f32[64,16], index: 4, kind: input, shape index: {}]   ;;  %s314_s2 = inlined_call_operand.vmem [shape: f32[64,16], index: 2, kind: input, shape index: {}]   ;;  %s315_s5 = inlined_call_operand.vmem [shape: f32[1,16], index: 5, kind: input, shape index: {}]   ;;  %s316_s0 = inlined_call_operand.vmem [shape: f32[8,64], index: 0, kind: input, shape index: {}]   ;;  %s317_s3 = inlined_call_operand.vmem [shape: f32[1,16], index: 3, kind: input, shape index: {}]   ;;  %s318_s7 = inlined_call_operand.vmem [shape: f32[1,32], index: 7, kind: input, shape index: {}]   ;;  %s319_s6 = inlined_call_operand.vmem [shape: f32[16,32], index: 6, kind: input, shape index: {}]   ;;  %s320_s9 = inlined_call_operand.vmem [shape: f32[8,16], index: 9, kind: output, shape index: {1}]   ;;  %s321_s8 = inlined_call_operand.vmem [shape: f32[8,16], index: 8, kind: output, shape index: {0}]   ;;  %s322_s1 = inlined_call_operand.vmem [shape: f32[8,16], index: 1, kind: input, shape index: {}]   ;;  %s323_s10 = inlined_call_operand.vmem [shape: f32[8,16], index: 10, kind: output, shape index: {2}]   ;;  %s324_s11 = inlined_call_operand.vmem [shape: bf16[8,32], index: 11, kind: output, shape index: {3}]  }
   0x1   :  { %v77_v0 = vld [vmem:[%s313_s4 + $0x38] sm:$0xff]  ;;  %v76_v1 = vld [vmem:[%s313_s4 + $0x30] sm:$0xff]  ;;  %v75_v2 = vld [vmem:[%s313_s4 + $0x28] sm:$0xff] }
   0x2   :  { %90 = vmatpush.msra.mxu1 %v77_v0  ;;  %v41_v3 = vld [vmem:[%s314_s2 + $0x38] sm:$0xff]  ;;  %v40_v4 = vld [vmem:[%s314_s2 + $0x30] sm:$0xff]  ;;  %v74_v5 = vld [vmem:[%s313_s4 + $0x20] sm:$0xff] }
   0x3   :  { %58 = vmatpush.msra.mxu0 %v41_v3  ;;  %v39_v6 = vld [vmem:[%s314_s2 + $0x28] sm:$0xff]  ;;  %v73_v7 = vld [vmem:[%s313_s4 + $0x18] sm:$0xff]  ;;  %v38_v8 = vld [vmem:[%s314_s2 + $0x20] sm:$0xff] }
   0x4   :  { %91 = vmatpush.msra.mxu1 %v76_v1  ;;  %v72_v9 = vld [vmem:[%s313_s4 + $0x10] sm:$0xff]  ;;  %v37_v10 = vld [vmem:[%s314_s2 + $0x18] sm:$0xff]  ;;  %v71_v11 = vld [vmem:[%s313_s4 + $0x8] sm:$0xff] }
   0x5   :  { %59 = vmatpush.msra.mxu0 %v40_v4  ;;  %v36_v12 = vld [vmem:[%s314_s2 + $0x10] sm:$0xff]  ;;  %v70_v13 = vld [vmem:[%s313_s4] sm:$0xff]  ;;  %v35_v14 = vld [vmem:[%s314_s2 + $0x8] sm:$0xff] }
   0x6   :  { %92 = vmatpush.msra.mxu1 %v75_v2  ;;  %v33_v15 = vld [vmem:[%s316_s0] sm:$0xff]  ;;  %v109_v17 = vld [vmem:[%s319_s6 + $0x8] sm:$0xff] }
   0x7   :  { %60 = vmatpush.msra.mxu0 %v39_v6  ;;  %v34_v16 = vld [vmem:[%s314_s2] sm:$0xff]  ;;  %132 = vmatpush.msra.mxu2 %v109_v17 }
   0x8   :  { %93 = vmatpush.msra.mxu1 %v74_v5  ;;  %v108_v18 = vld [vmem:[%s319_s6] sm:$0xff] }
   0x9   :  { %61 = vmatpush.msra.mxu0 %v38_v8  ;;  %133 = vmatpush.msra.mxu2 %v108_v18  ;;  %v163_v19 = vld [vmem:[%s315_s5] ss:$0 sm:$0xff] }
   0xa   :  { %94 = vmatpush.msra.mxu1 %v73_v7  ;;  %v164_v20 = vld [vmem:[%s317_s3] ss:$0 sm:$0xff] }
   0xb   :  { %62 = vmatpush.msra.mxu0 %v37_v10  ;;  %v102_v27 = vld [vmem:[%s322_s1] sm:$0xff] }
   0xc   :  { %95 = vmatpush.msra.mxu1 %v72_v9  ;;  %v165_v31 = vld [vmem:[%s318_s7] ss:$0 sm:$0xff] }
   0xd   :  { %63 = vmatpush.msra.mxu0 %v36_v12 }
   0xe   :  { %96 = vmatpush.msra.mxu1 %v71_v11 }
   0xf   :  { %64 = vmatpush.msra.mxu0 %v35_v14 }
  0x10   :  { %97 = vmatpush.msra.mxu1 %v70_v13 }
  0x11   :  { %161 = vmatmul.msk.f32.vlgmr.msra.gmra.mxu1 %vm46_vm0, %v33_v15  ;;  %65 = vmatpush.msra.mxu0 %v34_v16 }
  0x12   :  { %160 = vmatmul.msk.f32.vlgmr.msra.gmra.mxu0 %vm46_vm0, %v33_v15 }
  0x8e   :  { %v99_v21 = vpop.f32.mrf.mxu1 }
  0x8f   :  { %v100_v22 = vadd.f32 %v163_v19, %v99_v21  ;;  %v67_v23 = vpop.f32.mrf.mxu0 }
  0x90   :  { %v68_v25 = vadd.f32 %v164_v20, %v67_v23 }
  0x91   :  { %v103_v24 = vmul.f32 0.5, %v100_v22  ;;  %139 = vst.msk [vmem:[%s320_s9] sm:$0xff] %vm114_vm1, %v100_v22 }
  0x92   :  { %138 = vst.msk [vmem:[%s321_s8] sm:$0xff] %vm114_vm1, %v68_v25 }
  0x93   :  { %v104_v26 = vmul.f32 1.442695, %v103_v24 }
  0x95   :  { %166 = vpow2.f32 %v104_v26 }
  0x9b   :  { %v167_v28 = vpop.eup %166 }
  0x9c   :  { %v106_v29 = vmul.f32 %v167_v28, %v102_v27 }
  0x9e   :  { %v107_v30 = vadd.f32 %v106_v29, %v68_v25 }
  0xa0   :  { %162 = vmatmul.msk.f32.vlgmr.msra.gmra.mxu2 %vm114_vm1, %v107_v30  ;;  %140 = vst.msk [vmem:[%s323_s10] sm:$0xff] %vm114_vm1, %v107_v30 }
 0x123   :  { %v135_v32 = vpop.f32.mrf.mxu2 }
 0x124   :  { %v136_v33 = vadd.f32 %v165_v31, %v135_v32 }
 0x126   :  { %v141_v34 = vpack.c.bf16 %v136_v33, %v136_v33 }
 0x128   :  { %143 = vst.msk [vmem:[%s324_s11] sm:$0xf] %vm142_vm2, %v141_v34 }

// kernel: reviewdi_forward.3
= control target key start
LH: loop header
LB: loop body
LE: loop exit
PB: predicated region body
PF: predicated region fallthrough
CT: control target
= control target key end

     0   :  { %13 = vsyncpa [#allocation9], 0  ;;  %s1767_s27 = smov [#allocation8]   ;;  %s1768_s29 = smov 128   ;;  %s2224_s0 = inlined_call_operand.vmem [shape: bf16[64,32], index: 0, kind: input, shape index: {}, may-alias: {0,1}]   ;;  %s2225_s1 = inlined_call_operand.vmem [shape: bf16[64,32], index: 1, kind: input, shape index: {}, may-alias: {0,1}]   ;;  %s2226_s2 = inlined_call_operand.vmem [shape: bf16[2,32,96], index: 2, kind: input, shape index: {}]   ;;  %s2227_s3 = inlined_call_operand.hbm [shape: f32[2,32,96], index: 3, kind: input, shape index: {}]   ;;  %s2228_s4 = inlined_call_operand.vmem [shape: f32[2,1,96], index: 4, kind: input, shape index: {}]   ;;  %s2229_s5 = inlined_call_operand.vmem [shape: f32[2,1,32], index: 5, kind: input, shape index: {}]   ;;  %s2230_s6 = inlined_call_operand.vmem [shape: bf16[64,32], index: 6, kind: output, shape index: {0}]   ;;  %s2231_s7 = inlined_call_operand.vmem [shape: bf16[64,32], index: 7, kind: output, shape index: {1}]  }
   0x1   :  { %s32_s26 = sshll.u32 %s2227_s3, 4  ;;  %s34_s28 = sshll.u32 %s1767_s27, 4  ;;  %s33_s26 = int_to_ptr.hbm [resolvable:$true] %s32_s26  ;;  %s35_s28 = int_to_ptr.vmem [resolvable:$true] %s34_s28 }
   0x2   :  { %s1769_s30 = smov 8  }
   0x3   :  { %40 = dma.hbm_to_vmem [thread:$0]  %s33_s26, 1024, %s35_s28, [#allocation9], %s1768_s29, %s1768_s29, %s1769_s30  }
   0x4   :  { %1765 = dma.done.wait [#allocation9], 1024  }
   0x5   :  { %1766 = vsyncadd [#allocation9], 4294966272  ;;  %vm82_vm0 = vcmask 261120   ;;  %v1770_v0 = vmov 0.0   ;;  %v1819_v1 = vld [vmem:[#allocation8 + $0x18] sm:$0xff]  ;;  %v1624_v3 = vld [vmem:[%s2226_s2 + $0x18] sm:$0xff] }
   0x6   :  { %83 = vst.msk [vmem:[#allocation2] sm:$0xff] %vm82_vm0, %v1770_v0  ;;  %v1618_v2 = vld [vmem:[%s2226_s2 + $0x8] sm:$0xff]  ;;  %313 = vmatpush.msra.mxu2 %v1819_v1  ;;  %v1828_v4 = vld [vmem:[#allocation8 + $0x10] sm:$0xff]  ;;  %252 = vmatpush.bf16.msra.mxu1 %v1624_v3  ;;  %v1830_v5 = vld [vmem:[#allocation8 + $0x8] sm:$0xff]  ;;  %s1771_s20 = smov 64   ;;  %vm175_vm1 = vcmask 785408  }
   0x7   :  { %84 = vst.msk [vmem:[#allocation3] sm:$0xff] %vm82_vm0, %v1770_v0  ;;  %152 = vmatpush.bf16.msra.mxu0 %v1618_v2  ;;  %v1617_v6 = vld [vmem:[%s2226_s2] sm:$0xff]  ;;  %v1623_v7 = vld [vmem:[%s2226_s2 + $0x10] sm:$0xff]  ;;  %v1841_v9 = vld [vmem:[#allocation8 + $0x38] sm:$0xff]  ;;  %s1773_s9 = smov 96   ;;  %vm1449_vm10 = vcmask 257024  }
   0x8   :  { %314 = vmatpush.msra.mxu2 %v1828_v4  ;;  %v1839_v8 = vld [vmem:[#allocation8] sm:$0xff]  ;;  %386 = vmatpush.msra.mxu3 %v1841_v9  ;;  %v1613_v11 = vld [vmem:[%s2224_s0] sm:$0xff]  ;;  %v1860_v15 = vld [vmem:[#allocation8 + $0x28] sm:$0xff] }
   0x9   :  { %v1849_v12 = vld [vmem:[#allocation8 + $0x30] sm:$0xff]  ;;  %v1867_v16 = vld [vmem:[#allocation8 + $0x20] sm:$0xff]  ;;  %v1620_v19 = vld [vmem:[%s2225_s1 + $0x8] sm:$0xff] }
   0xa   :  { %315 = vmatpush.msra.mxu2 %v1830_v5  ;;  %v1619_v13 = vld [vmem:[%s2225_s1] sm:$0xff]  ;;  %253 = vmatpush.bf16.msra.mxu1 %v1623_v7  ;;  %v1621_v20 = vld [vmem:[%s2225_s1 + $0x10] sm:$0xff]  ;;  %v1622_v21 = vld [vmem:[%s2225_s1 + $0x18] sm:$0xff]  ;;  %s1772_s1 = smov 32  }
   0xb   :  { %v1632_v14 = vld [vmem:[%s2229_s5] ss:$0 sm:$0xff]  ;;  %153 = vmatpush.bf16.msra.mxu0 %v1617_v6  ;;  %387 = vmatpush.msra.mxu3 %v1849_v12  ;;  %v1633_v18 = vld [vmem:[%s2229_s5 + $0x1] ss:$0 sm:$0xff] }
   0xc   :  { %316 = vmatpush.msra.mxu2 %v1839_v8  ;;  %343 = vrot.lane.b32.xlu0 %v1632_v14, %s1771_s20  ;;  %v1910_v22 = vld [vmem:[%s2228_s4] ss:$0 sm:$0xff]  ;;  %v1635_v23 = vld [vmem:[%s2228_s4 + $0x1] ss:$0 sm:$0xff] }
   0xd   :  { %v1843_v10 = vld [vmem:[#allocation2] sm:$0xff]  ;;  %1576 = vmatmul.msk.bf16.vlgmr.msra.gmra.mxu1 %vm82_vm0, %v1619_v13  ;;  %388 = vmatpush.msra.mxu3 %v1860_v15 }
   0xe   :  { %1581 = vmatmul.msk.f32.vlgmr.msra.gmra.mxu2 %vm82_vm0, %v1843_v10  ;;  %1543 = vmatmul.msk.bf16.vlgmr.msra.gmra.mxu0 %vm82_vm0, %v1613_v11  ;;  %v1870_v17 = vld [vmem:[#allocation3] sm:$0xff] }
   0xf   :  { %469 = vmatpush.msrb.mxu2 %v1819_v1  ;;  %389 = vmatpush.msra.mxu3 %v1867_v16 }
  0x10   :  { %1583 = vmatmul.msk.f32.vlgmr.msra.gmra.mxu3 %vm82_vm0, %v1870_v17 }
  0x11   :  { %470 = vmatpush.msrb.mxu2 %v1828_v4  ;;  %533 = vmatpush.msrb.mxu3 %v1841_v9 }
  0x13   :  { %471 = vmatpush.msrb.mxu2 %v1830_v5  ;;  %534 = vmatpush.msrb.mxu3 %v1849_v12 }
  0x14   :  { %416 = vrot.lane.b32.xlu0 %v1633_v18, %s1771_s20 }
  0x15   :  { %472 = vmatpush.msrb.mxu2 %v1839_v8  ;;  %535 = vmatpush.msrb.mxu3 %v1860_v15 }
  0x17   :  { %609 = vmatpush.msra.mxu2 %v1819_v1  ;;  %536 = vmatpush.msrb.mxu3 %v1867_v16 }
  0x19   :  { %610 = vmatpush.msra.mxu2 %v1828_v4  ;;  %673 = vmatpush.msra.mxu3 %v1841_v9 }
  0x1b   :  { %611 = vmatpush.msra.mxu2 %v1830_v5  ;;  %674 = vmatpush.msra.mxu3 %v1849_v12 }
  0x1d   :  { %612 = vmatpush.msra.mxu2 %v1839_v8  ;;  %1577 = vmatmul.msk.bf16.gmra.mxu1 %vm82_vm0, %v1620_v19 }
  0x1e   :  { %675 = vmatpush.msra.mxu3 %v1860_v15 }
  0x20   :  { %676 = vmatpush.msra.mxu3 %v1867_v16 }
  0x2d   :  { %1578 = vmatmul.msk.bf16.gmra.mxu1 %vm82_vm0, %v1621_v20 }
  0x3d   :  { %1579 = vmatmul.msk.bf16.gmra.mxu1 %vm82_vm0, %v1622_v21 }
  0x7e   :  { %v1915_v24 = vpop.permute.xlu0 %343 }
  0x86   :  { %v1922_v33 = vpop.permute.xlu0 %416 }
  0x8a   :  { %v255_v26 = vpop.f32.mrf.mxu1 }
  0x8b   :  { %v155_v25 = vpop.f32.mrf.mxu0  ;;  %v256_v28 = vadd.f32 %v1635_v23, %v255_v26 }
  0x8c   :  { %v156_v27 = vadd.f32 %v1910_v22, %v155_v25 }
  0x8d   :  { %275 = vst.msk [vmem:[#allocation5] sm:$0xff] %vm175_vm1, %v256_v28 }
  0x8e   :  { %176 = vst.msk [vmem:[#allocation4] sm:$0xff] %vm175_vm1, %v156_v27 }
  0x91   :  { %v318_v29 = vpop.f32.mrf.mxu2 }
  0x92   :  { %v346_v30 = vadd.f32 %v1915_v24, %v318_v29  ;;  %v257_v31 = vpop.f32.mrf.mxu1 }
  0x93   :  { %v258_v32 = vadd.f32 %v1635_v23, %v257_v31  ;;  %v391_v34 = vpop.f32.mrf.mxu3  ;;  %v157_v40 = vpop.f32.mrf.mxu0 }
  0x94   :  { %348 = vrot.lane.b32.xlu1 %v346_v30, %s1771_s20  ;;  %v419_v35 = vadd.f32 %v1922_v33, %v391_v34  ;;  %v158_v41 = vadd.f32 %v1910_v22, %v157_v40 }
  0x95   :  { %276 = vst.msk [vmem:[#allocation5 + $0x8] sm:$0xff] %vm175_vm1, %v258_v32  ;;  %v297_v50 = vld [vmem:[#allocation4] sm:$0xff] }
  0x96   :  { %177 = vst.msk [vmem:[#allocation4 + $0x8] sm:$0xff] %vm175_vm1, %v158_v41  ;;  %v321_v51 = vadd.f32 %v318_v29, %v297_v50 }
  0x98   :  { %v1582_v52 = vmul.f32 -1.442695, %v321_v51 }
  0x9a   :  { %v260_v36 = vpop.f32.mrf.mxu1  ;;  %1636 = vpow2.f32 %v1582_v52 }
  0x9b   :  { %v261_v37 = vadd.f32 %v1635_v23, %v260_v36 }
  0x9c   :  { %421 = vrot.lane.b32.xlu1 %v419_v35, %s1771_s20 }
  0x9d   :  { %277 = vst.msk [vmem:[#allocation5 + $0x10] sm:$0xff] %vm175_vm1, %v261_v37 }
  0xa0   :  { %v1637_v56 = vpop.eup %1636 }
  0xa1   :  { %v325_v57 = vadd.f32 1.0, %v1637_v56 }
  0xa2   :  { %v262_v38 = vpop.f32.mrf.mxu1 }
  0xa3   :  { %v263_v39 = vadd.f32 %v1635_v23, %v262_v38  ;;  %v337_v7 = vand.u32 2147483648, %v325_v57  ;;  %vm331_vm3 = vweird.f32 %v325_v57 }
  0xa4   :  { %364 = vrot.lane.b32.xlu1 %v1843_v10, %s1772_s1  ;;  %v335_v10 = vand.u32 2147483647, %v325_v57 }
  0xa5   :  { %278 = vst.msk [vmem:[#allocation5 + $0x18] sm:$0xff] %vm175_vm1, %v263_v39  ;;  %v338_v14 = vor.u32 1.1754944e-38, %v337_v7 }
  0xa6   :  { %vm336_vm5 = vcmp.eq.f32.partialorder %v335_v10, 8.507059e+37 }
  0xaa   :  { %v265_v42 = vpop.f32.mrf.mxu1 }
  0xab   :  { %v266_v43 = vadd.f32 %v1635_v23, %v265_v42 }
  0xad   :  { %279 = vst.msk [vmem:[#allocation5 + $0x20] sm:$0xff] %vm175_vm1, %v266_v43 }
  0xb2   :  { %v267_v44 = vpop.f32.mrf.mxu1 }
  0xb3   :  { %v268_v45 = vadd.f32 %v1635_v23, %v267_v44 }
  0xb5   :  { %280 = vst.msk [vmem:[#allocation5 + $0x28] sm:$0xff] %vm175_vm1, %v268_v45 }
  0xba   :  { %v270_v46 = vpop.f32.mrf.mxu1 }
  0xbb   :  { %v271_v47 = vadd.f32 %v1635_v23, %v270_v46 }
  0xbd   :  { %281 = vst.msk [vmem:[#allocation5 + $0x30] sm:$0xff] %vm175_vm1, %v271_v47 }
  0xc2   :  { %v272_v48 = vpop.f32.mrf.mxu1 }
  0xc3   :  { %v273_v49 = vadd.f32 %v1635_v23, %v272_v48 }
  0xc5   :  { %282 = vst.msk [vmem:[#allocation5 + $0x38] sm:$0xff] %vm175_vm1, %v273_v49 }
  0xcc   :  { %v370_v53 = vld [vmem:[#allocation5 + $0x38] sm:$0xff] }
  0xcd   :  { %v394_v54 = vadd.f32 %v391_v34, %v370_v53 }
  0xcf   :  { %v1584_v55 = vmul.f32 -1.442695, %v394_v54 }
  0xd1   :  { %1638 = vpow2.f32 %v1584_v55 }
  0xd2   :  { %1640 = vrcp.f32 %v325_v57 }
  0xd7   :  { %v1639_v58 = vpop.eup %1638 }
  0xd8   :  { %v398_v59 = vadd.f32 1.0, %v1639_v58  ;;  %v1641_v60 = vpop.eup %1640 }
  0xd9   :  { %v327_v61 = vmul.f32 %v1641_v60, %v325_v57  ;;  %vm332_vm2 = vweird.f32 %v1641_v60 }
  0xda   :  { %1642 = vrcp.f32 %v398_v59  ;;  %vm333_vm4 = vmor %vm331_vm3, %vm332_vm2  ;;  %v410_v23 = vand.u32 2147483648, %v398_v59  ;;  %vm404_vm7 = vweird.f32 %v398_v59  ;;  %v408_v25 = vand.u32 2147483647, %v398_v59 }
  0xdb   :  { %v328_v62 = vsub.f32 1.0, %v327_v61 }
  0xdc   :  { %v411_v27 = vor.u32 1.1754944e-38, %v410_v23  ;;  %vm409_vm9 = vcmp.eq.f32.partialorder %v408_v25, 8.507059e+37 }
  0xdd   :  { %v329_v0 = vmul.f32 %v1641_v60, %v328_v62 }
  0xdf   :  { %v330_v3 = vadd.f32 %v1641_v60, %v329_v0 }
  0xe0   :  { %v1643_v63 = vpop.eup %1642 }
  0xe1   :  { %v400_v2 = vmul.f32 %v1643_v63, %v398_v59  ;;  %v334_v11 = vsel %vm333_vm4, %v1641_v60, %v330_v3  ;;  %vm405_vm6 = vweird.f32 %v1643_v63  ;;  %v518_v59 = vld [vmem:[#allocation5 + $0x30] sm:$0xff] }
  0xe2   :  { %v339_v19 = vsel %vm336_vm5, %v338_v14, %v334_v11  ;;  %vm406_vm8 = vmor %vm404_vm7, %vm405_vm6 }
  0xe3   :  { %v401_v6 = vsub.f32 1.0, %v400_v2  ;;  %v358_v39 = vsub.f32 1.0, %v339_v19 }
  0xe5   :  { %v402_v13 = vmul.f32 %v1643_v63, %v401_v6 }
  0xe7   :  { %v403_v21 = vadd.f32 %v1643_v63, %v402_v13 }
  0xe9   :  { %v407_v26 = vsel %vm406_vm8, %v1643_v63, %v403_v21  ;;  %v454_v63 = vld [vmem:[#allocation4 + $0x8] sm:$0xff] }
  0xea   :  { %v412_v28 = vsel %vm409_vm9, %v411_v27, %v407_v26 }
  0xeb   :  { %v431_v45 = vsub.f32 1.0, %v412_v28 }
 0x106   :  { %v349_v18 = vpop.permute.xlu1 %348 }
 0x107   :  { %v351_v20 = vmul.f32 %v349_v18, %v339_v19 }
 0x109   :  { %353 = vrot.lane.b32.xlu2 %v351_v20, %s1771_s20 }
 0x10e   :  { %v422_v29 = vpop.permute.xlu1 %421 }
 0x10f   :  { %v424_v30 = vmul.f32 %v422_v29, %v412_v28 }
 0x111   :  { %426 = vrot.lane.b32.xlu2 %v424_v30, %s1771_s20 }
 0x116   :  { %v365_v38 = vpop.permute.xlu1 %364 }
 0x117   :  { %v367_v41 = vmul.f32 %v365_v38, %v339_v19 }
 0x163   :  { %v354_v31 = vpop.permute.xlu2 %353 }
 0x164   :  { %v356_v32 = vadd.f32 %v354_v31, %v297_v50 }
 0x166   :  { %1644 = vtanh.f32 %v356_v32 }
 0x16b   :  { %v427_v34 = vpop.permute.xlu2 %426 }
 0x16c   :  { %v1645_v35 = vpop.eup %1644  ;;  %v429_v36 = vadd.f32 %v427_v34, %v370_v53 }
 0x16d   :  { %360 = vrot.lane.b32.xlu0 %v1645_v35, %s1773_s9 }
 0x16e   :  { %1646 = vtanh.f32 %v429_v36 }
 0x174   :  { %v1647_v37 = vpop.eup %1646 }
 0x175   :  { %437 = vrot.lane.b32.xlu0 %v1870_v17, %s1772_s1  ;;  %433 = vrot.lane.b32.xlu2 %v1647_v37, %s1773_s9 }
 0x1cf   :  { %v434_v44 = vpop.permute.xlu2 %433 }
 0x1d0   :  { %v436_v47 = vmul.f32 %v434_v44, %v431_v45 }
 0x1df   :  { %v361_v40 = vpop.permute.xlu0 %360 }
 0x1e0   :  { %v363_v42 = vmul.f32 %v361_v40, %v358_v39 }
 0x1e2   :  { %v1943_v43 = vadd.f32 %v367_v41, %v363_v42 }
 0x1e4   :  { %443 = vrot.lane.b32.xlu1 %v1943_v43, %s1773_s9 }
 0x1e7   :  { %v438_v46 = vpop.permute.xlu0 %437 }
 0x1e8   :  { %v440_v48 = vmul.f32 %v438_v46, %v412_v28 }
 0x1ea   :  { %v1947_v49 = vadd.f32 %v440_v48, %v436_v47 }
 0x1ec   :  { %448 = vrot.lane.b32.xlu2 %v1947_v49, %s1773_s9 }
 0x246   :  { %v449_v17 = vpop.permute.xlu2 %448 }
 0x247   :  { %452 = vst.msk [vmem:[#allocation7 + $0x38] sm:$0xff] %vm82_vm0, %v449_v17  ;;  %1587 = vmatmul.msk.f32.vlgmr.msrb.gmra.mxu3 %vm82_vm0, %v449_v17 }
 0x248   :  { %813 = vmatpush.msrb.mxu3 %v1841_v9 }
 0x24a   :  { %814 = vmatpush.msrb.mxu3 %v1849_v12 }
 0x24c   :  { %815 = vmatpush.msrb.mxu3 %v1860_v15 }
 0x24e   :  { %v1465_v50 = vld [vmem:[#allocation7 + $0x38] sm:$0xff]  ;;  %816 = vmatpush.msrb.mxu3 %v1867_v16 }
 0x24f   :  { %v1473_v51 = vpack.c.bf16 %v1465_v50, %v1465_v50 }
 0x251   :  { %1481 = vst.msk [vmem:[%s2231_s7 + $0x1c] sm:$0xf] %vm1449_vm10, %v1473_v51 }
 0x256   :  { %v444_v52 = vpop.permute.xlu1 %443 }
 0x257   :  { %446 = vst.msk [vmem:[#allocation6] sm:$0xff] %vm82_vm0, %v444_v52  ;;  %1585 = vmatmul.msk.f32.vlgmr.msrb.gmra.mxu2 %vm82_vm0, %v444_v52 }
 0x258   :  { %749 = vmatpush.msrb.mxu2 %v1819_v1 }
 0x25a   :  { %750 = vmatpush.msrb.mxu2 %v1828_v4 }
 0x25c   :  { %751 = vmatpush.msrb.mxu2 %v1830_v5 }
 0x25e   :  { %v1433_v53 = vld [vmem:[#allocation6] sm:$0xff]  ;;  %752 = vmatpush.msrb.mxu2 %v1839_v8 }
 0x25f   :  { %v1441_v54 = vpack.c.bf16 %v1433_v53, %v1433_v53 }
 0x261   :  { %1450 = vst.msk [vmem:[%s2230_s6] sm:$0xf] %vm1449_vm10, %v1441_v54 }
 0x2ca   :  { %v538_v55 = vpop.f32.mrf.mxu3 }
 0x2cb   :  { %v561_v56 = vadd.f32 %v538_v55, %v1922_v33  ;;  %v541_v60 = vadd.f32 %v538_v55, %v518_v59 }
 0x2cd   :  { %563 = vrot.lane.b32.xlu1 %v561_v56, %s1771_s20  ;;  %v1588_v61 = vmul.f32 -1.442695, %v541_v60 }
 0x2cf   :  { %1648 = vpow2.f32 %v1588_v61 }
 0x2d5   :  { %v1649_v62 = vpop.eup %1648 }
 0x2d6   :  { %v545_v2 = vadd.f32 1.0, %v1649_v62 }
 0x2d8   :  { %1650 = vrcp.f32 %v545_v2  ;;  %v557_v20 = vand.u32 2147483648, %v545_v2  ;;  %vm551_vm12 = vweird.f32 %v545_v2  ;;  %v555_v21 = vand.u32 2147483647, %v545_v2 }
 0x2da   :  { %v474_v57 = vpop.f32.mrf.mxu2  ;;  %v558_v26 = vor.u32 1.1754944e-38, %v557_v20  ;;  %vm556_vm14 = vcmp.eq.f32.partialorder %v555_v21, 8.507059e+37 }
 0x2db   :  { %v497_v58 = vadd.f32 %v474_v57, %v1915_v24  ;;  %v477_v0 = vadd.f32 %v474_v57, %v454_v63 }
 0x2dd   :  { %499 = vrot.lane.b32.xlu0 %v497_v58, %s1771_s20  ;;  %v1586_v3 = vmul.f32 -1.442695, %v477_v0 }
 0x2de   :  { %v1651_v6 = vpop.eup %1650 }
 0x2df   :  { %1652 = vpow2.f32 %v1586_v3  ;;  %v547_v10 = vmul.f32 %v1651_v6, %v545_v2  ;;  %vm552_vm11 = vweird.f32 %v1651_v6 }
 0x2e0   :  { %vm553_vm13 = vmor %vm551_vm12, %vm552_vm11 }
 0x2e1   :  { %v548_v13 = vsub.f32 1.0, %v547_v10 }
 0x2e3   :  { %v549_v14 = vmul.f32 %v1651_v6, %v548_v13 }
 0x2e5   :  { %v1653_v7 = vpop.eup %1652  ;;  %v550_v18 = vadd.f32 %v1651_v6, %v549_v14 }
 0x2e6   :  { %v481_v11 = vadd.f32 1.0, %v1653_v7 }
 0x2e7   :  { %v554_v23 = vsel %vm553_vm13, %v1651_v6, %v550_v18 }
 0x2e8   :  { %1654 = vrcp.f32 %v481_v11  ;;  %v559_v28 = vsel %vm556_vm14, %v558_v26, %v554_v23  ;;  %v493_v34 = vand.u32 2147483648, %v481_v11  ;;  %vm487_vm2 = vweird.f32 %v481_v11 }
 0x2e9   :  { %v491_v35 = vand.u32 2147483647, %v481_v11  ;;  %v573_v48 = vsub.f32 1.0, %v559_v28  ;;  %v579_v50 = vmul.f32 %v559_v28, %v1947_v49  ;;  %v1614_v49 = vld [vmem:[%s2224_s0 + $0x8] sm:$0xff] }
 0x2ea   :  { %v494_v37 = vor.u32 1.1754944e-38, %v493_v34  ;;  %1544 = vmatmul.msk.bf16.gmra.mxu0 %vm82_vm0, %v1614_v49 }
 0x2eb   :  { %vm492_vm4 = vcmp.eq.f32.partialorder %v491_v35, 8.507059e+37 }
 0x2ee   :  { %v1655_v19 = vpop.eup %1654 }
 0x2ef   :  { %v483_v25 = vmul.f32 %v1655_v19, %v481_v11  ;;  %vm488_vm15 = vweird.f32 %v1655_v19 }
 0x2f0   :  { %vm489_vm3 = vmor %vm487_vm2, %vm488_vm15 }
 0x2f1   :  { %v484_v30 = vsub.f32 1.0, %v483_v25 }
 0x2f3   :  { %v485_v31 = vmul.f32 %v1655_v19, %v484_v30 }
 0x2f5   :  { %v486_v32 = vadd.f32 %v1655_v19, %v485_v31 }
 0x2f7   :  { %v490_v36 = vsel %vm489_vm3, %v1655_v19, %v486_v32  ;;  %v658_v19 = vld [vmem:[#allocation5 + $0x28] sm:$0xff] }
 0x2f8   :  { %v495_v38 = vsel %vm492_vm4, %v494_v37, %v490_v36 }
 0x2f9   :  { %v509_v53 = vsub.f32 1.0, %v495_v38  ;;  %v515_v55 = vmul.f32 %v495_v38, %v1943_v43 }
 0x33f   :  { %v564_v27 = vpop.permute.xlu1 %563 }
 0x340   :  { %v566_v29 = vmul.f32 %v564_v27, %v559_v28 }
 0x342   :  { %568 = vrot.lane.b32.xlu0 %v566_v29, %s1771_s20 }
 0x34f   :  { %v500_v39 = vpop.permute.xlu0 %499 }
 0x350   :  { %v502_v40 = vmul.f32 %v500_v39, %v495_v38 }
 0x352   :  { %504 = vrot.lane.b32.xlu2 %v502_v40, %s1771_s20 }
 0x3ac   :  { %v505_v41 = vpop.permute.xlu2 %504 }
 0x3ad   :  { %v507_v42 = vadd.f32 %v505_v41, %v454_v63  ;;  %v160_v63 = vpop.f32.mrf.mxu0 }
 0x3ae   :  { %v161_v0 = vadd.f32 %v1910_v22, %v160_v63 }
 0x3af   :  { %1656 = vtanh.f32 %v507_v42 }
 0x3b0   :  { %178 = vst.msk [vmem:[#allocation4 + $0x10] sm:$0xff] %vm175_vm1, %v161_v0 }
 0x3b4   :  { %v569_v44 = vpop.permute.xlu0 %568 }
 0x3b5   :  { %v1657_v45 = vpop.eup %1656  ;;  %v571_v46 = vadd.f32 %v569_v44, %v518_v59  ;;  %v162_v2 = vpop.f32.mrf.mxu0 }
 0x3b6   :  { %511 = vrot.lane.b32.xlu1 %v1657_v45, %s1773_s9  ;;  %v163_v3 = vadd.f32 %v1910_v22, %v162_v2 }
 0x3b7   :  { %1658 = vtanh.f32 %v571_v46  ;;  %v594_v13 = vld [vmem:[#allocation4 + $0x10] sm:$0xff] }
 0x3b8   :  { %179 = vst.msk [vmem:[#allocation4 + $0x18] sm:$0xff] %vm175_vm1, %v163_v3 }
 0x3bd   :  { %v1659_v47 = vpop.eup %1658 }
 0x3be   :  { %575 = vrot.lane.b32.xlu2 %v1659_v47, %s1773_s9 }
 0x418   :  { %v576_v17 = vpop.permute.xlu2 %575 }
 0x419   :  { %v578_v51 = vmul.f32 %v576_v17, %v573_v48 }
 0x41b   :  { %v1980_v52 = vadd.f32 %v579_v50, %v578_v51 }
 0x41d   :  { %588 = vrot.lane.b32.xlu1 %v1980_v52, %s1773_s9 }
 0x428   :  { %v512_v54 = vpop.permute.xlu1 %511 }
 0x429   :  { %v514_v56 = vmul.f32 %v512_v54, %v509_v53 }
 0x42b   :  { %v1985_v57 = vadd.f32 %v515_v55, %v514_v56 }
 0x42d   :  { %582 = vrot.lane.b32.xlu0 %v1985_v57, %s1773_s9 }
 0x48f   :  { %v589_v58 = vpop.permute.xlu1 %588 }
 0x490   :  { %592 = vst.msk [vmem:[#allocation7 + $0x30] sm:$0xff] %vm82_vm0, %v589_v58  ;;  %1591 = vmatmul.msk.f32.vlgmr.msra.gmra.mxu3 %vm82_vm0, %v589_v58 }
 0x491   :  { %953 = vmatpush.msra.mxu3 %v1841_v9 }
 0x493   :  { %954 = vmatpush.msra.mxu3 %v1849_v12 }
 0x495   :  { %955 = vmatpush.msra.mxu3 %v1860_v15 }
 0x497   :  { %v1464_v43 = vld [vmem:[#allocation7 + $0x30] sm:$0xff]  ;;  %956 = vmatpush.msra.mxu3 %v1867_v16 }
 0x498   :  { %v1472_v59 = vpack.c.bf16 %v1464_v43, %v1464_v43 }
 0x49a   :  { %1480 = vst.msk [vmem:[%s2231_s7 + $0x18] sm:$0xf] %vm1449_vm10, %v1472_v59 }
 0x49f   :  { %v583_v60 = vpop.permute.xlu0 %582 }
 0x4a0   :  { %586 = vst.msk [vmem:[#allocation6 + $0x8] sm:$0xff] %vm82_vm0, %v583_v60  ;;  %1589 = vmatmul.msk.f32.vlgmr.msra.gmra.mxu2 %vm82_vm0, %v583_v60 }
 0x4a1   :  { %889 = vmatpush.msra.mxu2 %v1819_v1 }
 0x4a3   :  { %890 = vmatpush.msra.mxu2 %v1828_v4 }
 0x4a5   :  { %891 = vmatpush.msra.mxu2 %v1830_v5 }
 0x4a7   :  { %v1434_v61 = vld [vmem:[#allocation6 + $0x8] sm:$0xff]  ;;  %892 = vmatpush.msra.mxu2 %v1839_v8 }
 0x4a8   :  { %v1442_v62 = vpack.c.bf16 %v1434_v61, %v1434_v61 }
 0x4aa   :  { %1451 = vst.msk [vmem:[%s2230_s6 + $0x4] sm:$0xf] %vm1449_vm10, %v1442_v62 }
 0x513   :  { %v678_v6 = vpop.f32.mrf.mxu3 }
 0x514   :  { %v701_v7 = vadd.f32 %v678_v6, %v1922_v33  ;;  %v681_v20 = vadd.f32 %v678_v6, %v658_v19 }
 0x516   :  { %703 = vrot.lane.b32.xlu0 %v701_v7, %s1771_s20  ;;  %v1592_v21 = vmul.f32 -1.442695, %v681_v20 }
 0x523   :  { %v614_v10 = vpop.f32.mrf.mxu2 }
 0x524   :  { %v637_v11 = vadd.f32 %v614_v10, %v1915_v24  ;;  %v617_v14 = vadd.f32 %v614_v10, %v594_v13 }
 0x526   :  { %639 = vrot.lane.b32.xlu2 %v637_v11, %s1771_s20  ;;  %v1590_v18 = vmul.f32 -1.442695, %v617_v14 }
 0x528   :  { %1660 = vpow2.f32 %v1590_v18 }
 0x529   :  { %1662 = vpow2.f32 %v1592_v21 }
 0x52e   :  { %v1661_v23 = vpop.eup %1660 }
 0x52f   :  { %v621_v25 = vadd.f32 1.0, %v1661_v23  ;;  %v1663_v26 = vpop.eup %1662 }
 0x530   :  { %v685_v27 = vadd.f32 1.0, %v1663_v26 }
 0x531   :  { %1664 = vrcp.f32 %v621_v25  ;;  %v633_v37 = vand.u32 2147483648, %v621_v25  ;;  %vm627_vm6 = vweird.f32 %v621_v25  ;;  %v631_v38 = vand.u32 2147483647, %v621_v25 }
 0x532   :  { %1666 = vrcp.f32 %v685_v27  ;;  %v697_v47 = vand.u32 2147483648, %v685_v27  ;;  %vm691_vm11 = vweird.f32 %v685_v27  ;;  %v695_v48 = vand.u32 2147483647, %v685_v27 }
 0x533   :  { %v634_v41 = vor.u32 1.1754944e-38, %v633_v37  ;;  %vm632_vm8 = vcmp.eq.f32.partialorder %v631_v38, 8.507059e+37 }
 0x534   :  { %v698_v50 = vor.u32 1.1754944e-38, %v697_v47  ;;  %vm696_vm13 = vcmp.eq.f32.partialorder %v695_v48, 8.507059e+37 }
 0x537   :  { %v1665_v28 = vpop.eup %1664 }
 0x538   :  { %v623_v29 = vmul.f32 %v1665_v28, %v621_v25  ;;  %v1667_v31 = vpop.eup %1666  ;;  %vm628_vm5 = vweird.f32 %v1665_v28  ;;  %v798_v25 = vld [vmem:[#allocation5 + $0x20] sm:$0xff] }
 0x539   :  { %v687_v34 = vmul.f32 %v1667_v31, %v685_v27  ;;  %vm629_vm7 = vmor %vm627_vm6, %vm628_vm5  ;;  %vm692_vm9 = vweird.f32 %v1667_v31 }
 0x53a   :  { %v624_v30 = vsub.f32 1.0, %v623_v29  ;;  %vm693_vm12 = vmor %vm691_vm11, %vm692_vm9  ;;  %v734_v29 = vld [vmem:[#allocation4 + $0x18] sm:$0xff] }
 0x53b   :  { %v688_v36 = vsub.f32 1.0, %v687_v34 }
 0x53c   :  { %v625_v32 = vmul.f32 %v1665_v28, %v624_v30 }
 0x53d   :  { %v689_v40 = vmul.f32 %v1667_v31, %v688_v36 }
 0x53e   :  { %v626_v35 = vadd.f32 %v1665_v28, %v625_v32 }
 0x53f   :  { %v690_v46 = vadd.f32 %v1667_v31, %v689_v40 }
 0x540   :  { %v630_v39 = vsel %vm629_vm7, %v1665_v28, %v626_v35 }
 0x541   :  { %v635_v42 = vsel %vm632_vm8, %v634_v41, %v630_v39  ;;  %v694_v17 = vsel %vm693_vm12, %v1667_v31, %v690_v46 }
 0x542   :  { %v699_v53 = vsel %vm696_vm13, %v698_v50, %v694_v17  ;;  %v649_v2 = vsub.f32 1.0, %v635_v42  ;;  %v655_v6 = vmul.f32 %v635_v42, %v1985_v57 }
 0x543   :  { %v713_v60 = vsub.f32 1.0, %v699_v53  ;;  %v719_v62 = vmul.f32 %v699_v53, %v1980_v52 }
 0x580   :  { %v640_v44 = vpop.permute.xlu2 %639 }
 0x581   :  { %v642_v45 = vmul.f32 %v640_v44, %v635_v42 }
 0x583   :  { %644 = vrot.lane.b32.xlu1 %v642_v45, %s1771_s20 }
 0x588   :  { %v704_v51 = vpop.permute.xlu0 %703 }
 0x589   :  { %v706_v54 = vmul.f32 %v704_v51, %v699_v53 }
 0x58b   :  { %708 = vrot.lane.b32.xlu2 %v706_v54, %s1771_s20 }
 0x5e5   :  { %v709_v55 = vpop.permute.xlu2 %708 }
 0x5e6   :  { %v711_v56 = vadd.f32 %v709_v55, %v658_v19 }
 0x5e8   :  { %1668 = vtanh.f32 %v711_v56 }
 0x5ee   :  { %v1669_v49 = vpop.eup %1668 }
 0x5ef   :  { %715 = vrot.lane.b32.xlu1 %v1669_v49, %s1773_s9 }
 0x5f5   :  { %v645_v58 = vpop.permute.xlu1 %644 }
 0x5f6   :  { %v647_v43 = vadd.f32 %v645_v58, %v594_v13 }
 0x5f8   :  { %1670 = vtanh.f32 %v647_v43 }
 0x5fe   :  { %v1671_v59 = vpop.eup %1670 }
 0x5ff   :  { %651 = vrot.lane.b32.xlu0 %v1671_v59, %s1773_s9 }
 0x661   :  { %v716_v61 = vpop.permute.xlu1 %715 }
 0x662   :  { %v718_v63 = vmul.f32 %v716_v61, %v713_v60 }
 0x664   :  { %v2026_v0 = vadd.f32 %v719_v62, %v718_v63 }
 0x666   :  { %728 = vrot.lane.b32.xlu0 %v2026_v0, %s1773_s9 }
 0x671   :  { %v652_v3 = vpop.permute.xlu0 %651 }
 0x672   :  { %v654_v7 = vmul.f32 %v652_v3, %v649_v2 }
 0x674   :  { %v2031_v10 = vadd.f32 %v655_v6, %v654_v7 }
 0x676   :  { %722 = vrot.lane.b32.xlu2 %v2031_v10, %s1773_s9 }
 0x6d0   :  { %v723_v11 = vpop.permute.xlu2 %722 }
 0x6d1   :  { %726 = vst.msk [vmem:[#allocation6 + $0x10] sm:$0xff] %vm82_vm0, %v723_v11  ;;  %1593 = vmatmul.msk.f32.vlgmr.msrb.gmra.mxu2 %vm82_vm0, %v723_v11 }
 0x6d2   :  { %1029 = vmatpush.msrb.mxu2 %v1819_v1 }
 0x6d4   :  { %1030 = vmatpush.msrb.mxu2 %v1828_v4 }
 0x6d6   :  { %1031 = vmatpush.msrb.mxu2 %v1830_v5 }
 0x6d8   :  { %v1435_v52 = vld [vmem:[#allocation6 + $0x10] sm:$0xff]  ;;  %v729_v13 = vpop.permute.xlu0 %728  ;;  %1032 = vmatpush.msrb.mxu2 %v1839_v8 }
 0x6d9   :  { %v1443_v57 = vpack.c.bf16 %v1435_v52, %v1435_v52  ;;  %732 = vst.msk [vmem:[#allocation7 + $0x28] sm:$0xff] %vm82_vm0, %v729_v13  ;;  %1595 = vmatmul.msk.f32.vlgmr.msrb.gmra.mxu3 %vm82_vm0, %v729_v13 }
 0x6da   :  { %1093 = vmatpush.msrb.mxu3 %v1841_v9 }
 0x6db   :  { %1452 = vst.msk [vmem:[%s2230_s6 + $0x8] sm:$0xf] %vm1449_vm10, %v1443_v57 }
 0x6dc   :  { %1094 = vmatpush.msrb.mxu3 %v1849_v12 }
 0x6de   :  { %1095 = vmatpush.msrb.mxu3 %v1860_v15 }
 0x6e0   :  { %v1463_v14 = vld [vmem:[#allocation7 + $0x28] sm:$0xff]  ;;  %1096 = vmatpush.msrb.mxu3 %v1867_v16 }
 0x6e1   :  { %v1471_v18 = vpack.c.bf16 %v1463_v14, %v1463_v14 }
 0x6e3   :  { %1479 = vst.msk [vmem:[%s2231_s7 + $0x14] sm:$0xf] %vm1449_vm10, %v1471_v18 }
 0x754   :  { %v754_v19 = vpop.f32.mrf.mxu2 }
 0x755   :  { %v777_v20 = vadd.f32 %v754_v19, %v1915_v24  ;;  %v757_v30 = vadd.f32 %v754_v19, %v734_v29 }
 0x757   :  { %779 = vrot.lane.b32.xlu1 %v777_v20, %s1771_s20  ;;  %v1594_v32 = vmul.f32 -1.442695, %v757_v30 }
 0x75c   :  { %v818_v21 = vpop.f32.mrf.mxu3 }
 0x75d   :  { %v841_v23 = vadd.f32 %v818_v21, %v1922_v33  ;;  %v821_v26 = vadd.f32 %v818_v21, %v798_v25 }
 0x75f   :  { %843 = vrot.lane.b32.xlu2 %v841_v23, %s1771_s20  ;;  %v1596_v27 = vmul.f32 -1.442695, %v821_v26 }
 0x761   :  { %1672 = vpow2.f32 %v1596_v27 }
 0x767   :  { %v1673_v28 = vpop.eup %1672 }
 0x768   :  { %v825_v31 = vadd.f32 1.0, %v1673_v28 }
 0x76a   :  { %1674 = vrcp.f32 %v825_v31  ;;  %v837_v42 = vand.u32 2147483648, %v825_v31  ;;  %vm831_vm15 = vweird.f32 %v825_v31  ;;  %v835_v44 = vand.u32 2147483647, %v825_v31 }
 0x76b   :  { %1676 = vpow2.f32 %v1594_v32 }
 0x76c   :  { %v838_v47 = vor.u32 1.1754944e-38, %v837_v42  ;;  %vm836_vm3 = vcmp.eq.f32.partialorder %v835_v44, 8.507059e+37 }
 0x770   :  { %v1675_v34 = vpop.eup %1674 }
 0x771   :  { %v1677_v35 = vpop.eup %1676  ;;  %v827_v36 = vmul.f32 %v1675_v34, %v825_v31  ;;  %vm832_vm14 = vweird.f32 %v1675_v34 }
 0x772   :  { %v761_v37 = vadd.f32 1.0, %v1677_v35  ;;  %vm833_vm2 = vmor %vm831_vm15, %vm832_vm14 }
 0x773   :  { %v828_v38 = vsub.f32 1.0, %v827_v36 }
 0x774   :  { %1678 = vrcp.f32 %v761_v37  ;;  %v773_v55 = vand.u32 2147483648, %v761_v37  ;;  %vm767_vm5 = vweird.f32 %v761_v37  ;;  %v771_v56 = vand.u32 2147483647, %v761_v37 }
 0x775   :  { %v829_v39 = vmul.f32 %v1675_v34, %v828_v38 }
 0x776   :  { %v774_v58 = vor.u32 1.1754944e-38, %v773_v55  ;;  %vm772_vm7 = vcmp.eq.f32.partialorder %v771_v56, 8.507059e+37 }
 0x777   :  { %v830_v40 = vadd.f32 %v1675_v34, %v829_v39 }
 0x779   :  { %v834_v45 = vsel %vm833_vm2, %v1675_v34, %v830_v40 }
 0x77a   :  { %v1679_v41 = vpop.eup %1678  ;;  %v839_v48 = vsel %vm836_vm3, %v838_v47, %v834_v45 }
 0x77b   :  { %v763_v46 = vmul.f32 %v1679_v41, %v761_v37  ;;  %vm768_vm4 = vweird.f32 %v1679_v41  ;;  %v853_v14 = vsub.f32 1.0, %v839_v48  ;;  %v859_v19 = vmul.f32 %v839_v48, %v2026_v0 }
 0x77c   :  { %vm769_vm6 = vmor %vm767_vm5, %vm768_vm4 }
 0x77d   :  { %v764_v51 = vsub.f32 1.0, %v763_v46 }
 0x77f   :  { %v765_v53 = vmul.f32 %v1679_v41, %v764_v51 }
 0x781   :  { %v766_v54 = vadd.f32 %v1679_v41, %v765_v53 }
 0x783   :  { %v770_v49 = vsel %vm769_vm6, %v1679_v41, %v766_v54 }
 0x784   :  { %v775_v59 = vsel %vm772_vm7, %v774_v58, %v770_v49 }
 0x785   :  { %v789_v7 = vsub.f32 1.0, %v775_v59  ;;  %v795_v52 = vmul.f32 %v775_v59, %v2031_v10  ;;  %v1615_v10 = vld [vmem:[%s2224_s0 + $0x10] sm:$0xff] }
 0x786   :  { %1545 = vmatmul.msk.bf16.gmra.mxu0 %vm82_vm0, %v1615_v10 }
 0x7b9   :  { %v844_v17 = vpop.permute.xlu2 %843 }
 0x7ba   :  { %v846_v50 = vmul.f32 %v844_v17, %v839_v48 }
 0x7bc   :  { %848 = vrot.lane.b32.xlu1 %v846_v50, %s1771_s20 }
 0x7c9   :  { %v780_v43 = vpop.permute.xlu1 %779 }
 0x7ca   :  { %v782_v60 = vmul.f32 %v780_v43, %v775_v59 }
 0x7cc   :  { %784 = vrot.lane.b32.xlu0 %v782_v60, %s1771_s20 }
 0x82e   :  { %v849_v61 = vpop.permute.xlu1 %848 }
 0x82f   :  { %v851_v62 = vadd.f32 %v849_v61, %v798_v25 }
 0x831   :  { %1680 = vtanh.f32 %v851_v62 }
 0x837   :  { %v1681_v63 = vpop.eup %1680 }
 0x838   :  { %855 = vrot.lane.b32.xlu0 %v1681_v63, %s1773_s9 }
 0x83e   :  { %v785_v2 = vpop.permute.xlu0 %784 }
 0x83f   :  { %v787_v3 = vadd.f32 %v785_v2, %v734_v29  ;;  %v938_v29 = vld [vmem:[#allocation5 + $0x18] sm:$0xff] }
 0x841   :  { %1682 = vtanh.f32 %v787_v3 }
 0x847   :  { %v1683_v6 = vpop.eup %1682 }
 0x848   :  { %791 = vrot.lane.b32.xlu2 %v1683_v6, %s1773_s9 }
 0x8a2   :  { %v792_v11 = vpop.permute.xlu2 %791 }
 0x8a3   :  { %v794_v13 = vmul.f32 %v792_v11, %v789_v7 }
 0x8a5   :  { %v2064_v57 = vadd.f32 %v795_v52, %v794_v13 }
 0x8a7   :  { %862 = vrot.lane.b32.xlu1 %v2064_v57, %s1773_s9 }
 0x8aa   :  { %v856_v18 = vpop.permute.xlu0 %855 }
 0x8ab   :  { %v858_v20 = vmul.f32 %v856_v18, %v853_v14 }
 0x8ad   :  { %v2069_v21 = vadd.f32 %v859_v19, %v858_v20 }
 0x8af   :  { %868 = vrot.lane.b32.xlu2 %v2069_v21, %s1773_s9 }
 0x909   :  { %v869_v23 = vpop.permute.xlu2 %868 }
 0x90a   :  { %872 = vst.msk [vmem:[#allocation7 + $0x20] sm:$0xff] %vm82_vm0, %v869_v23  ;;  %1599 = vmatmul.msk.f32.vlgmr.msra.gmra.mxu3 %vm82_vm0, %v869_v23 }
 0x90b   :  { %1233 = vmatpush.msra.mxu3 %v1841_v9 }
 0x90d   :  { %1234 = vmatpush.msra.mxu3 %v1849_v12 }
 0x90f   :  { %1235 = vmatpush.msra.mxu3 %v1860_v15  ;;  %v165_v15 = vpop.f32.mrf.mxu0 }
 0x911   :  { %v1462_v0 = vld [vmem:[#allocation7 + $0x20] sm:$0xff]  ;;  %1236 = vmatpush.msra.mxu3 %v1867_v16  ;;  %v166_v16 = vadd.f32 %v1910_v22, %v165_v15  ;;  %v1734_v15 = vld [vmem:[#allocation8 + $0x28] sm:$0xff] }
 0x912   :  { %v1470_v25 = vpack.c.bf16 %v1462_v0, %v1462_v0 }
 0x913   :  { %180 = vst.msk [vmem:[#allocation4 + $0x20] sm:$0xff] %vm175_vm1, %v166_v16 }
 0x914   :  { %1478 = vst.msk [vmem:[%s2231_s7 + $0x10] sm:$0xf] %vm1449_vm10, %v1470_v25 }
 0x917   :  { %v167_v27 = vpop.f32.mrf.mxu0 }
 0x919   :  { %v863_v26 = vpop.permute.xlu1 %862 }
 0x91a   :  { %866 = vst.msk [vmem:[#allocation6 + $0x18] sm:$0xff] %vm82_vm0, %v863_v26  ;;  %1597 = vmatmul.msk.f32.vlgmr.msra.gmra.mxu2 %vm82_vm0, %v863_v26  ;;  %v874_v32 = vld [vmem:[#allocation4 + $0x20] sm:$0xff] }
 0x91b   :  { %1169 = vmatpush.msra.mxu2 %v1819_v1  ;;  %v168_v1 = vadd.f32 %v1910_v22, %v167_v27  ;;  %v1735_v27 = vld [vmem:[#allocation8 + $0x20] sm:$0xff] }
 0x91d   :  { %1170 = vmatpush.msra.mxu2 %v1828_v4  ;;  %181 = vst.msk [vmem:[#allocation4 + $0x28] sm:$0xff] %vm175_vm1, %v168_v1 }
 0x91f   :  { %1171 = vmatpush.msra.mxu2 %v1830_v5 }
 0x921   :  { %v1436_v9 = vld [vmem:[#allocation6 + $0x18] sm:$0xff]  ;;  %1172 = vmatpush.msra.mxu2 %v1839_v8 }
 0x922   :  { %v1444_v12 = vpack.c.bf16 %v1436_v9, %v1436_v9 }
 0x924   :  { %1453 = vst.msk [vmem:[%s2230_s6 + $0xc] sm:$0xf] %vm1449_vm10, %v1444_v12  ;;  %v1733_v12 = vld [vmem:[#allocation8 + $0x30] sm:$0xff] }
 0x98d   :  { %v958_v4 = vpop.f32.mrf.mxu3 }
 0x98e   :  { %v981_v5 = vadd.f32 %v958_v4, %v1922_v33  ;;  %v961_v30 = vadd.f32 %v958_v4, %v938_v29  ;;  %v1736_v4 = vld [vmem:[#allocation8 + $0x18] sm:$0xff] }
 0x990   :  { %983 = vrot.lane.b32.xlu1 %v981_v5, %s1771_s20  ;;  %v1600_v31 = vmul.f32 -1.442695, %v961_v30  ;;  %v1737_v5 = vld [vmem:[#allocation8 + $0x10] sm:$0xff] }
 0x992   :  { %1684 = vpow2.f32 %v1600_v31 }
 0x998   :  { %v1685_v34 = vpop.eup %1684 }
 0x999   :  { %v965_v22 = vadd.f32 1.0, %v1685_v34 }
 0x99b   :  { %1686 = vrcp.f32 %v965_v22  ;;  %v977_v46 = vand.u32 2147483648, %v965_v22  ;;  %vm971_vm9 = vweird.f32 %v965_v22  ;;  %v975_v47 = vand.u32 2147483647, %v965_v22 }
 0x99d   :  { %v894_v8 = vpop.f32.mrf.mxu2  ;;  %v978_v50 = vor.u32 1.1754944e-38, %v977_v46  ;;  %vm976_vm12 = vcmp.eq.f32.partialorder %v975_v47, 8.507059e+37 }
 0x99e   :  { %v917_v28 = vadd.f32 %v894_v8, %v1915_v24  ;;  %v897_v35 = vadd.f32 %v894_v8, %v874_v32  ;;  %v1738_v8 = vld [vmem:[#allocation8 + $0x8] sm:$0xff] }
 0x9a0   :  { %919 = vrot.lane.b32.xlu0 %v917_v28, %s1771_s20  ;;  %v1598_v36 = vmul.f32 -1.442695, %v897_v35 }
 0x9a1   :  { %v1687_v37 = vpop.eup %1686 }
 0x9a2   :  { %1688 = vpow2.f32 %v1598_v36  ;;  %v967_v39 = vmul.f32 %v1687_v37, %v965_v22  ;;  %vm972_vm8 = vweird.f32 %v1687_v37  ;;  %v1014_v22 = vld [vmem:[#allocation4 + $0x28] sm:$0xff] }
 0x9a3   :  { %vm973_vm11 = vmor %vm971_vm9, %vm972_vm8 }
 0x9a4   :  { %v968_v41 = vsub.f32 1.0, %v967_v39 }
 0x9a6   :  { %v969_v42 = vmul.f32 %v1687_v37, %v968_v41 }
 0x9a8   :  { %v1689_v38 = vpop.eup %1688  ;;  %v970_v44 = vadd.f32 %v1687_v37, %v969_v42 }
 0x9a9   :  { %v901_v40 = vadd.f32 1.0, %v1689_v38  ;;  %v1078_v38 = vld [vmem:[#allocation5 + $0x10] sm:$0xff] }
 0x9aa   :  { %v974_v48 = vsel %vm973_vm11, %v1687_v37, %v970_v44 }
 0x9ab   :  { %1690 = vrcp.f32 %v901_v40  ;;  %v979_v53 = vsel %vm976_vm12, %v978_v50, %v974_v48  ;;  %v913_v58 = vand.u32 2147483648, %v901_v40  ;;  %vm907_vm14 = vweird.f32 %v901_v40 }
 0x9ac   :  { %v911_v43 = vand.u32 2147483647, %v901_v40  ;;  %v993_v13 = vsub.f32 1.0, %v979_v53  ;;  %v999_v18 = vmul.f32 %v979_v53, %v2069_v21  ;;  %v1732_v21 = vld [vmem:[#allocation8 + $0x38] sm:$0xff] }
 0x9ad   :  { %v914_v60 = vor.u32 1.1754944e-38, %v913_v58 }
 0x9ae   :  { %vm912_vm2 = vcmp.eq.f32.partialorder %v911_v43, 8.507059e+37 }
 0x9b1   :  { %v1691_v45 = vpop.eup %1690 }
 0x9b2   :  { %v903_v17 = vmul.f32 %v1691_v45, %v901_v40  ;;  %vm908_vm13 = vweird.f32 %v1691_v45 }
 0x9b3   :  { %vm909_vm15 = vmor %vm907_vm14, %vm908_vm13 }
 0x9b4   :  { %v904_v55 = vsub.f32 1.0, %v903_v17 }
 0x9b6   :  { %v905_v56 = vmul.f32 %v1691_v45, %v904_v55 }
 0x9b8   :  { %v906_v49 = vadd.f32 %v1691_v45, %v905_v56 }
 0x9ba   :  { %v910_v59 = vsel %vm909_vm15, %v1691_v45, %v906_v49 }
 0x9bb   :  { %v915_v62 = vsel %vm912_vm2, %v914_v60, %v910_v59 }
 0x9bc   :  { %v929_v10 = vsub.f32 1.0, %v915_v62  ;;  %v935_v0 = vmul.f32 %v915_v62, %v2064_v57 }
 0xa02   :  { %v984_v51 = vpop.permute.xlu1 %983 }
 0xa03   :  { %v986_v54 = vmul.f32 %v984_v51, %v979_v53 }
 0xa05   :  { %988 = vrot.lane.b32.xlu0 %v986_v54, %s1771_s20 }
 0xa12   :  { %v920_v61 = vpop.permute.xlu0 %919 }
 0xa13   :  { %v922_v63 = vmul.f32 %v920_v61, %v915_v62 }
 0xa15   :  { %924 = vrot.lane.b32.xlu2 %v922_v63, %s1771_s20 }
 0xa6f   :  { %v925_v2 = vpop.permute.xlu2 %924 }
 0xa70   :  { %v927_v3 = vadd.f32 %v925_v2, %v874_v32 }
 0xa72   :  { %1692 = vtanh.f32 %v927_v3 }
 0xa77   :  { %v989_v6 = vpop.permute.xlu0 %988 }
 0xa78   :  { %v1693_v7 = vpop.eup %1692  ;;  %v991_v11 = vadd.f32 %v989_v6, %v938_v29  ;;  %v1739_v29 = vld [vmem:[#allocation8] sm:$0xff] }
 0xa79   :  { %931 = vrot.lane.b32.xlu1 %v1693_v7, %s1773_s9 }
 0xa7a   :  { %1694 = vtanh.f32 %v991_v11 }
 0xa80   :  { %v1695_v52 = vpop.eup %1694 }
 0xa81   :  { %995 = vrot.lane.b32.xlu2 %v1695_v52, %s1773_s9 }
 0xadb   :  { %v996_v14 = vpop.permute.xlu2 %995 }
 0xadc   :  { %v998_v19 = vmul.f32 %v996_v14, %v993_v13 }
 0xade   :  { %v2110_v20 = vadd.f32 %v999_v18, %v998_v19 }
 0xae0   :  { %1008 = vrot.lane.b32.xlu1 %v2110_v20, %s1773_s9 }
 0xaeb   :  { %v932_v23 = vpop.permute.xlu1 %931 }
 0xaec   :  { %v934_v25 = vmul.f32 %v932_v23, %v929_v10 }
 0xaee   :  { %v2115_v26 = vadd.f32 %v935_v0, %v934_v25  ;;  %v1616_v0 = vld [vmem:[%s2224_s0 + $0x18] sm:$0xff] }
 0xaef   :  { %1546 = vmatmul.msk.bf16.gmra.mxu0 %vm82_vm0, %v1616_v0 }
 0xaf0   :  { %1002 = vrot.lane.b32.xlu0 %v2115_v26, %s1773_s9 }
 0xb52   :  { %v1009_v9 = vpop.permute.xlu1 %1008 }
 0xb53   :  { %1012 = vst.msk [vmem:[#allocation7 + $0x18] sm:$0xff] %vm82_vm0, %v1009_v9  ;;  %1603 = vmatmul.msk.f32.vlgmr.msrb.gmra.mxu3 %vm82_vm0, %v1009_v9 }
 0xb54   :  { %1372 = vmatpush.msrb.mxu3 %v1732_v21 }
 0xb56   :  { %1373 = vmatpush.msrb.mxu3 %v1733_v12 }
 0xb58   :  { %1374 = vmatpush.msrb.mxu3 %v1734_v15 }
 0xb5a   :  { %v1461_v16 = vld [vmem:[#allocation7 + $0x18] sm:$0xff]  ;;  %1375 = vmatpush.msrb.mxu3 %v1735_v27 }
 0xb5b   :  { %v1469_v57 = vpack.c.bf16 %v1461_v16, %v1461_v16 }
 0xb5d   :  { %1477 = vst.msk [vmem:[%s2231_s7 + $0xc] sm:$0xf] %vm1449_vm10, %v1469_v57 }
 0xb62   :  { %v1003_v1 = vpop.permute.xlu0 %1002 }
 0xb63   :  { %1006 = vst.msk [vmem:[#allocation6 + $0x20] sm:$0xff] %vm82_vm0, %v1003_v1  ;;  %1601 = vmatmul.msk.f32.vlgmr.msrb.gmra.mxu2 %vm82_vm0, %v1003_v1 }
 0xb64   :  { %1309 = vmatpush.msrb.mxu2 %v1736_v4 }
 0xb66   :  { %1310 = vmatpush.msrb.mxu2 %v1737_v5 }
 0xb68   :  { %1311 = vmatpush.msrb.mxu2 %v1738_v8  ;;  %v1740_v8 = vld [vmem:[%s2228_s4] ss:$0 sm:$0xff] }
 0xb6a   :  { %v1437_v28 = vld [vmem:[#allocation6 + $0x20] sm:$0xff]  ;;  %1312 = vmatpush.msrb.mxu2 %v1739_v29 }
 0xb6b   :  { %v1445_v30 = vpack.c.bf16 %v1437_v28, %v1437_v28 }
 0xb6d   :  { %1454 = vst.msk [vmem:[%s2230_s6 + $0x10] sm:$0xf] %vm1449_vm10, %v1445_v30 }
 0xbd6   :  { %v1098_v31 = vpop.f32.mrf.mxu3 }
 0xbd7   :  { %v1121_v32 = vadd.f32 %v1098_v31, %v1922_v33  ;;  %v1101_v39 = vadd.f32 %v1098_v31, %v1078_v38 }
 0xbd9   :  { %1123 = vrot.lane.b32.xlu0 %v1121_v32, %s1771_s20  ;;  %v1604_v40 = vmul.f32 -1.442695, %v1101_v39  ;;  %v1218_v39 = vld [vmem:[#allocation5 + $0x8] sm:$0xff] }
 0xbe6   :  { %v1034_v34 = vpop.f32.mrf.mxu2 }
 0xbe7   :  { %v1057_v35 = vadd.f32 %v1034_v34, %v1915_v24  ;;  %v1037_v36 = vadd.f32 %v1034_v34, %v1014_v22 }
 0xbe9   :  { %1059 = vrot.lane.b32.xlu2 %v1057_v35, %s1771_s20  ;;  %v1602_v37 = vmul.f32 -1.442695, %v1037_v36 }
 0xbeb   :  { %1696 = vpow2.f32 %v1602_v37 }
 0xbec   :  { %1698 = vpow2.f32 %v1604_v40 }
 0xbf1   :  { %v1697_v41 = vpop.eup %1696 }
 0xbf2   :  { %v1041_v42 = vadd.f32 1.0, %v1697_v41  ;;  %v1699_v44 = vpop.eup %1698 }
 0xbf3   :  { %v1105_v45 = vadd.f32 1.0, %v1699_v44 }
 0xbf4   :  { %1700 = vrcp.f32 %v1041_v42  ;;  %v1053_v55 = vand.u32 2147483648, %v1041_v42  ;;  %vm1047_vm4 = vweird.f32 %v1041_v42  ;;  %v1051_v56 = vand.u32 2147483647, %v1041_v42 }
 0xbf5   :  { %1702 = vrcp.f32 %v1105_v45  ;;  %v1117_v63 = vand.u32 2147483648, %v1105_v45  ;;  %vm1111_vm8 = vweird.f32 %v1105_v45  ;;  %v1115_v2 = vand.u32 2147483647, %v1105_v45 }
 0xbf6   :  { %v1054_v43 = vor.u32 1.1754944e-38, %v1053_v55  ;;  %vm1052_vm6 = vcmp.eq.f32.partialorder %v1051_v56, 8.507059e+37 }
 0xbf7   :  { %v1118_v6 = vor.u32 1.1754944e-38, %v1117_v63  ;;  %vm1116_vm11 = vcmp.eq.f32.partialorder %v1115_v2, 8.507059e+37 }
 0xbfa   :  { %v1701_v46 = vpop.eup %1700 }
 0xbfb   :  { %v1043_v47 = vmul.f32 %v1701_v46, %v1041_v42  ;;  %v1703_v17 = vpop.eup %1702  ;;  %vm1048_vm3 = vweird.f32 %v1701_v46 }
 0xbfc   :  { %v1107_v51 = vmul.f32 %v1703_v17, %v1105_v45  ;;  %vm1049_vm5 = vmor %vm1047_vm4, %vm1048_vm3  ;;  %vm1112_vm7 = vweird.f32 %v1703_v17 }
 0xbfd   :  { %v1044_v48 = vsub.f32 1.0, %v1043_v47  ;;  %vm1113_vm9 = vmor %vm1111_vm8, %vm1112_vm7 }
 0xbfe   :  { %v1108_v54 = vsub.f32 1.0, %v1107_v51 }
 0xbff   :  { %v1045_v50 = vmul.f32 %v1701_v46, %v1044_v48 }
 0xc00   :  { %v1109_v58 = vmul.f32 %v1703_v17, %v1108_v54 }
 0xc01   :  { %v1046_v53 = vadd.f32 %v1701_v46, %v1045_v50 }
 0xc02   :  { %v1110_v62 = vadd.f32 %v1703_v17, %v1109_v58 }
 0xc03   :  { %v1050_v49 = vsel %vm1049_vm5, %v1701_v46, %v1046_v53 }
 0xc04   :  { %v1055_v59 = vsel %vm1052_vm6, %v1054_v43, %v1050_v49  ;;  %v1114_v3 = vsel %vm1113_vm9, %v1703_v17, %v1110_v62 }
 0xc05   :  { %v1119_v11 = vsel %vm1116_vm11, %v1118_v6, %v1114_v3  ;;  %v1069_v16 = vsub.f32 1.0, %v1055_v59  ;;  %v1075_v57 = vmul.f32 %v1055_v59, %v2115_v26 }
 0xc06   :  { %v1133_v25 = vsub.f32 1.0, %v1119_v11  ;;  %v1139_v21 = vmul.f32 %v1119_v11, %v2110_v20  ;;  %v170_v20 = vpop.f32.mrf.mxu0 }
 0xc07   :  { %v171_v28 = vadd.f32 %v1740_v8, %v170_v20 }
 0xc09   :  { %182 = vst.msk [vmem:[#allocation4 + $0x30] sm:$0xff] %vm175_vm1, %v171_v28 }
 0xc0e   :  { %v172_v34 = vpop.f32.mrf.mxu0 }
 0xc0f   :  { %v173_v35 = vadd.f32 %v1740_v8, %v172_v34 }
 0xc10   :  { %v1154_v42 = vld [vmem:[#allocation4 + $0x30] sm:$0xff] }
 0xc11   :  { %183 = vst.msk [vmem:[#allocation4 + $0x38] sm:$0xff] %vm175_vm1, %v173_v35 }
 0xc43   :  { %v1060_v60 = vpop.permute.xlu2 %1059 }
 0xc44   :  { %v1062_v61 = vmul.f32 %v1060_v60, %v1055_v59 }
 0xc46   :  { %1064 = vrot.lane.b32.xlu1 %v1062_v61, %s1771_s20 }
 0xc4b   :  { %v1124_v7 = vpop.permute.xlu0 %1123 }
 0xc4c   :  { %v1126_v52 = vmul.f32 %v1124_v7, %v1119_v11 }
 0xc4e   :  { %1128 = vrot.lane.b32.xlu2 %v1126_v52, %s1771_s20 }
 0xca8   :  { %v1129_v13 = vpop.permute.xlu2 %1128 }
 0xca9   :  { %v1131_v14 = vadd.f32 %v1129_v13, %v1078_v38 }
 0xcab   :  { %1704 = vtanh.f32 %v1131_v14 }
 0xcb1   :  { %v1705_v18 = vpop.eup %1704 }
 0xcb2   :  { %1135 = vrot.lane.b32.xlu1 %v1705_v18, %s1773_s9 }
 0xcb8   :  { %v1065_v19 = vpop.permute.xlu1 %1064 }
 0xcb9   :  { %v1067_v10 = vadd.f32 %v1065_v19, %v1014_v22 }
 0xcbb   :  { %1706 = vtanh.f32 %v1067_v10 }
 0xcc1   :  { %v1707_v23 = vpop.eup %1706 }
 0xcc2   :  { %1071 = vrot.lane.b32.xlu0 %v1707_v23, %s1773_s9 }
 0xd24   :  { %v1136_v9 = vpop.permute.xlu1 %1135 }
 0xd25   :  { %v1138_v12 = vmul.f32 %v1136_v9, %v1133_v25 }
 0xd27   :  { %v2144_v15 = vadd.f32 %v1139_v21, %v1138_v12 }
 0xd29   :  { %1148 = vrot.lane.b32.xlu0 %v2144_v15, %s1773_s9 }
 0xd34   :  { %v1072_v27 = vpop.permute.xlu0 %1071 }
 0xd35   :  { %v1074_v1 = vmul.f32 %v1072_v27, %v1069_v16 }
 0xd37   :  { %v2149_v4 = vadd.f32 %v1075_v57, %v1074_v1 }
 0xd39   :  { %1142 = vrot.lane.b32.xlu2 %v2149_v4, %s1773_s9 }
 0xd93   :  { %v1143_v5 = vpop.permute.xlu2 %1142 }
 0xd94   :  { %1146 = vst.msk [vmem:[#allocation6 + $0x28] sm:$0xff] %vm82_vm0, %v1143_v5  ;;  %1605 = vmatmul.msk.f32.vlgmr.msra.gmra.mxu2 %vm82_vm0, %v1143_v5 }
 0xd9b   :  { %v1438_v29 = vld [vmem:[#allocation6 + $0x28] sm:$0xff]  ;;  %v1149_v30 = vpop.permute.xlu0 %1148 }
 0xd9c   :  { %v1446_v26 = vpack.c.bf16 %v1438_v29, %v1438_v29  ;;  %1152 = vst.msk [vmem:[#allocation7 + $0x10] sm:$0xff] %vm82_vm0, %v1149_v30  ;;  %1607 = vmatmul.msk.f32.vlgmr.msra.gmra.mxu3 %vm82_vm0, %v1149_v30 }
 0xd9e   :  { %1455 = vst.msk [vmem:[%s2230_s6 + $0x14] sm:$0xf] %vm1449_vm10, %v1446_v26 }
 0xda3   :  { %v1460_v31 = vld [vmem:[#allocation7 + $0x10] sm:$0xff] }
 0xda4   :  { %v1468_v32 = vpack.c.bf16 %v1460_v31, %v1460_v31 }
 0xda6   :  { %1476 = vst.msk [vmem:[%s2231_s7 + $0x8] sm:$0xf] %vm1449_vm10, %v1468_v32 }
 0xe17   :  { %v1174_v22 = vpop.f32.mrf.mxu2 }
 0xe18   :  { %v1197_v36 = vadd.f32 %v1174_v22, %v1915_v24  ;;  %v1177_v45 = vadd.f32 %v1174_v22, %v1154_v42 }
 0xe1a   :  { %1199 = vrot.lane.b32.xlu1 %v1197_v36, %s1771_s20  ;;  %v1606_v47 = vmul.f32 -1.442695, %v1177_v45 }
 0xe1f   :  { %v1238_v37 = vpop.f32.mrf.mxu3 }
 0xe20   :  { %v1261_v38 = vadd.f32 %v1238_v37, %v1922_v33  ;;  %v1241_v40 = vadd.f32 %v1238_v37, %v1218_v39  ;;  %v1357_v37 = vld [vmem:[#allocation5] sm:$0xff] }
 0xe22   :  { %1263 = vrot.lane.b32.xlu2 %v1261_v38, %s1771_s20  ;;  %v1608_v41 = vmul.f32 -1.442695, %v1241_v40 }
 0xe24   :  { %1708 = vpow2.f32 %v1608_v41  ;;  %v1294_v41 = vld [vmem:[#allocation4 + $0x38] sm:$0xff] }
 0xe2a   :  { %v1709_v44 = vpop.eup %1708 }
 0xe2b   :  { %v1245_v46 = vadd.f32 1.0, %v1709_v44 }
 0xe2d   :  { %1710 = vrcp.f32 %v1245_v46  ;;  %v1257_v49 = vand.u32 2147483648, %v1245_v46  ;;  %vm1251_vm12 = vweird.f32 %v1245_v46  ;;  %v1255_v58 = vand.u32 2147483647, %v1245_v46 }
 0xe2e   :  { %1712 = vpow2.f32 %v1606_v47 }
 0xe2f   :  { %v1258_v60 = vor.u32 1.1754944e-38, %v1257_v49  ;;  %vm1256_vm14 = vcmp.eq.f32.partialorder %v1255_v58, 8.507059e+37 }
 0xe33   :  { %v1711_v48 = vpop.eup %1710 }
 0xe34   :  { %v1713_v17 = vpop.eup %1712  ;;  %v1247_v50 = vmul.f32 %v1711_v48, %v1245_v46  ;;  %vm1252_vm1 = vweird.f32 %v1711_v48 }
 0xe35   :  { %v1181_v51 = vadd.f32 1.0, %v1713_v17  ;;  %vm1253_vm13 = vmor %vm1251_vm12, %vm1252_vm1 }
 0xe36   :  { %v1248_v53 = vsub.f32 1.0, %v1247_v50 }
 0xe37   :  { %1714 = vrcp.f32 %v1181_v51  ;;  %v1193_v7 = vand.u32 2147483648, %v1181_v51  ;;  %vm1187_vm2 = vweird.f32 %v1181_v51  ;;  %v1191_v11 = vand.u32 2147483647, %v1181_v51 }
 0xe38   :  { %v1249_v54 = vmul.f32 %v1711_v48, %v1248_v53 }
 0xe39   :  { %v1194_v13 = vor.u32 1.1754944e-38, %v1193_v7  ;;  %vm1192_vm4 = vcmp.eq.f32.partialorder %v1191_v11, 8.507059e+37 }
 0xe3a   :  { %v1250_v55 = vadd.f32 %v1711_v48, %v1249_v54 }
 0xe3c   :  { %v1254_v43 = vsel %vm1253_vm13, %v1711_v48, %v1250_v55 }
 0xe3d   :  { %v1715_v56 = vpop.eup %1714  ;;  %v1259_v61 = vsel %vm1256_vm14, %v1258_v60, %v1254_v43 }
 0xe3e   :  { %v1183_v59 = vmul.f32 %v1715_v56, %v1181_v51  ;;  %vm1188_vm15 = vweird.f32 %v1715_v56  ;;  %v1273_v5 = vsub.f32 1.0, %v1259_v61  ;;  %v1279_v8 = vmul.f32 %v1259_v61, %v2144_v15 }
 0xe3f   :  { %vm1189_vm3 = vmor %vm1187_vm2, %vm1188_vm15 }
 0xe40   :  { %v1184_v2 = vsub.f32 1.0, %v1183_v59 }
 0xe42   :  { %v1185_v3 = vmul.f32 %v1715_v56, %v1184_v2 }
 0xe44   :  { %v1186_v6 = vadd.f32 %v1715_v56, %v1185_v3 }
 0xe46   :  { %v1190_v52 = vsel %vm1189_vm3, %v1715_v56, %v1186_v6 }
 0xe47   :  { %v1195_v18 = vsel %vm1192_vm4, %v1194_v13, %v1190_v52 }
 0xe48   :  { %v1209_v12 = vsub.f32 1.0, %v1195_v18  ;;  %v1215_v27 = vmul.f32 %v1195_v18, %v2149_v4 }
 0xe7c   :  { %v1264_v62 = vpop.permute.xlu2 %1263 }
 0xe7d   :  { %v1266_v63 = vmul.f32 %v1264_v62, %v1259_v61 }
 0xe7f   :  { %1268 = vrot.lane.b32.xlu1 %v1266_v63, %s1771_s20 }
 0xe8c   :  { %v1200_v14 = vpop.permute.xlu1 %1199 }
 0xe8d   :  { %v1202_v19 = vmul.f32 %v1200_v14, %v1195_v18 }
 0xe8f   :  { %1204 = vrot.lane.b32.xlu0 %v1202_v19, %s1771_s20 }
 0xef1   :  { %v1269_v10 = vpop.permute.xlu1 %1268 }
 0xef2   :  { %v1271_v23 = vadd.f32 %v1269_v10, %v1218_v39 }
 0xef4   :  { %1716 = vtanh.f32 %v1271_v23 }
 0xefa   :  { %v1717_v0 = vpop.eup %1716 }
 0xefb   :  { %1275 = vrot.lane.b32.xlu0 %v1717_v0, %s1773_s9 }
 0xf01   :  { %v1205_v25 = vpop.permute.xlu0 %1204 }
 0xf02   :  { %v1207_v9 = vadd.f32 %v1205_v25, %v1154_v42 }
 0xf04   :  { %1718 = vtanh.f32 %v1207_v9 }
 0xf0a   :  { %v1719_v21 = vpop.eup %1718 }
 0xf0b   :  { %1211 = vrot.lane.b32.xlu2 %v1719_v21, %s1773_s9 }
 0xf65   :  { %v1212_v16 = vpop.permute.xlu2 %1211 }
 0xf66   :  { %v1214_v57 = vmul.f32 %v1212_v16, %v1209_v12 }
 0xf68   :  { %v2179_v1 = vadd.f32 %v1215_v27, %v1214_v57 }
 0xf6a   :  { %1282 = vrot.lane.b32.xlu1 %v2179_v1, %s1773_s9 }
 0xf6d   :  { %v1276_v20 = vpop.permute.xlu0 %1275 }
 0xf6e   :  { %v1278_v28 = vmul.f32 %v1276_v20, %v1273_v5 }
 0xf70   :  { %v2184_v29 = vadd.f32 %v1279_v8, %v1278_v28 }
 0xf72   :  { %1288 = vrot.lane.b32.xlu2 %v2184_v29, %s1773_s9 }
 0xfcc   :  { %v1289_v30 = vpop.permute.xlu2 %1288 }
 0xfcd   :  { %1292 = vst.msk [vmem:[#allocation7 + $0x8] sm:$0xff] %vm82_vm0, %v1289_v30  ;;  %1611 = vmatmul.msk.f32.vlgmr.msrb.gmra.mxu3 %vm82_vm0, %v1289_v30 }
 0xfd4   :  { %v1459_v4 = vld [vmem:[#allocation7 + $0x8] sm:$0xff] }
 0xfd5   :  { %v1467_v26 = vpack.c.bf16 %v1459_v4, %v1459_v4 }
 0xfd7   :  { %1475 = vst.msk [vmem:[%s2231_s7 + $0x4] sm:$0xf] %vm1449_vm10, %v1467_v26 }
 0xfdc   :  { %v1283_v31 = vpop.permute.xlu1 %1282 }
 0xfdd   :  { %1286 = vst.msk [vmem:[#allocation6 + $0x30] sm:$0xff] %vm82_vm0, %v1283_v31  ;;  %1609 = vmatmul.msk.f32.vlgmr.msrb.gmra.mxu2 %vm82_vm0, %v1283_v31 }
 0xfe4   :  { %v1439_v15 = vld [vmem:[#allocation6 + $0x30] sm:$0xff] }
 0xfe5   :  { %v1447_v32 = vpack.c.bf16 %v1439_v15, %v1439_v15 }
 0xfe7   :  { %1456 = vst.msk [vmem:[%s2230_s6 + $0x18] sm:$0xf] %vm1449_vm10, %v1447_v32 }
0x1050   :  { %v1377_v34 = vpop.f32.mrf.mxu3 }
0x1051   :  { %v1400_v35 = vadd.f32 %v1377_v34, %v1922_v33  ;;  %v1380_v38 = vadd.f32 %v1377_v34, %v1357_v37 }
0x1053   :  { %1402 = vrot.lane.b32.xlu1 %v1400_v35, %s1771_s20  ;;  %v1612_v39 = vmul.f32 -1.442695, %v1380_v38 }
0x1055   :  { %1720 = vpow2.f32 %v1612_v39 }
0x105b   :  { %v1721_v40 = vpop.eup %1720 }
0x105c   :  { %v1384_v44 = vadd.f32 1.0, %v1721_v40 }
0x105e   :  { %1722 = vrcp.f32 %v1384_v44  ;;  %v1396_v53 = vand.u32 2147483648, %v1384_v44  ;;  %vm1390_vm6 = vweird.f32 %v1384_v44  ;;  %v1394_v54 = vand.u32 2147483647, %v1384_v44 }
0x1060   :  { %v1314_v22 = vpop.f32.mrf.mxu2  ;;  %v1397_v49 = vor.u32 1.1754944e-38, %v1396_v53  ;;  %vm1395_vm8 = vcmp.eq.f32.partialorder %v1394_v54, 8.507059e+37 }
0x1061   :  { %v1337_v36 = vadd.f32 %v1314_v22, %v1915_v24  ;;  %v1317_v42 = vadd.f32 %v1314_v22, %v1294_v41 }
0x1063   :  { %1339 = vrot.lane.b32.xlu0 %v1337_v36, %s1771_s20  ;;  %v1610_v45 = vmul.f32 -1.442695, %v1317_v42 }
0x1064   :  { %v1723_v46 = vpop.eup %1722 }
0x1065   :  { %1724 = vpow2.f32 %v1610_v45  ;;  %v1386_v47 = vmul.f32 %v1723_v46, %v1384_v44  ;;  %vm1391_vm5 = vweird.f32 %v1723_v46 }
0x1066   :  { %vm1392_vm7 = vmor %vm1390_vm6, %vm1391_vm5 }
0x1067   :  { %v1387_v17 = vsub.f32 1.0, %v1386_v47 }
0x1069   :  { %v1388_v24 = vmul.f32 %v1723_v46, %v1387_v17 }
0x106b   :  { %v1725_v33 = vpop.eup %1724  ;;  %v1389_v50 = vadd.f32 %v1723_v46, %v1388_v24 }
0x106c   :  { %v1321_v48 = vadd.f32 1.0, %v1725_v33 }
0x106d   :  { %v1393_v55 = vsel %vm1392_vm7, %v1723_v46, %v1389_v50 }
0x106e   :  { %1726 = vrcp.f32 %v1321_v48  ;;  %v1398_v43 = vsel %vm1395_vm8, %v1397_v49, %v1393_v55  ;;  %v1333_v63 = vand.u32 2147483648, %v1321_v48  ;;  %vm1327_vm11 = vweird.f32 %v1321_v48 }
0x106f   :  { %v1331_v2 = vand.u32 2147483647, %v1321_v48  ;;  %v1412_v0 = vsub.f32 1.0, %v1398_v43  ;;  %v1418_v9 = vmul.f32 %v1398_v43, %v2184_v29 }
0x1070   :  { %v1334_v6 = vor.u32 1.1754944e-38, %v1333_v63 }
0x1071   :  { %vm1332_vm12 = vcmp.eq.f32.partialorder %v1331_v2, 8.507059e+37 }
0x1074   :  { %v1727_v51 = vpop.eup %1726 }
0x1075   :  { %v1323_v56 = vmul.f32 %v1727_v51, %v1321_v48  ;;  %vm1328_vm9 = vweird.f32 %v1727_v51 }
0x1076   :  { %vm1329_vm1 = vmor %vm1327_vm11, %vm1328_vm9 }
0x1077   :  { %v1324_v60 = vsub.f32 1.0, %v1323_v56 }
0x1079   :  { %v1325_v61 = vmul.f32 %v1727_v51, %v1324_v60 }
0x107b   :  { %v1326_v62 = vadd.f32 %v1727_v51, %v1325_v61 }
0x107d   :  { %v1330_v3 = vsel %vm1329_vm1, %v1727_v51, %v1326_v62 }
0x107e   :  { %v1335_v11 = vsel %vm1332_vm12, %v1334_v6, %v1330_v3 }
0x107f   :  { %v1349_v16 = vsub.f32 1.0, %v1335_v11  ;;  %v1355_v57 = vmul.f32 %v1335_v11, %v2179_v1 }
0x10c5   :  { %v1403_v58 = vpop.permute.xlu1 %1402 }
0x10c6   :  { %v1405_v59 = vmul.f32 %v1403_v58, %v1398_v43 }
0x10c8   :  { %1407 = vrot.lane.b32.xlu0 %v1405_v59, %s1771_s20 }
0x10d5   :  { %v1340_v7 = vpop.permute.xlu0 %1339 }
0x10d6   :  { %v1342_v52 = vmul.f32 %v1340_v7, %v1335_v11 }
0x10d8   :  { %1344 = vrot.lane.b32.xlu2 %v1342_v52, %s1771_s20 }
0x1132   :  { %v1345_v13 = vpop.permute.xlu2 %1344 }
0x1133   :  { %v1347_v14 = vadd.f32 %v1345_v13, %v1294_v41 }
0x1135   :  { %1728 = vtanh.f32 %v1347_v14 }
0x113a   :  { %v1408_v18 = vpop.permute.xlu0 %1407 }
0x113b   :  { %v1729_v19 = vpop.eup %1728  ;;  %v1410_v10 = vadd.f32 %v1408_v18, %v1357_v37 }
0x113c   :  { %1351 = vrot.lane.b32.xlu1 %v1729_v19, %s1773_s9 }
0x113d   :  { %1730 = vtanh.f32 %v1410_v10 }
0x1143   :  { %v1731_v23 = vpop.eup %1730 }
0x1144   :  { %1414 = vrot.lane.b32.xlu2 %v1731_v23, %s1773_s9 }
0x119e   :  { %v1415_v25 = vpop.permute.xlu2 %1414 }
0x119f   :  { %v1417_v21 = vmul.f32 %v1415_v25, %v1412_v0 }
0x11a1   :  { %v1419_v12 = vadd.f32 %v1418_v9, %v1417_v21 }
0x11a3   :  { %1427 = vrot.lane.b32.xlu1 %v1419_v12, %s1773_s9 }
0x11ae   :  { %v1352_v27 = vpop.permute.xlu1 %1351 }
0x11af   :  { %v1354_v5 = vmul.f32 %v1352_v27, %v1349_v16 }
0x11b1   :  { %v1356_v20 = vadd.f32 %v1355_v57, %v1354_v5 }
0x11b3   :  { %1421 = vrot.lane.b32.xlu0 %v1356_v20, %s1773_s9 }
0x1215   :  { %v1428_v8 = vpop.permute.xlu1 %1427 }
0x1216   :  { %1430 = vst.msk [vmem:[#allocation7] sm:$0xff] %vm82_vm0, %v1428_v8 }
0x1217   :  { %1432 = vst.msk [vmem:[#allocation3] sm:$0xff] %vm82_vm0, %v1428_v8 }
0x121d   :  { %v1458_v28 = vld [vmem:[#allocation7] sm:$0xff] }
0x121e   :  { %v1466_v30 = vpack.c.bf16 %v1458_v28, %v1458_v28 }
0x1220   :  { %1474 = vst.msk [vmem:[%s2231_s7] sm:$0xf] %vm1449_vm10, %v1466_v30 }
0x1225   :  { %v1422_v29 = vpop.permute.xlu0 %1421 }
0x1226   :  { %1425 = vst.msk [vmem:[#allocation6 + $0x38] sm:$0xff] %vm82_vm0, %v1422_v29 }
0x1227   :  { %1431 = vst.msk [vmem:[#allocation2] sm:$0xff] %vm82_vm0, %v1422_v29 }
0x122d   :  { %v1440_v1 = vld [vmem:[#allocation6 + $0x38] sm:$0xff] }
0x122e   :  { %v1448_v4 = vpack.c.bf16 %v1440_v1, %v1440_v1 }
0x1230   :  { %1457 = vst.msk [vmem:[%s2230_s6 + $0x1c] sm:$0xf] %vm1449_vm10, %v1448_v4 }
0x1231   :  { %1504 = vsyncpa [#allocation9], 1 }

</bundles_post_ra>
